<compile_context>
chip_gen: v7x
topology: tpu7x:2x2x1
jax: 0.10.0
libtpu: 0.0.40
codegen_flags: <defaults>
</compile_context>

<pallas_src>
import functools

import jax
import jax.numpy as jnp
from jax.experimental import pallas as pl
from jax.experimental.pallas import tpu as pltpu


def _round_up(v, m):
    return ((v + m - 1) // m) * m


def _largest_divisor_leq(n, cap):
    best = 1
    for d in range(1, n + 1):
        if n % d == 0 and d <= cap:
            best = d
    return best


# -----------------------------------------------------------------------------
# Pallas kernel: full forward for one batch tile of B_t samples.
# Activation layout: position-major slabs, row index = t * B_t + b.
# -----------------------------------------------------------------------------
def _proposed_model_kernel(L, B_t, CT2, CT3,
                           xcols_ref,
                           w1f, b1f, w2f, b2f, w3f, b3f,
                           wf1, bf1, wf2, bf2, wf3, bf3,
                           out_fc2_ref, out_fc3_ref,
                           x1f, x2f, x3bm):
    f32 = jnp.float32
    bf16 = jnp.bfloat16

    # ---- halo rows ("same" padding) -------------------------------------------
    # Re-zeroed every grid step: with dimension_semantics=("parallel",) each core's
    # scratch starts uninitialized, so a program_id==0 guard would be unsafe.
    zh2 = jnp.zeros((2 * B_t, 192), bf16)
    zh3 = jnp.zeros((3 * B_t, 192), bf16)
    x1f[0:2 * B_t, :] = zh2
    x1f[(L + 2) * B_t:(L + 4) * B_t, :] = zh2
    x2f[0:3 * B_t, :] = zh3
    x2f[(L + 3) * B_t:(L + 6) * B_t, :] = zh3

    rc2 = CT2 * B_t
    rc3 = CT3 * B_t
    b1 = b1f[...]
    b2 = b2f[...]
    b3 = b3f[...]
    w1 = w1f[...]

    # ---- stage 1: fused Conv1d(1 -> 192), K=5, f32 (tiny K, keeps numerics) ----
    for t0 in range(0, L, CT2):
        r0 = t0 * B_t
        s = jnp.dot(xcols_ref[r0:r0 + rc2, :], w1, preferred_element_type=f32)
        x1f[2 * B_t + r0:2 * B_t + r0 + rc2, :] = \
            jnp.maximum(s + b1, 0.0).astype(bf16)

    # ---- stage 2: fused Conv1d(192 -> 192), K=5 --------------------------------
    # Value-level chained dot-add over the 5 taps per position chunk; one fused
    # bias+ReLU+bf16 store per chunk (no scratch RMW, no separate ReLU pass).
    for t0 in range(0, L, CT2):
        r0 = t0 * B_t
        acc = jnp.dot(x1f[r0:r0 + rc2, :], w2f[0], preferred_element_type=f32)
        for j in range(1, 5):
            acc = acc + jnp.dot(x1f[r0 + j * B_t:r0 + j * B_t + rc2, :], w2f[j],
                                preferred_element_type=f32)
        x2f[3 * B_t + r0:3 * B_t + r0 + rc2, :] = \
            jnp.maximum(acc + b2, 0.0).astype(bf16)

    # ---- stage 3: Conv1d(192 -> 64), K=7, batch-major epilogue -----------------
    # The per-position (B_t, 64) activations are stored into a batch-major
    # (B_t, 64*L) buffer so fc1 becomes a single full-K matmul.
    for t0 in range(0, L, CT3):
        r0 = t0 * B_t
        acc = jnp.dot(x2f[r0:r0 + rc3, :], w3f[0], preferred_element_type=f32)
        for j in range(1, 7):
            acc = acc + jnp.dot(x2f[r0 + j * B_t:r0 + j * B_t + rc3, :], w3f[j],
                                preferred_element_type=f32)
        act = jnp.maximum(acc + b3, 0.0).astype(bf16)            # (rc3, 64)
        for p in range(CT3):                                     # position-major -> batch-major
            x3bm[:, (t0 + p) * 64:(t0 + p + 1) * 64] = act[p * B_t:(p + 1) * B_t, :]

    # ---- fc1: ONE (B_t, 64*L) @ (64*L, 256) matmul -----------------------------
    h1 = jnp.dot(x3bm[...], wf1[...], preferred_element_type=f32)
    h1 = jnp.maximum(h1 + bf1[...], 0.0).astype(bf16)

    # ---- fc2 / fc3 (lane-dense (B_t, 128)+ output slabs) -----------------------
    h2 = jnp.maximum(jnp.dot(h1, wf2[...], preferred_element_type=f32) + bf2[...],
                     0.0)
    out_fc2_ref[...] = h2
    out_fc3_ref[...] = jnp.dot(h2.astype(bf16), wf3[...],
                               preferred_element_type=f32) + bf3[...]


# -----------------------------------------------------------------------------
# Parameter init (PyTorch layouts) and conversion to fused kernel layouts.
# -----------------------------------------------------------------------------
def init_params(key, input_dim, num_classes):
    keys = jax.random.split(key, 20)

    def w(k, shape, scale=0.1):
        return (scale * jax.random.normal(k, shape)).astype(jnp.float32)

    p = {}
    p["w1_1"] = w(keys[0], (64, 1, 1));    p["b1_1"] = w(keys[1], (64,), 0.01)
    p["w1_3"] = w(keys[2], (64, 1, 3));    p["b1_3"] = w(keys[3], (64,), 0.01)
    p["w1_5"] = w(keys[4], (64, 1, 5));    p["b1_5"] = w(keys[5], (64,), 0.01)
    p["w2_1"] = w(keys[6], (64, 192, 1));  p["b2_1"] = w(keys[7], (64,), 0.01)
    p["w2_3"] = w(keys[8], (64, 192, 3));  p["b2_3"] = w(keys[9], (64,), 0.01)
    p["w2_5"] = w(keys[10], (64, 192, 5)); p["b2_5"] = w(keys[11], (64,), 0.01)
    p["w3"]   = w(keys[12], (64, 192, 7)); p["b3"]   = w(keys[13], (64,), 0.01)
    p["wfc1"] = w(keys[14], (256, 64 * input_dim), 0.05); p["bfc1"] = w(keys[15], (256,), 0.01)
    p["wfc2"] = w(keys[16], (128, 256), 0.05);            p["bfc2"] = w(keys[17], (128,), 0.01)
    p["wfc3"] = w(keys[18], (num_classes, 128), 0.05);    p["bfc3"] = w(keys[19], (num_classes,), 0.01)
    return p


def _to_kernel_params(p, L, num_classes):
    bf16 = jnp.bfloat16
    f32 = jnp.float32

    def center_pad_taps(w, k_target):
        k = w.shape[0]
        lo = (k_target - k) // 2
        hi = k_target - k - lo
        return jnp.pad(w, [(lo, hi)] + [(0, 0)] * (w.ndim - 1))

    kp = {}
    # stage 1: torch (64, 1, K) -> (K, 64); fuse branches -> (5, 192); keep f32.
    w1 = [center_pad_taps(jnp.transpose(p[f"w1_{k}"][:, 0, :], (1, 0)), 5)
          for k in (1, 3, 5)]
    kp["w1f"] = jnp.concatenate(w1, axis=1).astype(f32)
    kp["b1f"] = jnp.concatenate([p["b1_1"], p["b1_3"], p["b1_5"]])[None, :].astype(f32)
    # stage 2: torch (64, 192, K) -> (K, 192, 64); fuse branches -> (5, 192, 192)
    w2 = [center_pad_taps(jnp.transpose(p[f"w2_{k}"], (2, 1, 0)), 5)
          for k in (1, 3, 5)]
    kp["w2f"] = jnp.concatenate(w2, axis=2).astype(bf16)
    kp["b2f"] = jnp.concatenate([p["b2_1"], p["b2_3"], p["b2_5"]])[None, :].astype(f32)
    # stage 3: torch (64, 192, 7) -> (7, 192, 64)
    kp["w3f"] = jnp.transpose(p["w3"], (2, 1, 0)).astype(bf16)
    kp["b3f"] = p["b3"][None, :].astype(f32)
    # fc1: torch flattens (B, 64, L) channel-major (column c*L + t); our x3 buffer
    # is batch-major with column t*64 + c, so reorder the weight accordingly and
    # flatten it so fc1 is one matmul.
    kp["wf1"] = jnp.transpose(p["wfc1"].reshape(256, 64, L),
                              (2, 1, 0)).reshape(L * 64, 256).astype(bf16)
    kp["bf1"] = p["bfc1"][None, :].astype(f32)
    kp["wf2"] = p["wfc2"].T.astype(bf16)
    kp["bf2"] = p["bfc2"][None, :].astype(f32)
    # fc3: pad the class dim up to 128 lanes (lane-dense output store)
    ncp = max(128, ((num_classes + 127) // 128) * 128)
    wf3 = jnp.zeros((128, ncp), f32).at[:, :num_classes].set(p["wfc3"].T)
    bf3 = jnp.zeros((1, ncp), f32).at[0, :num_classes].set(p["bfc3"])
    kp["wf3"] = wf3.astype(bf16)
    kp["bf3"] = bf3
    return kp


def _build_x_cols(x_pad_batch, L, B_t, G):
    """(B_pad, L) -> position-major im2col (G, L*B_t, 5), kept in f32 for stage 1."""
    xp = jnp.pad(x_pad_batch, ((0, 0), (2, 2)))                      # halo for K=5
    cols = jnp.stack([xp[:, j:j + L] for j in range(5)], axis=-1)    # (B_pad, L, 5)
    cols = cols.reshape(G, B_t, L, 5).transpose(0, 2, 1, 3).reshape(G, L * B_t, 5)
    return cols.astype(jnp.float32)


# -----------------------------------------------------------------------------
# Wrapper: pallas_call with a batch-tiled grid.
# -----------------------------------------------------------------------------
def proposed_model_forward(x, params, *, num_classes, block_b=256):
    B, L = x.shape
    x = x.astype(jnp.float32)

    # ---- adaptive batch tile ---------------------------------------------------
    # per-sample scratch bytes: bf16 x1/x2 slabs (incl. halos) + batch-major x3.
    per_sample = ((L + 4) * 192 + (L + 6) * 192 + 64 * L) * 2
    try:
        vmem_cap = int(getattr(pltpu.get_tpu_info(), "vmem_capacity_bytes",
                               64 * 1024 * 1024))
    except Exception:
        vmem_cap = 64 * 1024 * 1024                      # v7x per-core worst case
    vmem_limit = int(min(vmem_cap * 3 // 4, 96 * 1024 * 1024))
    bt_vmem = max(8, ((vmem_limit // 3) // per_sample) // 8 * 8)
    # keep at least 2 grid steps when the batch allows it (v7x megacore: 2 TCs)
    bt_half = _round_up(max(1, (B + 1) // 2), 8)
    B_t = max(8, min(block_b, bt_vmem, bt_half))
    B_pad = _round_up(B, B_t)
    G = B_pad // B_t

    # position-chunking of the in-kernel tap loops: keep per-chunk accumulators
    # register-sized (~128-256 rows for stage 2, <=512 for stage 3), but bound the
    # number of unrolled chunks so trace/compile time stays sane for large L.
    max_chunks = 64
    ct2_cap = max(1, 256 // B_t, -(-L // max_chunks))
    ct3_cap = max(1, 512 // B_t, -(-L // max_chunks))
    CT2 = _largest_divisor_leq(L, ct2_cap)
    CT3 = _largest_divisor_leq(L, ct3_cap)

    x_p = jnp.pad(x, ((0, B_pad - B), (0, 0)))
    x_cols = _build_x_cols(x_p, L, B_t, G)
    kp = _to_kernel_params(params, L, num_classes)
    ncp = kp["wf3"].shape[1]

    kern_args = [x_cols,
                 kp["w1f"], kp["b1f"], kp["w2f"], kp["b2f"], kp["w3f"], kp["b3f"],
                 kp["wf1"], kp["bf1"], kp["wf2"], kp["bf2"], kp["wf3"], kp["bf3"]]

    def const_spec(a):
        nd = a.ndim
        return pl.BlockSpec(a.shape, lambda i, _nd=nd: (0,) * _nd)

    in_specs = [pl.BlockSpec((None, L * B_t, 5), lambda i: (i, 0, 0))] + \
               [const_spec(a) for a in kern_args[1:]]
    out_shape = (jax.ShapeDtypeStruct((B_pad, 128), jnp.float32),
                 jax.ShapeDtypeStruct((B_pad, ncp), jnp.float32))
    out_specs = (pl.BlockSpec((B_t, 128), lambda i: (i, 0)),
                 pl.BlockSpec((B_t, ncp), lambda i: (i, 0)))

    kernel = functools.partial(_proposed_model_kernel, L, B_t, CT2, CT3)
    h2, h3 = pl.pallas_call(
        kernel,
        grid=(G,),
        in_specs=in_specs,
        out_specs=out_specs,
        out_shape=out_shape,
        scratch_shapes=[pltpu.VMEM(((L + 4) * B_t, 192), jnp.bfloat16),   # x1 slab (+halo)
                        pltpu.VMEM(((L + 6) * B_t, 192), jnp.bfloat16),   # x2 slab (+halo)
                        pltpu.VMEM((B_t, 64 * L), jnp.bfloat16)],         # x3 batch-major
        compiler_params=pltpu.CompilerParams(
            dimension_semantics=("parallel",),
            vmem_limit_bytes=vmem_limit),
    )(*kern_args)
    return h2[:B, :], h3[:B, :num_classes]


# -----------------------------------------------------------------------------
# Pure-JAX reference (PyTorch NCL semantics, highest precision) for verification.
# -----------------------------------------------------------------------------
def reference_forward(x, p):
    relu = lambda v: jnp.maximum(v, 0.0)
    hp = jax.lax.Precision.HIGHEST

    def conv(xin, w, b, pad):  # xin (B, Cin, L), w (Cout, Cin, K)
        K = w.shape[-1]
        Lx = xin.shape[-1]
        xp = jnp.pad(xin, ((0, 0), (0, 0), (pad, pad)))
        cols = jnp.stack([xp[:, :, j:j + Lx] for j in range(K)], axis=-1)  # (B,Cin,L,K)
        return jnp.einsum("bclk,ock->bol", cols, w, precision=hp) + b[None, :, None]

    xc = x[:, None, :]
    x1 = jnp.concatenate([relu(conv(xc, p["w1_1"], p["b1_1"], 0)),
                          relu(conv(xc, p["w1_3"], p["b1_3"], 1)),
                          relu(conv(xc, p["w1_5"], p["b1_5"], 2))], axis=1)
    x2 = jnp.concatenate([relu(conv(x1, p["w2_1"], p["b2_1"], 0)),
                          relu(conv(x1, p["w2_3"], p["b2_3"], 1)),
                          relu(conv(x1, p["w2_5"], p["b2_5"], 2))], axis=1)
    x3 = relu(conv(x2, p["w3"], p["b3"], 3))
    xf = x3.reshape(x.shape[0], -1)
    h1 = relu(jnp.dot(xf, p["wfc1"].T, precision=hp) + p["bfc1"])
    h2 = relu(jnp.dot(h1, p["wfc2"].T, precision=hp) + p["bfc2"])
    h3 = jnp.dot(h2, p["wfc3"].T, precision=hp) + p["bfc3"]
    return h2, h3


if __name__ == "__main__":
    B, input_dim, num_classes = 2, 16, 10
    key = jax.random.PRNGKey(0)
    kx, kparam = jax.random.split(key)
    x = jax.random.normal(kx, (B, input_dim), dtype=jnp.float32)
    params = init_params(kparam, input_dim, num_classes)

    fc2_out, fc3_out = proposed_model_forward(x, params, num_classes=num_classes)
    jax.block_until_ready((fc2_out, fc3_out))

    ref_fc2, ref_fc3 = reference_forward(x, params)
    assert fc2_out.shape == (B, 128) and fc3_out.shape == (B, num_classes)
    assert jnp.allclose(fc2_out, ref_fc2, rtol=2e-2, atol=2e-2), \
        float(jnp.max(jnp.abs(fc2_out - ref_fc2)))
    assert jnp.allclose(fc3_out, ref_fc3, rtol=2e-2, atol=2e-2), \
        float(jnp.max(jnp.abs(fc3_out - ref_fc3)))
    print("KERNEL_OK")
</pallas_src>

<mosaic_0001>
module attributes {stable_mosaic.version = 11 : i64} {
  func.func @_proposed_model_kernel(%arg0: i32, %arg1: memref<1x128x5xf32, #tpu.memory_space<vmem>>, %arg2: memref<5x192xf32, #tpu.memory_space<vmem>>, %arg3: memref<1x192xf32, #tpu.memory_space<vmem>>, %arg4: memref<5x192x192xbf16, #tpu.memory_space<vmem>>, %arg5: memref<1x192xf32, #tpu.memory_space<vmem>>, %arg6: memref<7x192x64xbf16, #tpu.memory_space<vmem>>, %arg7: memref<1x64xf32, #tpu.memory_space<vmem>>, %arg8: memref<1024x256xbf16, #tpu.memory_space<vmem>>, %arg9: memref<1x256xf32, #tpu.memory_space<vmem>>, %arg10: memref<256x128xbf16, #tpu.memory_space<vmem>>, %arg11: memref<1x128xf32, #tpu.memory_space<vmem>>, %arg12: memref<128x128xbf16, #tpu.memory_space<vmem>>, %arg13: memref<1x128xf32, #tpu.memory_space<vmem>>, %arg14: memref<8x128xf32, #tpu.memory_space<vmem>>, %arg15: memref<8x128xf32, #tpu.memory_space<vmem>>, %arg16: memref<160x192xbf16, #tpu.memory_space<vmem>>, %arg17: memref<176x192xbf16, #tpu.memory_space<vmem>>, %arg18: memref<8x1024xbf16, #tpu.memory_space<vmem>>) attributes {dimension_semantics = [#tpu.dimension_semantics<parallel>], iteration_bounds = array<i64: 1>, scalar_prefetch = 0 : i64, scratch_operands = 3 : i64, tpu.core_type = #tpu.core_type<tc>, window_params = [{transform_indices = @transform_0, window_bounds = array<i64: 1, 128, 5>}, {pipeline_mode = #tpu.pipeline_mode<synchronous>, transform_indices = @transform_1, window_bounds = array<i64: 5, 192>}, {pipeline_mode = #tpu.pipeline_mode<synchronous>, transform_indices = @transform_2, window_bounds = array<i64: 1, 192>}, {pipeline_mode = #tpu.pipeline_mode<synchronous>, transform_indices = @transform_3, window_bounds = array<i64: 5, 192, 192>}, {pipeline_mode = #tpu.pipeline_mode<synchronous>, transform_indices = @transform_4, window_bounds = array<i64: 1, 192>}, {pipeline_mode = #tpu.pipeline_mode<synchronous>, transform_indices = @transform_5, window_bounds = array<i64: 7, 192, 64>}, {pipeline_mode = #tpu.pipeline_mode<synchronous>, transform_indices = @transform_6, window_bounds = array<i64: 1, 64>}, {pipeline_mode = #tpu.pipeline_mode<synchronous>, transform_indices = @transform_7, window_bounds = array<i64: 1024, 256>}, {pipeline_mode = #tpu.pipeline_mode<synchronous>, transform_indices = @transform_8, window_bounds = array<i64: 1, 256>}, {pipeline_mode = #tpu.pipeline_mode<synchronous>, transform_indices = @transform_9, window_bounds = array<i64: 256, 128>}, {pipeline_mode = #tpu.pipeline_mode<synchronous>, transform_indices = @transform_10, window_bounds = array<i64: 1, 128>}, {pipeline_mode = #tpu.pipeline_mode<synchronous>, transform_indices = @transform_11, window_bounds = array<i64: 128, 128>}, {pipeline_mode = #tpu.pipeline_mode<synchronous>, transform_indices = @transform_12, window_bounds = array<i64: 1, 128>}, {transform_indices = @transform_13, window_bounds = array<i64: 8, 128>}, {transform_indices = @transform_14, window_bounds = array<i64: 8, 128>}]} {
    %cst = arith.constant 0.000000e+00 : bf16
    %0 = vector.broadcast %cst : bf16 to vector<16x192xbf16>
    %cst_0 = arith.constant 0.000000e+00 : bf16
    %1 = vector.broadcast %cst_0 : bf16 to vector<24x192xbf16>
    %c0 = arith.constant 0 : index
    %c0_1 = arith.constant 0 : index
    %2 = vector.load %arg16[%c0, %c0_1] : memref<160x192xbf16, #tpu.memory_space<vmem>>, vector<16x192xbf16>
    tpu.vector_store %arg16[%c0, %c0_1], %0 {strides = array<i32>} : memref<160x192xbf16, #tpu.memory_space<vmem>>, vector<16x192xbf16>,
    %c144 = arith.constant 144 : index
    %c0_2 = arith.constant 0 : index
    %3 = vector.load %arg16[%c144, %c0_2] : memref<160x192xbf16, #tpu.memory_space<vmem>>, vector<16x192xbf16>
    tpu.vector_store %arg16[%c144, %c0_2], %0 {strides = array<i32>} : memref<160x192xbf16, #tpu.memory_space<vmem>>, vector<16x192xbf16>,
    %c0_3 = arith.constant 0 : index
    %c0_4 = arith.constant 0 : index
    %4 = vector.load %arg17[%c0_3, %c0_4] : memref<176x192xbf16, #tpu.memory_space<vmem>>, vector<24x192xbf16>
    tpu.vector_store %arg17[%c0_3, %c0_4], %1 {strides = array<i32>} : memref<176x192xbf16, #tpu.memory_space<vmem>>, vector<24x192xbf16>,
    %c152 = arith.constant 152 : index
    %c0_5 = arith.constant 0 : index
    %5 = vector.load %arg17[%c152, %c0_5] : memref<176x192xbf16, #tpu.memory_space<vmem>>, vector<24x192xbf16>
    tpu.vector_store %arg17[%c152, %c0_5], %1 {strides = array<i32>} : memref<176x192xbf16, #tpu.memory_space<vmem>>, vector<24x192xbf16>,
    %c0_6 = arith.constant 0 : index
    %c0_7 = arith.constant 0 : index
    %6 = vector.load %arg3[%c0_6, %c0_7] : memref<1x192xf32, #tpu.memory_space<vmem>>, vector<1x192xf32>
    %c0_8 = arith.constant 0 : index
    %c0_9 = arith.constant 0 : index
    %7 = vector.load %arg5[%c0_8, %c0_9] : memref<1x192xf32, #tpu.memory_space<vmem>>, vector<1x192xf32>
    %c0_10 = arith.constant 0 : index
    %c0_11 = arith.constant 0 : index
    %8 = vector.load %arg7[%c0_10, %c0_11] : memref<1x64xf32, #tpu.memory_space<vmem>>, vector<1x64xf32>
    %c0_12 = arith.constant 0 : index
    %c0_13 = arith.constant 0 : index
    %9 = vector.load %arg2[%c0_12, %c0_13] : memref<5x192xf32, #tpu.memory_space<vmem>>, vector<5x192xf32>
    %c0_14 = arith.constant 0 : index
    %c0_15 = arith.constant 0 : index
    %c0_16 = arith.constant 0 : index
    %10 = vector.load %arg1[%c0_14, %c0_15, %c0_16] : memref<1x128x5xf32, #tpu.memory_space<vmem>>, vector<1x128x5xf32>
    %11 = vector.shape_cast %10 : vector<1x128x5xf32> to vector<128x5xf32>
    %cst_17 = arith.constant dense<0.000000e+00> : vector<128x192xf32>
    %12 = tpu.matmul %11, %9, %cst_17 {dimension_numbers = #tpu.dot_dimension_numbers<[1], [0], [0], [1], [0, 0, 1, 1], [], []>} : vector<128x5xf32>, vector<5x192xf32>, vector<128x192xf32> -> vector<128x192xf32>
    %13 = vector.broadcast %6 : vector<1x192xf32> to vector<128x192xf32>
    %14 = arith.addf %12, %13 : vector<128x192xf32>
    %cst_18 = arith.constant 0.000000e+00 : f32
    %15 = vector.broadcast %cst_18 : f32 to vector<128x192xf32>
    %16 = arith.maximumf %14, %15 : vector<128x192xf32>
    %17 = arith.truncf %16 : vector<128x192xf32> to vector<128x192xbf16>
    %c16 = arith.constant 16 : index
    %c0_19 = arith.constant 0 : index
    %18 = vector.load %arg16[%c16, %c0_19] : memref<160x192xbf16, #tpu.memory_space<vmem>>, vector<128x192xbf16>
    tpu.vector_store %arg16[%c16, %c0_19], %17 {strides = array<i32>} : memref<160x192xbf16, #tpu.memory_space<vmem>>, vector<128x192xbf16>,
    %c0_20 = arith.constant 0 : index
    %c0_21 = arith.constant 0 : index
    %19 = vector.load %arg16[%c0_20, %c0_21] : memref<160x192xbf16, #tpu.memory_space<vmem>>, vector<128x192xbf16>
    %c0_22 = arith.constant 0 : index
    %c0_23 = arith.constant 0 : index
    %c0_24 = arith.constant 0 : index
    %20 = vector.load %arg4[%c0_22, %c0_23, %c0_24] : memref<5x192x192xbf16, #tpu.memory_space<vmem>>, vector<1x192x192xbf16>
    %21 = vector.shape_cast %20 : vector<1x192x192xbf16> to vector<192x192xbf16>
    %cst_25 = arith.constant dense<0.000000e+00> : vector<128x192xf32>
    %22 = tpu.matmul %19, %21, %cst_25 {dimension_numbers = #tpu.dot_dimension_numbers<[1], [0], [0], [1], [0, 0, 1, 1], [], []>} : vector<128x192xbf16>, vector<192x192xbf16>, vector<128x192xf32> -> vector<128x192xf32>
    %c8 = arith.constant 8 : index
    %c0_26 = arith.constant 0 : index
    %23 = vector.load %arg16[%c8, %c0_26] : memref<160x192xbf16, #tpu.memory_space<vmem>>, vector<128x192xbf16>
    %c1 = arith.constant 1 : index
    %c0_27 = arith.constant 0 : index
    %c0_28 = arith.constant 0 : index
    %24 = vector.load %arg4[%c1, %c0_27, %c0_28] : memref<5x192x192xbf16, #tpu.memory_space<vmem>>, vector<1x192x192xbf16>
    %25 = vector.shape_cast %24 : vector<1x192x192xbf16> to vector<192x192xbf16>
    %cst_29 = arith.constant dense<0.000000e+00> : vector<128x192xf32>
    %26 = tpu.matmul %23, %25, %cst_29 {dimension_numbers = #tpu.dot_dimension_numbers<[1], [0], [0], [1], [0, 0, 1, 1], [], []>} : vector<128x192xbf16>, vector<192x192xbf16>, vector<128x192xf32> -> vector<128x192xf32>
    %27 = arith.addf %22, %26 : vector<128x192xf32>
    %c16_30 = arith.constant 16 : index
    %c0_31 = arith.constant 0 : index
    %28 = vector.load %arg16[%c16_30, %c0_31] : memref<160x192xbf16, #tpu.memory_space<vmem>>, vector<128x192xbf16>
    %c2 = arith.constant 2 : index
    %c0_32 = arith.constant 0 : index
    %c0_33 = arith.constant 0 : index
    %29 = vector.load %arg4[%c2, %c0_32, %c0_33] : memref<5x192x192xbf16, #tpu.memory_space<vmem>>, vector<1x192x192xbf16>
    %30 = vector.shape_cast %29 : vector<1x192x192xbf16> to vector<192x192xbf16>
    %cst_34 = arith.constant dense<0.000000e+00> : vector<128x192xf32>
    %31 = tpu.matmul %28, %30, %cst_34 {dimension_numbers = #tpu.dot_dimension_numbers<[1], [0], [0], [1], [0, 0, 1, 1], [], []>} : vector<128x192xbf16>, vector<192x192xbf16>, vector<128x192xf32> -> vector<128x192xf32>
    %32 = arith.addf %27, %31 : vector<128x192xf32>
    %c24 = arith.constant 24 : index
    %c0_35 = arith.constant 0 : index
    %33 = vector.load %arg16[%c24, %c0_35] : memref<160x192xbf16, #tpu.memory_space<vmem>>, vector<128x192xbf16>
    %c3 = arith.constant 3 : index
    %c0_36 = arith.constant 0 : index
    %c0_37 = arith.constant 0 : index
    %34 = vector.load %arg4[%c3, %c0_36, %c0_37] : memref<5x192x192xbf16, #tpu.memory_space<vmem>>, vector<1x192x192xbf16>
    %35 = vector.shape_cast %34 : vector<1x192x192xbf16> to vector<192x192xbf16>
    %cst_38 = arith.constant dense<0.000000e+00> : vector<128x192xf32>
    %36 = tpu.matmul %33, %35, %cst_38 {dimension_numbers = #tpu.dot_dimension_numbers<[1], [0], [0], [1], [0, 0, 1, 1], [], []>} : vector<128x192xbf16>, vector<192x192xbf16>, vector<128x192xf32> -> vector<128x192xf32>
    %37 = arith.addf %32, %36 : vector<128x192xf32>
    %c32 = arith.constant 32 : index
    %c0_39 = arith.constant 0 : index
    %38 = vector.load %arg16[%c32, %c0_39] : memref<160x192xbf16, #tpu.memory_space<vmem>>, vector<128x192xbf16>
    %c4 = arith.constant 4 : index
    %c0_40 = arith.constant 0 : index
    %c0_41 = arith.constant 0 : index
    %39 = vector.load %arg4[%c4, %c0_40, %c0_41] : memref<5x192x192xbf16, #tpu.memory_space<vmem>>, vector<1x192x192xbf16>
    %40 = vector.shape_cast %39 : vector<1x192x192xbf16> to vector<192x192xbf16>
    %cst_42 = arith.constant dense<0.000000e+00> : vector<128x192xf32>
    %41 = tpu.matmul %38, %40, %cst_42 {dimension_numbers = #tpu.dot_dimension_numbers<[1], [0], [0], [1], [0, 0, 1, 1], [], []>} : vector<128x192xbf16>, vector<192x192xbf16>, vector<128x192xf32> -> vector<128x192xf32>
    %42 = arith.addf %37, %41 : vector<128x192xf32>
    %43 = vector.broadcast %7 : vector<1x192xf32> to vector<128x192xf32>
    %44 = arith.addf %42, %43 : vector<128x192xf32>
    %cst_43 = arith.constant 0.000000e+00 : f32
    %45 = vector.broadcast %cst_43 : f32 to vector<128x192xf32>
    %46 = arith.maximumf %44, %45 : vector<128x192xf32>
    %47 = arith.truncf %46 : vector<128x192xf32> to vector<128x192xbf16>
    %c24_44 = arith.constant 24 : index
    %c0_45 = arith.constant 0 : index
    %48 = vector.load %arg17[%c24_44, %c0_45] : memref<176x192xbf16, #tpu.memory_space<vmem>>, vector<128x192xbf16>
    tpu.vector_store %arg17[%c24_44, %c0_45], %47 {strides = array<i32>} : memref<176x192xbf16, #tpu.memory_space<vmem>>, vector<128x192xbf16>,
    %c0_46 = arith.constant 0 : index
    %c0_47 = arith.constant 0 : index
    %49 = vector.load %arg17[%c0_46, %c0_47] : memref<176x192xbf16, #tpu.memory_space<vmem>>, vector<128x192xbf16>
    %c0_48 = arith.constant 0 : index
    %c0_49 = arith.constant 0 : index
    %c0_50 = arith.constant 0 : index
    %50 = vector.load %arg6[%c0_48, %c0_49, %c0_50] : memref<7x192x64xbf16, #tpu.memory_space<vmem>>, vector<1x192x64xbf16>
    %51 = vector.shape_cast %50 : vector<1x192x64xbf16> to vector<192x64xbf16>
    %cst_51 = arith.constant dense<0.000000e+00> : vector<128x64xf32>
    %52 = tpu.matmul %49, %51, %cst_51 {dimension_numbers = #tpu.dot_dimension_numbers<[1], [0], [0], [1], [0, 0, 1, 1], [], []>} : vector<128x192xbf16>, vector<192x64xbf16>, vector<128x64xf32> -> vector<128x64xf32>
    %c8_52 = arith.constant 8 : index
    %c0_53 = arith.constant 0 : index
    %53 = vector.load %arg17[%c8_52, %c0_53] : memref<176x192xbf16, #tpu.memory_space<vmem>>, vector<128x192xbf16>
    %c1_54 = arith.constant 1 : index
    %c0_55 = arith.constant 0 : index
    %c0_56 = arith.constant 0 : index
    %54 = vector.load %arg6[%c1_54, %c0_55, %c0_56] : memref<7x192x64xbf16, #tpu.memory_space<vmem>>, vector<1x192x64xbf16>
    %55 = vector.shape_cast %54 : vector<1x192x64xbf16> to vector<192x64xbf16>
    %cst_57 = arith.constant dense<0.000000e+00> : vector<128x64xf32>
    %56 = tpu.matmul %53, %55, %cst_57 {dimension_numbers = #tpu.dot_dimension_numbers<[1], [0], [0], [1], [0, 0, 1, 1], [], []>} : vector<128x192xbf16>, vector<192x64xbf16>, vector<128x64xf32> -> vector<128x64xf32>
    %57 = arith.addf %52, %56 : vector<128x64xf32>
    %c16_58 = arith.constant 16 : index
    %c0_59 = arith.constant 0 : index
    %58 = vector.load %arg17[%c16_58, %c0_59] : memref<176x192xbf16, #tpu.memory_space<vmem>>, vector<128x192xbf16>
    %c2_60 = arith.constant 2 : index
    %c0_61 = arith.constant 0 : index
    %c0_62 = arith.constant 0 : index
    %59 = vector.load %arg6[%c2_60, %c0_61, %c0_62] : memref<7x192x64xbf16, #tpu.memory_space<vmem>>, vector<1x192x64xbf16>
    %60 = vector.shape_cast %59 : vector<1x192x64xbf16> to vector<192x64xbf16>
    %cst_63 = arith.constant dense<0.000000e+00> : vector<128x64xf32>
    %61 = tpu.matmul %58, %60, %cst_63 {dimension_numbers = #tpu.dot_dimension_numbers<[1], [0], [0], [1], [0, 0, 1, 1], [], []>} : vector<128x192xbf16>, vector<192x64xbf16>, vector<128x64xf32> -> vector<128x64xf32>
    %62 = arith.addf %57, %61 : vector<128x64xf32>
    %c24_64 = arith.constant 24 : index
    %c0_65 = arith.constant 0 : index
    %63 = vector.load %arg17[%c24_64, %c0_65] : memref<176x192xbf16, #tpu.memory_space<vmem>>, vector<128x192xbf16>
    %c3_66 = arith.constant 3 : index
    %c0_67 = arith.constant 0 : index
    %c0_68 = arith.constant 0 : index
    %64 = vector.load %arg6[%c3_66, %c0_67, %c0_68] : memref<7x192x64xbf16, #tpu.memory_space<vmem>>, vector<1x192x64xbf16>
    %65 = vector.shape_cast %64 : vector<1x192x64xbf16> to vector<192x64xbf16>
    %cst_69 = arith.constant dense<0.000000e+00> : vector<128x64xf32>
    %66 = tpu.matmul %63, %65, %cst_69 {dimension_numbers = #tpu.dot_dimension_numbers<[1], [0], [0], [1], [0, 0, 1, 1], [], []>} : vector<128x192xbf16>, vector<192x64xbf16>, vector<128x64xf32> -> vector<128x64xf32>
    %67 = arith.addf %62, %66 : vector<128x64xf32>
    %c32_70 = arith.constant 32 : index
    %c0_71 = arith.constant 0 : index
    %68 = vector.load %arg17[%c32_70, %c0_71] : memref<176x192xbf16, #tpu.memory_space<vmem>>, vector<128x192xbf16>
    %c4_72 = arith.constant 4 : index
    %c0_73 = arith.constant 0 : index
    %c0_74 = arith.constant 0 : index
    %69 = vector.load %arg6[%c4_72, %c0_73, %c0_74] : memref<7x192x64xbf16, #tpu.memory_space<vmem>>, vector<1x192x64xbf16>
    %70 = vector.shape_cast %69 : vector<1x192x64xbf16> to vector<192x64xbf16>
    %cst_75 = arith.constant dense<0.000000e+00> : vector<128x64xf32>
    %71 = tpu.matmul %68, %70, %cst_75 {dimension_numbers = #tpu.dot_dimension_numbers<[1], [0], [0], [1], [0, 0, 1, 1], [], []>} : vector<128x192xbf16>, vector<192x64xbf16>, vector<128x64xf32> -> vector<128x64xf32>
    %72 = arith.addf %67, %71 : vector<128x64xf32>
    %c40 = arith.constant 40 : index
    %c0_76 = arith.constant 0 : index
    %73 = vector.load %arg17[%c40, %c0_76] : memref<176x192xbf16, #tpu.memory_space<vmem>>, vector<128x192xbf16>
    %c5 = arith.constant 5 : index
    %c0_77 = arith.constant 0 : index
    %c0_78 = arith.constant 0 : index
    %74 = vector.load %arg6[%c5, %c0_77, %c0_78] : memref<7x192x64xbf16, #tpu.memory_space<vmem>>, vector<1x192x64xbf16>
    %75 = vector.shape_cast %74 : vector<1x192x64xbf16> to vector<192x64xbf16>
    %cst_79 = arith.constant dense<0.000000e+00> : vector<128x64xf32>
    %76 = tpu.matmul %73, %75, %cst_79 {dimension_numbers = #tpu.dot_dimension_numbers<[1], [0], [0], [1], [0, 0, 1, 1], [], []>} : vector<128x192xbf16>, vector<192x64xbf16>, vector<128x64xf32> -> vector<128x64xf32>
    %77 = arith.addf %72, %76 : vector<128x64xf32>
    %c48 = arith.constant 48 : index
    %c0_80 = arith.constant 0 : index
    %78 = vector.load %arg17[%c48, %c0_80] : memref<176x192xbf16, #tpu.memory_space<vmem>>, vector<128x192xbf16>
    %c6 = arith.constant 6 : index
    %c0_81 = arith.constant 0 : index
    %c0_82 = arith.constant 0 : index
    %79 = vector.load %arg6[%c6, %c0_81, %c0_82] : memref<7x192x64xbf16, #tpu.memory_space<vmem>>, vector<1x192x64xbf16>
    %80 = vector.shape_cast %79 : vector<1x192x64xbf16> to vector<192x64xbf16>
    %cst_83 = arith.constant dense<0.000000e+00> : vector<128x64xf32>
    %81 = tpu.matmul %78, %80, %cst_83 {dimension_numbers = #tpu.dot_dimension_numbers<[1], [0], [0], [1], [0, 0, 1, 1], [], []>} : vector<128x192xbf16>, vector<192x64xbf16>, vector<128x64xf32> -> vector<128x64xf32>
    %82 = arith.addf %77, %81 : vector<128x64xf32>
    %83 = vector.broadcast %8 : vector<1x64xf32> to vector<128x64xf32>
    %84 = arith.addf %82, %83 : vector<128x64xf32>
    %cst_84 = arith.constant 0.000000e+00 : f32
    %85 = vector.broadcast %cst_84 : f32 to vector<128x64xf32>
    %86 = arith.maximumf %84, %85 : vector<128x64xf32>
    %87 = arith.truncf %86 : vector<128x64xf32> to vector<128x64xbf16>
    %88 = vector.extract_strided_slice %87 {offsets = [0, 0], sizes = [8, 64], strides = [1, 1]} : vector<128x64xbf16> to vector<8x64xbf16>
    %c0_85 = arith.constant 0 : index
    %c0_86 = arith.constant 0 : index
    %89 = vector.load %arg18[%c0_85, %c0_86] : memref<8x1024xbf16, #tpu.memory_space<vmem>>, vector<8x64xbf16>
    tpu.vector_store %arg18[%c0_85, %c0_86], %88 {strides = array<i32>} : memref<8x1024xbf16, #tpu.memory_space<vmem>>, vector<8x64xbf16>,
    %90 = vector.extract_strided_slice %87 {offsets = [8, 0], sizes = [8, 64], strides = [1, 1]} : vector<128x64xbf16> to vector<8x64xbf16>
    %c0_87 = arith.constant 0 : index
    %c64 = arith.constant 64 : index
    %91 = vector.load %arg18[%c0_87, %c64] : memref<8x1024xbf16, #tpu.memory_space<vmem>>, vector<8x64xbf16>
    tpu.vector_store %arg18[%c0_87, %c64], %90 {strides = array<i32>} : memref<8x1024xbf16, #tpu.memory_space<vmem>>, vector<8x64xbf16>,
    %92 = vector.extract_strided_slice %87 {offsets = [16, 0], sizes = [8, 64], strides = [1, 1]} : vector<128x64xbf16> to vector<8x64xbf16>
    %c0_88 = arith.constant 0 : index
    %c128 = arith.constant 128 : index
    %93 = vector.load %arg18[%c0_88, %c128] : memref<8x1024xbf16, #tpu.memory_space<vmem>>, vector<8x64xbf16>
    tpu.vector_store %arg18[%c0_88, %c128], %92 {strides = array<i32>} : memref<8x1024xbf16, #tpu.memory_space<vmem>>, vector<8x64xbf16>,
    %94 = vector.extract_strided_slice %87 {offsets = [24, 0], sizes = [8, 64], strides = [1, 1]} : vector<128x64xbf16> to vector<8x64xbf16>
    %c0_89 = arith.constant 0 : index
    %c192 = arith.constant 192 : index
    %95 = vector.load %arg18[%c0_89, %c192] : memref<8x1024xbf16, #tpu.memory_space<vmem>>, vector<8x64xbf16>
    tpu.vector_store %arg18[%c0_89, %c192], %94 {strides = array<i32>} : memref<8x1024xbf16, #tpu.memory_space<vmem>>, vector<8x64xbf16>,
    %96 = vector.extract_strided_slice %87 {offsets = [32, 0], sizes = [8, 64], strides = [1, 1]} : vector<128x64xbf16> to vector<8x64xbf16>
    %c0_90 = arith.constant 0 : index
    %c256 = arith.constant 256 : index
    %97 = vector.load %arg18[%c0_90, %c256] : memref<8x1024xbf16, #tpu.memory_space<vmem>>, vector<8x64xbf16>
    tpu.vector_store %arg18[%c0_90, %c256], %96 {strides = array<i32>} : memref<8x1024xbf16, #tpu.memory_space<vmem>>, vector<8x64xbf16>,
    %98 = vector.extract_strided_slice %87 {offsets = [40, 0], sizes = [8, 64], strides = [1, 1]} : vector<128x64xbf16> to vector<8x64xbf16>
    %c0_91 = arith.constant 0 : index
    %c320 = arith.constant 320 : index
    %99 = vector.load %arg18[%c0_91, %c320] : memref<8x1024xbf16, #tpu.memory_space<vmem>>, vector<8x64xbf16>
    tpu.vector_store %arg18[%c0_91, %c320], %98 {strides = array<i32>} : memref<8x1024xbf16, #tpu.memory_space<vmem>>, vector<8x64xbf16>,
    %100 = vector.extract_strided_slice %87 {offsets = [48, 0], sizes = [8, 64], strides = [1, 1]} : vector<128x64xbf16> to vector<8x64xbf16>
    %c0_92 = arith.constant 0 : index
    %c384 = arith.constant 384 : index
    %101 = vector.load %arg18[%c0_92, %c384] : memref<8x1024xbf16, #tpu.memory_space<vmem>>, vector<8x64xbf16>
    tpu.vector_store %arg18[%c0_92, %c384], %100 {strides = array<i32>} : memref<8x1024xbf16, #tpu.memory_space<vmem>>, vector<8x64xbf16>,
    %102 = vector.extract_strided_slice %87 {offsets = [56, 0], sizes = [8, 64], strides = [1, 1]} : vector<128x64xbf16> to vector<8x64xbf16>
    %c0_93 = arith.constant 0 : index
    %c448 = arith.constant 448 : index
    %103 = vector.load %arg18[%c0_93, %c448] : memref<8x1024xbf16, #tpu.memory_space<vmem>>, vector<8x64xbf16>
    tpu.vector_store %arg18[%c0_93, %c448], %102 {strides = array<i32>} : memref<8x1024xbf16, #tpu.memory_space<vmem>>, vector<8x64xbf16>,
    %104 = vector.extract_strided_slice %87 {offsets = [64, 0], sizes = [8, 64], strides = [1, 1]} : vector<128x64xbf16> to vector<8x64xbf16>
    %c0_94 = arith.constant 0 : index
    %c512 = arith.constant 512 : index
    %105 = vector.load %arg18[%c0_94, %c512] : memref<8x1024xbf16, #tpu.memory_space<vmem>>, vector<8x64xbf16>
    tpu.vector_store %arg18[%c0_94, %c512], %104 {strides = array<i32>} : memref<8x1024xbf16, #tpu.memory_space<vmem>>, vector<8x64xbf16>,
    %106 = vector.extract_strided_slice %87 {offsets = [72, 0], sizes = [8, 64], strides = [1, 1]} : vector<128x64xbf16> to vector<8x64xbf16>
    %c0_95 = arith.constant 0 : index
    %c576 = arith.constant 576 : index
    %107 = vector.load %arg18[%c0_95, %c576] : memref<8x1024xbf16, #tpu.memory_space<vmem>>, vector<8x64xbf16>
    tpu.vector_store %arg18[%c0_95, %c576], %106 {strides = array<i32>} : memref<8x1024xbf16, #tpu.memory_space<vmem>>, vector<8x64xbf16>,
    %108 = vector.extract_strided_slice %87 {offsets = [80, 0], sizes = [8, 64], strides = [1, 1]} : vector<128x64xbf16> to vector<8x64xbf16>
    %c0_96 = arith.constant 0 : index
    %c640 = arith.constant 640 : index
    %109 = vector.load %arg18[%c0_96, %c640] : memref<8x1024xbf16, #tpu.memory_space<vmem>>, vector<8x64xbf16>
    tpu.vector_store %arg18[%c0_96, %c640], %108 {strides = array<i32>} : memref<8x1024xbf16, #tpu.memory_space<vmem>>, vector<8x64xbf16>,
    %110 = vector.extract_strided_slice %87 {offsets = [88, 0], sizes = [8, 64], strides = [1, 1]} : vector<128x64xbf16> to vector<8x64xbf16>
    %c0_97 = arith.constant 0 : index
    %c704 = arith.constant 704 : index
    %111 = vector.load %arg18[%c0_97, %c704] : memref<8x1024xbf16, #tpu.memory_space<vmem>>, vector<8x64xbf16>
    tpu.vector_store %arg18[%c0_97, %c704], %110 {strides = array<i32>} : memref<8x1024xbf16, #tpu.memory_space<vmem>>, vector<8x64xbf16>,
    %112 = vector.extract_strided_slice %87 {offsets = [96, 0], sizes = [8, 64], strides = [1, 1]} : vector<128x64xbf16> to vector<8x64xbf16>
    %c0_98 = arith.constant 0 : index
    %c768 = arith.constant 768 : index
    %113 = vector.load %arg18[%c0_98, %c768] : memref<8x1024xbf16, #tpu.memory_space<vmem>>, vector<8x64xbf16>
    tpu.vector_store %arg18[%c0_98, %c768], %112 {strides = array<i32>} : memref<8x1024xbf16, #tpu.memory_space<vmem>>, vector<8x64xbf16>,
    %114 = vector.extract_strided_slice %87 {offsets = [104, 0], sizes = [8, 64], strides = [1, 1]} : vector<128x64xbf16> to vector<8x64xbf16>
    %c0_99 = arith.constant 0 : index
    %c832 = arith.constant 832 : index
    %115 = vector.load %arg18[%c0_99, %c832] : memref<8x1024xbf16, #tpu.memory_space<vmem>>, vector<8x64xbf16>
    tpu.vector_store %arg18[%c0_99, %c832], %114 {strides = array<i32>} : memref<8x1024xbf16, #tpu.memory_space<vmem>>, vector<8x64xbf16>,
    %116 = vector.extract_strided_slice %87 {offsets = [112, 0], sizes = [8, 64], strides = [1, 1]} : vector<128x64xbf16> to vector<8x64xbf16>
    %c0_100 = arith.constant 0 : index
    %c896 = arith.constant 896 : index
    %117 = vector.load %arg18[%c0_100, %c896] : memref<8x1024xbf16, #tpu.memory_space<vmem>>, vector<8x64xbf16>
    tpu.vector_store %arg18[%c0_100, %c896], %116 {strides = array<i32>} : memref<8x1024xbf16, #tpu.memory_space<vmem>>, vector<8x64xbf16>,
    %118 = vector.extract_strided_slice %87 {offsets = [120, 0], sizes = [8, 64], strides = [1, 1]} : vector<128x64xbf16> to vector<8x64xbf16>
    %c0_101 = arith.constant 0 : index
    %c960 = arith.constant 960 : index
    %119 = vector.load %arg18[%c0_101, %c960] : memref<8x1024xbf16, #tpu.memory_space<vmem>>, vector<8x64xbf16>
    tpu.vector_store %arg18[%c0_101, %c960], %118 {strides = array<i32>} : memref<8x1024xbf16, #tpu.memory_space<vmem>>, vector<8x64xbf16>,
    %c0_102 = arith.constant 0 : index
    %c0_103 = arith.constant 0 : index
    %120 = vector.load %arg18[%c0_102, %c0_103] : memref<8x1024xbf16, #tpu.memory_space<vmem>>, vector<8x1024xbf16>
    %c0_104 = arith.constant 0 : index
    %c0_105 = arith.constant 0 : index
    %121 = vector.load %arg8[%c0_104, %c0_105] : memref<1024x256xbf16, #tpu.memory_space<vmem>>, vector<1024x256xbf16>
    %cst_106 = arith.constant dense<0.000000e+00> : vector<8x256xf32>
    %122 = tpu.matmul %120, %121, %cst_106 {dimension_numbers = #tpu.dot_dimension_numbers<[1], [0], [0], [1], [0, 0, 1, 1], [], []>} : vector<8x1024xbf16>, vector<1024x256xbf16>, vector<8x256xf32> -> vector<8x256xf32>
    %c0_107 = arith.constant 0 : index
    %c0_108 = arith.constant 0 : index
    %123 = vector.load %arg9[%c0_107, %c0_108] : memref<1x256xf32, #tpu.memory_space<vmem>>, vector<1x256xf32>
    %124 = vector.broadcast %123 : vector<1x256xf32> to vector<8x256xf32>
    %125 = arith.addf %122, %124 : vector<8x256xf32>
    %cst_109 = arith.constant 0.000000e+00 : f32
    %126 = vector.broadcast %cst_109 : f32 to vector<8x256xf32>
    %127 = arith.maximumf %125, %126 : vector<8x256xf32>
    %128 = arith.truncf %127 : vector<8x256xf32> to vector<8x256xbf16>
    %c0_110 = arith.constant 0 : index
    %c0_111 = arith.constant 0 : index
    %129 = vector.load %arg10[%c0_110, %c0_111] : memref<256x128xbf16, #tpu.memory_space<vmem>>, vector<256x128xbf16>
    %cst_112 = arith.constant dense<0.000000e+00> : vector<8x128xf32>
    %130 = tpu.matmul %128, %129, %cst_112 {dimension_numbers = #tpu.dot_dimension_numbers<[1], [0], [0], [1], [0, 0, 1, 1], [], []>} : vector<8x256xbf16>, vector<256x128xbf16>, vector<8x128xf32> -> vector<8x128xf32>
    %c0_113 = arith.constant 0 : index
    %c0_114 = arith.constant 0 : index
    %131 = vector.load %arg11[%c0_113, %c0_114] : memref<1x128xf32, #tpu.memory_space<vmem>>, vector<1x128xf32>
    %132 = vector.broadcast %131 : vector<1x128xf32> to vector<8x128xf32>
    %133 = arith.addf %130, %132 : vector<8x128xf32>
    %cst_115 = arith.constant 0.000000e+00 : f32
    %134 = vector.broadcast %cst_115 : f32 to vector<8x128xf32>
    %135 = arith.maximumf %133, %134 : vector<8x128xf32>
    %c0_116 = arith.constant 0 : index
    %c0_117 = arith.constant 0 : index
    %136 = vector.load %arg14[%c0_116, %c0_117] : memref<8x128xf32, #tpu.memory_space<vmem>>, vector<8x128xf32>
    tpu.vector_store %arg14[%c0_116, %c0_117], %135 {strides = array<i32>} : memref<8x128xf32, #tpu.memory_space<vmem>>, vector<8x128xf32>,
    %137 = arith.truncf %135 : vector<8x128xf32> to vector<8x128xbf16>
    %c0_118 = arith.constant 0 : index
    %c0_119 = arith.constant 0 : index
    %138 = vector.load %arg12[%c0_118, %c0_119] : memref<128x128xbf16, #tpu.memory_space<vmem>>, vector<128x128xbf16>
    %cst_120 = arith.constant dense<0.000000e+00> : vector<8x128xf32>
    %139 = tpu.matmul %137, %138, %cst_120 {dimension_numbers = #tpu.dot_dimension_numbers<[1], [0], [0], [1], [0, 0, 1, 1], [], []>} : vector<8x128xbf16>, vector<128x128xbf16>, vector<8x128xf32> -> vector<8x128xf32>
    %c0_121 = arith.constant 0 : index
    %c0_122 = arith.constant 0 : index
    %140 = vector.load %arg13[%c0_121, %c0_122] : memref<1x128xf32, #tpu.memory_space<vmem>>, vector<1x128xf32>
    %141 = vector.broadcast %140 : vector<1x128xf32> to vector<8x128xf32>
    %142 = arith.addf %139, %141 : vector<8x128xf32>
    %c0_123 = arith.constant 0 : index
    %c0_124 = arith.constant 0 : index
    %143 = vector.load %arg15[%c0_123, %c0_124] : memref<8x128xf32, #tpu.memory_space<vmem>>, vector<8x128xf32>
    tpu.vector_store %arg15[%c0_123, %c0_124], %142 {strides = array<i32>} : memref<8x128xf32, #tpu.memory_space<vmem>>, vector<8x128xf32>,
    return
  }
  func.func @transform_0(%arg0: i32) -> (i32, i32, i32) {
    %c0_i32 = arith.constant 0 : i32
    %c0_i32_0 = arith.constant 0 : i32
    %c0_i32_1 = arith.constant 0 : i32
    return %arg0, %c0_i32, %c0_i32_0 : i32, i32, i32
  }
  func.func @transform_1(%arg0: i32) -> (i32, i32) {
    %c0_i32 = arith.constant 0 : i32
    %c0_i32_0 = arith.constant 0 : i32
    %c0_i32_1 = arith.constant 0 : i32
    return %c0_i32, %c0_i32_0 : i32, i32
  }
  func.func @transform_2(%arg0: i32) -> (i32, i32) {
    %c0_i32 = arith.constant 0 : i32
    %c0_i32_0 = arith.constant 0 : i32
    %c0_i32_1 = arith.constant 0 : i32
    return %c0_i32, %c0_i32_0 : i32, i32
  }
  func.func @transform_3(%arg0: i32) -> (i32, i32, i32) {
    %c0_i32 = arith.constant 0 : i32
    %c0_i32_0 = arith.constant 0 : i32
    %c0_i32_1 = arith.constant 0 : i32
    %c0_i32_2 = arith.constant 0 : i32
    return %c0_i32, %c0_i32_0, %c0_i32_1 : i32, i32, i32
  }
  func.func @transform_4(%arg0: i32) -> (i32, i32) {
    %c0_i32 = arith.constant 0 : i32
    %c0_i32_0 = arith.constant 0 : i32
    %c0_i32_1 = arith.constant 0 : i32
    return %c0_i32, %c0_i32_0 : i32, i32
  }
  func.func @transform_5(%arg0: i32) -> (i32, i32, i32) {
    %c0_i32 = arith.constant 0 : i32
    %c0_i32_0 = arith.constant 0 : i32
    %c0_i32_1 = arith.constant 0 : i32
    %c0_i32_2 = arith.constant 0 : i32
    return %c0_i32, %c0_i32_0, %c0_i32_1 : i32, i32, i32
  }
  func.func @transform_6(%arg0: i32) -> (i32, i32) {
    %c0_i32 = arith.constant 0 : i32
    %c0_i32_0 = arith.constant 0 : i32
    %c0_i32_1 = arith.constant 0 : i32
    return %c0_i32, %c0_i32_0 : i32, i32
  }
  func.func @transform_7(%arg0: i32) -> (i32, i32) {
    %c0_i32 = arith.constant 0 : i32
    %c0_i32_0 = arith.constant 0 : i32
    %c0_i32_1 = arith.constant 0 : i32
    return %c0_i32, %c0_i32_0 : i32, i32
  }
  func.func @transform_8(%arg0: i32) -> (i32, i32) {
    %c0_i32 = arith.constant 0 : i32
    %c0_i32_0 = arith.constant 0 : i32
    %c0_i32_1 = arith.constant 0 : i32
    return %c0_i32, %c0_i32_0 : i32, i32
  }
  func.func @transform_9(%arg0: i32) -> (i32, i32) {
    %c0_i32 = arith.constant 0 : i32
    %c0_i32_0 = arith.constant 0 : i32
    %c0_i32_1 = arith.constant 0 : i32
    return %c0_i32, %c0_i32_0 : i32, i32
  }
  func.func @transform_10(%arg0: i32) -> (i32, i32) {
    %c0_i32 = arith.constant 0 : i32
    %c0_i32_0 = arith.constant 0 : i32
    %c0_i32_1 = arith.constant 0 : i32
    return %c0_i32, %c0_i32_0 : i32, i32
  }
  func.func @transform_11(%arg0: i32) -> (i32, i32) {
    %c0_i32 = arith.constant 0 : i32
    %c0_i32_0 = arith.constant 0 : i32
    %c0_i32_1 = arith.constant 0 : i32
    return %c0_i32, %c0_i32_0 : i32, i32
  }
  func.func @transform_12(%arg0: i32) -> (i32, i32) {
    %c0_i32 = arith.constant 0 : i32
    %c0_i32_0 = arith.constant 0 : i32
    %c0_i32_1 = arith.constant 0 : i32
    return %c0_i32, %c0_i32_0 : i32, i32
  }
  func.func @transform_13(%arg0: i32) -> (i32, i32) {
    %c0_i32 = arith.constant 0 : i32
    %c0_i32_0 = arith.constant 0 : i32
    return %arg0, %c0_i32 : i32, i32
  }
  func.func @transform_14(%arg0: i32) -> (i32, i32) {
    %c0_i32 = arith.constant 0 : i32
    %c0_i32_0 = arith.constant 0 : i32
    return %arg0, %c0_i32 : i32, i32
  }
}

</mosaic_0001>

<bundles_post_ra>
// kernel: tpu_custom_call.1
= control target key start
LH: loop header
LB: loop body
LE: loop exit
PB: predicated region body
PF: predicated region fallthrough
CT: control target
= control target key end

     0   :  { %20 = vsyncpa [#allocation6], 0  ;;  %s8887_s0 = inlined_call_operand.vmem [shape: f32[1,128,5], index: 0, kind: input, shape index: {}]   ;;  %s8888_s1 = inlined_call_operand.vmem [shape: f32[5,192], index: 1, kind: input, shape index: {}]   ;;  %s8889_s2 = inlined_call_operand.vmem [shape: f32[1,192], index: 2, kind: input, shape index: {}]   ;;  %s8890_s3 = inlined_call_operand.hbm [shape: bf16[5,192,192], index: 3, kind: input, shape index: {}]   ;;  %s8891_s4 = inlined_call_operand.vmem [shape: f32[1,192], index: 4, kind: input, shape index: {}]   ;;  %s8892_s5 = inlined_call_operand.vmem [shape: bf16[7,192,64], index: 5, kind: input, shape index: {}]   ;;  %s8893_s6 = inlined_call_operand.vmem [shape: f32[1,64], index: 6, kind: input, shape index: {}]   ;;  %s8894_s7 = inlined_call_operand.vmem [shape: bf16[1024,256], index: 7, kind: input, shape index: {}]   ;;  %s8895_s8 = inlined_call_operand.vmem [shape: f32[1,256], index: 8, kind: input, shape index: {}]   ;;  %s8896_s9 = inlined_call_operand.vmem [shape: bf16[256,128], index: 9, kind: input, shape index: {}]   ;;  %s8897_s10 = inlined_call_operand.vmem [shape: f32[1,128], index: 10, kind: input, shape index: {}]   ;;  %s8898_s11 = inlined_call_operand.vmem [shape: bf16[128,128], index: 11, kind: input, shape index: {}]   ;;  %s8899_s12 = inlined_call_operand.vmem [shape: f32[1,128], index: 12, kind: input, shape index: {}]   ;;  %s8900_s13 = inlined_call_operand.hbm [shape: f32[8,128], index: 13, kind: output, shape index: {0}]   ;;  %s8901_s14 = inlined_call_operand.hbm [shape: f32[8,128], index: 14, kind: output, shape index: {1}]  }
   0x1   :  { %21 = vsyncpa [#allocation7], 0 }
   0x2   :  { %22 = vsyncpa [#allocation10], 0  ;;  %s6854_s29 = smov [#allocation5]   ;;  %s6782_s17 = scalar_lea.hbm %s8890_s3, 15360 }
   0x3   :  { %s34_s30 = sshll.u32 %s6854_s29, 4  ;;  %p6783_p0 = scmp.ne.s32.totalorder %s8890_s3, %s6782_s17  ;;  %s35_s30 = int_to_ptr.vmem [resolvable:$true] %s34_s30 }
   0x4   :  { %p6786_p1 = scmp.lt.u32.totalorder %s6782_s17, %s8890_s3 }
   0x6   :  { %p6788_p2 = pnand %p6786_p1, %p6783_p0 }
   0x8   :  { %6791 = shalt.err (!%p6788_p2)
}
   0x9   :  { %s6792_s22 = scalar_lea.vmem %s35_s30, 15360  ;;  %p6797_p4 = scmp.lt.s32.totalorder %s35_s30, %s35_s30 }
   0xa   :  { %p6793_p3 = scmp.ne.s32.totalorder %s35_s30, %s6792_s22  ;;  %p6798_p5 = scmp.lt.s32.totalorder %s6792_s22, %s6792_s22 }
   0xc   :  { %p6799_p6 = por %p6798_p5, %p6797_p4 }
   0xe   :  { %p6800_p7 = pnand %p6799_p6, %p6793_p3 }
  0x10   :  { %6803 = shalt.err (!%p6800_p7)
}
  0x11   :  { %s6855_s23 = smov 128   ;;  %s6856_s24 = smov 8  }
  0x12   :  { %40 = dma.hbm_to_vmem [thread:$0]  %s8890_s3, 15360, %s35_s30, [#allocation6], %s6855_s23, %s6855_s23, %s6856_s24  }
  0x13   :  { %6848 = dma.done.wait [#allocation6], 15360  }
  0x14   :  { %6849 = vsyncadd [#allocation6], 4294951936  ;;  %v6857_v0 = vmov 0.0   ;;  %vm159_vm0 = vcmask 1044480   ;;  %v82_v1 = vld [vmem:[%s8888_s1 + $0x8] sm:$0x1f] }
  0x15   :  { %230 = vmatprep.mubr.f32.mxu0 %v6857_v0  ;;  %v81_v2 = vld [vmem:[%s8888_s1] sm:$0x1f]  ;;  %vm110_vm1 = vcmask 39936   ;;  %5447 = vmatprep.subr.msk.mxu0 %vm159_vm0, %v82_v1  ;;  %v84_v4 = vld [vmem:[%s8887_s0 + $0x8] sm:$0xff]  ;;  %v6290_v5 = vld [vmem:[#allocation5 + $0x4] ss:$8 sps:$4 sm:$0xff]  }
  0x16   :  { %v83_v3 = vld [vmem:[%s8887_s0] sm:$0xff]  ;;  %5448 = vmatpush1.msk.msra.mxu0 %vm159_vm0, %v81_v2  ;;  %v6292_v6 = vld [vmem:[#allocation5] ss:$8 sps:$4 sm:$0xff]   ;;  %922 = vmatprep.subr.bf16.mxu1 %v6290_v5  ;;  %v6296_v10 = vld [vmem:[#allocation5 + $0x24] ss:$8 sps:$4 sm:$0xff]   ;;  %vm64_vm2 = vcmask 523264  }
  0x17   :  { %5449 = vmatmul.mubr.msk.f32.vlgmr.msra.gmra.mrb[0].mxu0 %vm110_vm1, %v83_v3  ;;  %v85_v7 = vld [vmem:[%s8887_s0 + $0x10] sm:$0xff]  ;;  %v6293_v8 = vld [vmem:[#allocation5 + $0x14] ss:$8 sps:$4 sm:$0xff]   ;;  %923 = vmatpush1.bf16.msra.mxu1 %v6292_v6  ;;  %v6295_v9 = vld [vmem:[#allocation5 + $0x10] ss:$8 sps:$4 sm:$0xff]   ;;  %v6858_v57 = vmov 0  }
  0x18   :  { %236 = vmatprep.mubr.f32.mxu0 %v6857_v0  ;;  %924 = vmatprep.subr.bf16.mxu1 %v6293_v8  ;;  %v6299_v11 = vld [vmem:[#allocation5 + $0xc0] ss:$8 sps:$4 sm:$0xff]   ;;  %v6301_v12 = vld [vmem:[#allocation5 + $0xc4] ss:$8 sps:$4 sm:$0xff]   ;;  %v6302_v15 = vld [vmem:[#allocation5 + $0x34] ss:$8 sps:$4 sm:$0xff]  }
  0x19   :  { %v86_v13 = vld [vmem:[%s8887_s0 + $0x18] sm:$0xff]  ;;  %665 = vmatprep.subr.bf16.mxu0 %v6301_v12  ;;  %v6307_v16 = vld [vmem:[#allocation5 + $0xd4] ss:$8 sps:$4 sm:$0xff]   ;;  %v6305_v17 = vld [vmem:[#allocation5 + $0xd0] ss:$8 sps:$4 sm:$0xff]   ;;  %63 = vst [vmem:[#allocation2] sm:$0xff] %v6858_v57 }
  0x1a   :  { %v6298_v14 = vld [vmem:[#allocation5 + $0x20] ss:$8 sps:$4 sm:$0xff]   ;;  %666 = vmatpush1.bf16.msra.mxu0 %v6299_v11  ;;  %v87_v18 = vld [vmem:[%s8887_s0 + $0x20] sm:$0xff]  ;;  %v6313_v19 = vld [vmem:[#allocation5 + $0xe4] ss:$8 sps:$4 sm:$0xff]   ;;  %66 = vst [vmem:[#allocation2 + $0x90] sm:$0xff] %v6858_v57 }
  0x1b   :  { %5450 = vmatmul.mubr.msk.f32.gmra.mrb[2].mxu0 %vm110_vm1, %v84_v4  ;;  %925 = vmatpush1.bf16.msra.mxu1 %v6295_v9  ;;  %v6304_v20 = vld [vmem:[#allocation5 + $0x30] ss:$8 sps:$4 sm:$0xff]   ;;  %v6308_v21 = vld [vmem:[#allocation5 + $0x44] ss:$8 sps:$4 sm:$0xff]   ;;  %v6311_v22 = vld [vmem:[#allocation5 + $0xe0] ss:$8 sps:$4 sm:$0xff]  }
  0x1c   :  { %242 = vmatprep.mubr.f32.mxu0 %v6857_v0  ;;  %926 = vmatprep.subr.bf16.mxu1 %v6296_v10  ;;  %v6319_v23 = vld [vmem:[#allocation5 + $0xf4] ss:$8 sps:$4 sm:$0xff]   ;;  %v6310_v25 = vld [vmem:[#allocation5 + $0x40] ss:$8 sps:$4 sm:$0xff]   ;;  %v6317_v27 = vld [vmem:[#allocation5 + $0xf0] ss:$8 sps:$4 sm:$0xff]  }
  0x1d   :  { %667 = vmatprep.subr.bf16.mxu0 %v6307_v16  ;;  %v88_v24 = vld [vmem:[%s8887_s0 + $0x28] sm:$0xff]  ;;  %v6325_v28 = vld [vmem:[#allocation5 + $0x104] ss:$8 sps:$4 sm:$0xff]   ;;  %v6323_v32 = vld [vmem:[#allocation5 + $0x100] ss:$8 sps:$4 sm:$0xff]   ;;  %68 = vst [vmem:[#allocation3] sm:$0xff] %v6858_v57 }
  0x1e   :  { %668 = vmatpush1.bf16.msra.mxu0 %v6305_v17  ;;  %v6314_v26 = vld [vmem:[#allocation5 + $0x54] ss:$8 sps:$4 sm:$0xff]   ;;  %v89_v29 = vld [vmem:[%s8887_s0 + $0x30] sm:$0xff]  ;;  %v6316_v30 = vld [vmem:[#allocation5 + $0x50] ss:$8 sps:$4 sm:$0xff]   ;;  %76 = vst [vmem:[#allocation3 + $0xa0] sm:$0xff] %v6858_v57 }
  0x1f   :  { %5451 = vmatmul.mubr.msk.f32.gmra.mrb[4].mxu0 %vm110_vm1, %v85_v7  ;;  %927 = vmatpush1.bf16.msra.mxu1 %v6298_v14  ;;  %v6320_v31 = vld [vmem:[#allocation5 + $0x64] ss:$8 sps:$4 sm:$0xff]   ;;  %v6331_v34 = vld [vmem:[#allocation5 + $0x114] ss:$8 sps:$4 sm:$0xff]   ;;  %v6322_v35 = vld [vmem:[#allocation5 + $0x60] ss:$8 sps:$4 sm:$0xff]  }
  0x20   :  { %248 = vmatprep.mubr.f32.mxu0 %v6857_v0  ;;  %928 = vmatprep.subr.bf16.mxu1 %v6302_v15  ;;  %v90_v33 = vld [vmem:[%s8887_s0 + $0x38] sm:$0xff]  ;;  %v6326_v36 = vld [vmem:[#allocation5 + $0x74] ss:$8 sps:$4 sm:$0xff]   ;;  %v6329_v37 = vld [vmem:[#allocation5 + $0x110] ss:$8 sps:$4 sm:$0xff]   ;;  %65 = vst.msk [vmem:[#allocation2 + $0x8] sm:$0xff] %vm64_vm2, %v6858_v57 }
  0x21   :  { %669 = vmatprep.subr.bf16.mxu0 %v6313_v19  ;;  %v91_v38 = vld [vmem:[%s8887_s0 + $0x40] sm:$0xff]  ;;  %v6332_v40 = vld [vmem:[#allocation5 + $0x84] ss:$8 sps:$4 sm:$0xff]   ;;  %v92_v41 = vld [vmem:[%s8887_s0 + $0x48] sm:$0xff]  ;;  %70 = vst [vmem:[#allocation3 + $0x10] sm:$0xf] %v6858_v57 }
  0x22   :  { %670 = vmatpush1.bf16.msra.mxu0 %v6311_v22  ;;  %v6328_v39 = vld [vmem:[#allocation5 + $0x70] ss:$8 sps:$4 sm:$0xff]   ;;  %v6334_v42 = vld [vmem:[#allocation5 + $0x80] ss:$8 sps:$4 sm:$0xff]   ;;  %v6337_v49 = vld [vmem:[#allocation5 + $0x124] ss:$8 sps:$4 sm:$0xff]  }
  0x23   :  { %5452 = vmatmul.mubr.msk.f32.gmra.mrb[6].mxu0 %vm110_vm1, %v86_v13  ;;  %929 = vmatpush1.bf16.msra.mxu1 %v6304_v20  ;;  %v93_v43 = vld [vmem:[%s8887_s0 + $0x50] sm:$0xff]  ;;  %v94_v44 = vld [vmem:[%s8887_s0 + $0x58] sm:$0xff]  ;;  %v95_v45 = vld [vmem:[%s8887_s0 + $0x60] sm:$0xff]  ;;  %73 = vst [vmem:[#allocation3 + $0x90] sm:$0xf0] %v6858_v57  ;;  %vm478_vm3 = vcmask 1043456  }
  0x24   :  { %254 = vmatprep.mubr.f32.mxu0 %v6857_v0  ;;  %930 = vmatprep.subr.bf16.mxu1 %v6308_v21  ;;  %v96_v46 = vld [vmem:[%s8887_s0 + $0x68] sm:$0xff]  ;;  %v97_v47 = vld [vmem:[%s8887_s0 + $0x70] sm:$0xff]  ;;  %v98_v48 = vld [vmem:[%s8887_s0 + $0x78] sm:$0xff]  ;;  %67 = vst.msk [vmem:[#allocation2 + $0x98] sm:$0xff] %vm64_vm2, %v6858_v57  ;;  %vm74_vm4 = vcmask 523268   ;;  %vm71_vm5 = vcmask 519168  }
  0x25   :  { %671 = vmatprep.subr.bf16.mxu0 %v6319_v23  ;;  %v6335_v50 = vld [vmem:[#allocation5 + $0x120] ss:$8 sps:$4 sm:$0xff]   ;;  %v6338_v51 = vld [vmem:[#allocation5 + $0x94] ss:$8 sps:$4 sm:$0xff]   ;;  %v6340_v52 = vld [vmem:[#allocation5 + $0x90] ss:$8 sps:$4 sm:$0xff]  }
  0x26   :  { %672 = vmatpush1.bf16.msra.mxu0 %v6317_v27  ;;  %v6343_v53 = vld [vmem:[#allocation5 + $0x134] ss:$8 sps:$4 sm:$0xff]   ;;  %v6341_v54 = vld [vmem:[#allocation5 + $0x130] ss:$8 sps:$4 sm:$0xff]   ;;  %v427_v55 = vld [vmem:[#allocation5 + $0xa0] sm:$0xff]  ;;  %69 = vst.msk [vmem:[#allocation3 + $0x8] sm:$0xff] %vm64_vm2, %v6858_v57 }
  0x27   :  { %5453 = vmatmul.mubr.msk.f32.gmra.mrb[8].mxu0 %vm110_vm1, %v87_v18  ;;  %931 = vmatpush1.bf16.msra.mxu1 %v6310_v25  ;;  %v428_v56 = vld [vmem:[#allocation5 + $0xa8] sm:$0xff]  ;;  %77 = vst.msk [vmem:[#allocation3 + $0xa8] sm:$0xff] %vm64_vm2, %v6858_v57  ;;  %v6349_v62 = vld [vmem:[#allocation5 + $0xb4] ss:$8 sps:$4 sm:$0xff]   ;;  %v6351_v63 = vld [vmem:[#allocation5 + $0xb0] ss:$8 sps:$4 sm:$0xff]  }
  0x28   :  { %260 = vmatprep.mubr.f32.mxu0 %v6857_v0  ;;  %932 = vmatprep.subr.bf16.mxu1 %v6314_v26  ;;  %v6344_v58 = vld [vmem:[#allocation5 + $0xa4] ss:$8 sps:$4 sm:$0xff]   ;;  %v5517_v59 = vcombine.low %v427_v55, %v428_v56  ;;  %v6346_v61 = vld [vmem:[#allocation5 + $0x140] ss:$8 sps:$4 sm:$0xff]   ;;  %v6354_v1 = vld [vmem:[#allocation5 + $0x154] ss:$8 sps:$4 sm:$0xff]  }
  0x29   :  { %673 = vmatprep.subr.bf16.mxu0 %v6325_v28  ;;  %v6348_v60 = vld [vmem:[#allocation5 + $0x144] ss:$8 sps:$4 sm:$0xff]   ;;  %v6352_v2 = vld [vmem:[#allocation5 + $0x150] ss:$8 sps:$4 sm:$0xff]   ;;  %v6358_v5 = vld [vmem:[#allocation5 + $0x160] ss:$8 sps:$4 sm:$0xff]  }
  0x2a   :  { %674 = vmatpush1.bf16.msra.mxu0 %v6323_v32  ;;  %v392_v3 = vld [vmem:[#allocation2 + $0x8] sm:$0xff]  ;;  %v6360_v4 = vld [vmem:[#allocation5 + $0x164] ss:$8 sps:$4 sm:$0xff]   ;;  %v6355_v7 = vld [vmem:[#allocation5 + $0x180] ss:$8 sps:$4 sm:$0xff]   ;;  %s6859_s15 = smov 64  }
  0x2b   :  { %5454 = vmatmul.mubr.msk.f32.gmra.mrb[10].mxu0 %vm110_vm1, %v88_v24  ;;  %933 = vmatpush1.bf16.msra.mxu1 %v6316_v30  ;;  %v6366_v6 = vld [vmem:[#allocation5 + $0x174] ss:$8 sps:$4 sm:$0xff]   ;;  %v6357_v8 = vld [vmem:[#allocation5 + $0x184] ss:$8 sps:$4 sm:$0xff]   ;;  %v6364_v9 = vld [vmem:[#allocation5 + $0x170] ss:$8 sps:$4 sm:$0xff]  }
  0x2c   :  { %266 = vmatprep.mubr.f32.mxu0 %v6857_v0  ;;  %934 = vmatprep.subr.bf16.mxu1 %v6320_v31  ;;  %v6361_v10 = vld [vmem:[#allocation5 + $0x190] ss:$8 sps:$4 sm:$0xff]   ;;  %v6363_v11 = vld [vmem:[#allocation5 + $0x194] ss:$8 sps:$4 sm:$0xff]   ;;  %v6367_v12 = vld [vmem:[#allocation5 + $0x1a0] ss:$8 sps:$4 sm:$0xff]  }
  0x2d   :  { %675 = vmatprep.subr.bf16.mxu0 %v6331_v34  ;;  %5521 = vmatprep.mubr.msk.bf16.mxu1 %vm64_vm2, %v392_v3  ;;  %v6369_v13 = vld [vmem:[#allocation5 + $0x1a4] ss:$8 sps:$4 sm:$0xff]   ;;  %v6370_v14 = vld [vmem:[#allocation5 + $0x1b0] ss:$8 sps:$4 sm:$0xff]   ;;  %v6372_v15 = vld [vmem:[#allocation5 + $0x1b4] ss:$8 sps:$4 sm:$0xff]  }
  0x2e   :  { %676 = vmatpush1.bf16.msra.mxu0 %v6329_v37  ;;  %v6373_v16 = vld [vmem:[#allocation5 + $0x1c0] ss:$8 sps:$4 sm:$0xff]   ;;  %v6375_v17 = vld [vmem:[#allocation5 + $0x1c4] ss:$8 sps:$4 sm:$0xff]   ;;  %v6376_v18 = vld [vmem:[#allocation5 + $0x1d0] ss:$8 sps:$4 sm:$0xff]  }
  0x2f   :  { %5455 = vmatmul.mubr.msk.f32.gmra.mrb[12].mxu0 %vm110_vm1, %v89_v29  ;;  %935 = vmatpush1.bf16.msra.mxu1 %v6322_v35  ;;  %v6378_v19 = vld [vmem:[#allocation5 + $0x1d4] ss:$8 sps:$4 sm:$0xff]   ;;  %v6379_v20 = vld [vmem:[#allocation5 + $0x1e0] ss:$8 sps:$4 sm:$0xff]   ;;  %v6381_v21 = vld [vmem:[#allocation5 + $0x1e4] ss:$8 sps:$4 sm:$0xff]  }
  0x30   :  { %272 = vmatprep.mubr.f32.mxu0 %v6857_v0  ;;  %936 = vmatprep.subr.bf16.mxu1 %v6326_v36  ;;  %v6382_v22 = vld [vmem:[#allocation5 + $0x1f0] ss:$8 sps:$4 sm:$0xff]   ;;  %v6384_v23 = vld [vmem:[#allocation5 + $0x1f4] ss:$8 sps:$4 sm:$0xff]   ;;  %v6387_v24 = vld [vmem:[#allocation5 + $0x204] ss:$8 sps:$4 sm:$0xff]  }
  0x31   :  { %677 = vmatprep.subr.bf16.mxu0 %v6337_v49  ;;  %v6385_v25 = vld [vmem:[#allocation5 + $0x200] ss:$8 sps:$4 sm:$0xff]   ;;  %v6390_v26 = vld [vmem:[#allocation5 + $0x214] ss:$8 sps:$4 sm:$0xff]   ;;  %v6388_v27 = vld [vmem:[#allocation5 + $0x210] ss:$8 sps:$4 sm:$0xff]  }
  0x32   :  { %678 = vmatpush1.bf16.msra.mxu0 %v6335_v50  ;;  %v6393_v28 = vld [vmem:[#allocation5 + $0x224] ss:$8 sps:$4 sm:$0xff]   ;;  %v6391_v29 = vld [vmem:[#allocation5 + $0x220] ss:$8 sps:$4 sm:$0xff]   ;;  %v6394_v30 = vld [vmem:[#allocation5 + $0x230] ss:$8 sps:$4 sm:$0xff]  }
  0x33   :  { %5456 = vmatmul.mubr.msk.f32.gmra.mrb[14].mxu0 %vm110_vm1, %v90_v33  ;;  %937 = vmatpush1.bf16.msra.mxu1 %v6328_v39  ;;  %v6396_v31 = vld [vmem:[#allocation5 + $0x234] ss:$8 sps:$4 sm:$0xff]   ;;  %v6399_v32 = vld [vmem:[#allocation5 + $0x244] ss:$8 sps:$4 sm:$0xff]   ;;  %v100_v33 = vlaneseq  ;;  %v78_v36 = vld [vmem:[%s8889_s2] sm:$0x3] }
  0x34   :  { %278 = vmatprep.mubr.f32.mxu0 %v6857_v0  ;;  %938 = vmatprep.subr.bf16.mxu1 %v6332_v40  ;;  %vm4090_vm6 = vcmask 1043968   ;;  %vm6860_vm7 = vmmov 0   ;;  %s6861_s22 = smov [#allocation8]  }
  0x35   :  { %679 = vmatprep.subr.bf16.mxu0 %v6343_v53  ;;  %v101_v34 = vshrl.u32 %v100_v33, 7 }
  0x36   :  { %680 = vmatpush1.bf16.msra.mxu0 %v6341_v54 }
  0x37   :  { %5457 = vmatmul.mubr.msk.f32.gmra.mrb[16].mxu0 %vm110_vm1, %v91_v38  ;;  %939 = vmatpush1.bf16.msra.mxu1 %v6334_v42  ;;  %v7041_v35 = vsub.s32 0, %v101_v34  ;;  %v7046_v37 = vsub.s32 1, %v101_v34 }
  0x38   :  { %284 = vmatprep.mubr.f32.mxu0 %v6857_v0  ;;  %940 = vmatprep.subr.bf16.mxu1 %v6338_v51 }
  0x39   :  { %681 = vmatprep.subr.bf16.mxu0 %v6348_v60  ;;  %v7049_v38 = vrot.slane %v78_v36, %v7041_v35  ;;  %v7052_v40 = vrot.slane %v78_v36, %v7046_v37 }
  0x3a   :  { %682 = vmatpush1.bf16.msra.mxu0 %v6346_v61 }
  0x3b   :  { %5458 = vmatmul.mubr.msk.f32.gmra.mrb[18].mxu0 %vm110_vm1, %v92_v41  ;;  %941 = vmatpush1.bf16.msra.mxu1 %v6340_v52 }
  0x3c   :  { %290 = vmatprep.mubr.f32.mxu0 %v6857_v0  ;;  %942 = vmatprep.subr.bf16.mxu1 %v6344_v58 }
  0x3d   :  { %683 = vmatprep.subr.bf16.mxu0 %v6354_v1  ;;  %v432_v1 = vld [vmem:[#allocation2 + $0x8] sm:$0xf0] }
  0x3e   :  { %684 = vmatpush1.bf16.msra.mxu0 %v6352_v2 }
  0x3f   :  { %5459 = vmatmul.mubr.msk.f32.gmra.mrb[20].mxu0 %vm110_vm1, %v93_v43  ;;  %943 = vmatpush1.bf16.msra.mxu1 %v5517_v59 }
  0x40   :  { %296 = vmatprep.mubr.f32.mxu0 %v6857_v0  ;;  %944 = vmatprep.subr.bf16.mxu1 %v6349_v62 }
  0x41   :  { %685 = vmatprep.subr.bf16.mxu0 %v6360_v4 }
  0x42   :  { %686 = vmatpush1.bf16.msra.mxu0 %v6358_v5  ;;  %v431_v5 = vld [vmem:[#allocation2] sm:$0xf0] }
  0x43   :  { %5460 = vmatmul.mubr.msk.f32.gmra.mrb[22].mxu0 %vm110_vm1, %v94_v44  ;;  %945 = vmatpush1.bf16.msra.mxu1 %v6351_v63 }
  0x44   :  { %302 = vmatprep.mubr.f32.mxu0 %v6857_v0  ;;  %687 = vmatprep.subr.bf16.mxu0 %v6366_v6 }
  0x45   :  { %1185 = vmatprep.subr.bf16.mxu1 %v6357_v8 }
  0x46   :  { %955 = vmatmul.mubr.bf16.vlgmr.msra.gmra.mrb[0].mxu1 %v6858_v57  ;;  %688 = vmatpush1.bf16.msra.mxu0 %v6364_v9  ;;  %v482_v9 = vrot.slane %v432_v1, 4 }
  0x47   :  { %5461 = vmatmul.mubr.msk.f32.gmra.mrb[24].mxu0 %vm110_vm1, %v95_v45  ;;  %1186 = vmatpush1.bf16.msra.mxu1 %v6355_v7 }
  0x48   :  { %308 = vmatprep.mubr.f32.mxu0 %v6857_v0  ;;  %2436 = vmatprep.subr.bf16.mxu0 %v6858_v57 }
  0x49   :  { %1187 = vmatprep.subr.bf16.mxu1 %v6363_v11 }
  0x4b   :  { %5462 = vmatmul.mubr.msk.f32.gmra.mrb[26].mxu0 %vm110_vm1, %v96_v46  ;;  %1188 = vmatpush1.bf16.msra.mxu1 %v6361_v10 }
  0x4c   :  { %314 = vmatprep.mubr.f32.mxu0 %v6857_v0  ;;  %1189 = vmatprep.subr.bf16.mxu1 %v6369_v13  ;;  %v479_v13 = vrot.slane %v431_v5, 4 }
  0x4f   :  { %5463 = vmatmul.mubr.msk.f32.gmra.mrb[28].mxu0 %vm110_vm1, %v97_v47  ;;  %1190 = vmatpush1.bf16.msra.mxu1 %v6367_v12 }
  0x50   :  { %320 = vmatprep.mubr.f32.mxu0 %v6857_v0  ;;  %1191 = vmatprep.subr.bf16.mxu1 %v6372_v15 }
  0x53   :  { %5464 = vmatmul.mubr.msk.f32.gmra.mrb[30].mxu0 %vm110_vm1, %v98_v48  ;;  %1192 = vmatpush1.bf16.msra.mxu1 %v6370_v14 }
  0x54   :  { %1193 = vmatprep.subr.bf16.mxu1 %v6375_v17 }
  0x57   :  { %1194 = vmatpush1.bf16.msra.mxu1 %v6373_v16 }
  0x58   :  { %1195 = vmatprep.subr.bf16.mxu1 %v6378_v19 }
  0x5b   :  { %1196 = vmatpush1.bf16.msra.mxu1 %v6376_v18 }
  0x5c   :  { %1197 = vmatprep.subr.bf16.mxu1 %v6381_v21 }
  0x5f   :  { %1198 = vmatpush1.bf16.msra.mxu1 %v6379_v20 }
  0x60   :  { %1199 = vmatprep.subr.bf16.mxu1 %v6384_v23 }
  0x63   :  { %1200 = vmatpush1.bf16.msra.mxu1 %v6382_v22 }
  0x64   :  { %1201 = vmatprep.subr.bf16.mxu1 %v6387_v24 }
  0x67   :  { %1202 = vmatpush1.bf16.msra.mxu1 %v6385_v25 }
  0x68   :  { %1203 = vmatprep.subr.bf16.mxu1 %v6390_v26 }
  0x6b   :  { %1204 = vmatpush1.bf16.msra.mxu1 %v6388_v27 }
  0x6c   :  { %1205 = vmatprep.subr.bf16.mxu1 %v6393_v28 }
  0x6f   :  { %1206 = vmatpush1.bf16.msra.mxu1 %v6391_v29 }
  0x70   :  { %1207 = vmatprep.subr.bf16.mxu1 %v6396_v31 }
  0x73   :  { %1208 = vmatpush1.bf16.msra.mxu1 %v6394_v30 }
  0x74   :  { %1577 = vmatprep.subr.bf16.mxu1 %v6399_v32 }
  0xea   :  { %v232_v39 = vpop.f32.mrb[0].mxu0 }
  0xeb   :  { %v234_v41 = vpop.f32.mrb[1].mxu0  ;;  %v233_v42 = vadd.f32 %v232_v39, %v7049_v38 }
  0xec   :  { %v235_v43 = vadd.f32 %v234_v41, %v7052_v40 }
  0xed   :  { %v327_v48 = vmax.f32 %v233_v42, 0.0 }
  0xee   :  { %v238_v44 = vpop.f32.mrb[2].mxu0  ;;  %v328_v50 = vmax.f32 %v235_v43, 0.0 }
  0xef   :  { %v239_v45 = vadd.f32 %v238_v44, %v7049_v38  ;;  %v240_v46 = vpop.f32.mrb[3].mxu0 }
  0xf0   :  { %v241_v47 = vadd.f32 %v240_v46, %v7052_v40 }
  0xf1   :  { %v329_v49 = vmax.f32 %v239_v45, 0.0 }
  0xf2   :  { %v330_v51 = vmax.f32 %v241_v47, 0.0  ;;  %v244_v52 = vpop.f32.mrb[4].mxu0 }
  0xf3   :  { %v7058_v53 = vpack.c.bf16 %v329_v49, %v327_v48  ;;  %v246_v54 = vpop.f32.mrb[5].mxu0  ;;  %v245_v56 = vadd.f32 %v244_v52, %v7049_v38 }
  0xf4   :  { %v360_v55 = vpack.c.bf16 %v330_v51, %v328_v50  ;;  %v247_v57 = vadd.f32 %v246_v54, %v7052_v40 }
  0xf5   :  { %375 = vst [vmem:[#allocation2 + $0x10] sm:$0xff] %v7058_v53  ;;  %v331_v62 = vmax.f32 %v245_v56, 0.0  ;;  %v480_v12 = vrot.slane %v7058_v53, 4 }
  0xf6   :  { %376 = vst.msk [vmem:[#allocation2 + $0x18] sm:$0xff] %vm64_vm2, %v360_v55  ;;  %v250_v58 = vpop.f32.mrb[6].mxu0  ;;  %v332_v2 = vmax.f32 %v247_v57, 0.0 }
  0xf7   :  { %v251_v59 = vadd.f32 %v250_v58, %v7049_v38  ;;  %v252_v60 = vpop.f32.mrb[7].mxu0  ;;  %v481_v23 = vsel %vm478_vm3, %v479_v13, %v480_v12 }
  0xf8   :  { %v253_v61 = vadd.f32 %v252_v60, %v7052_v40 }
  0xf9   :  { %v333_v63 = vmax.f32 %v251_v59, 0.0 }
  0xfa   :  { %v334_v3 = vmax.f32 %v253_v61, 0.0  ;;  %v256_v4 = vpop.f32.mrb[8].mxu0 }
  0xfb   :  { %v7066_v6 = vpack.c.bf16 %v333_v63, %v331_v62  ;;  %v258_v7 = vpop.f32.mrb[9].mxu0  ;;  %v257_v10 = vadd.f32 %v256_v4, %v7049_v38 }
  0xfc   :  { %v362_v8 = vpack.c.bf16 %v334_v3, %v332_v2  ;;  %v259_v14 = vadd.f32 %v258_v7, %v7052_v40 }
  0xfd   :  { %v7069_v11 = vld [vmem:[#allocation2 + $0x18] sm:$0xff]  ;;  %v335_v21 = vmax.f32 %v257_v10, 0.0  ;;  %v7089_v32 = vrot.slane %v7066_v6, 4 }
  0xfe   :  { %378 = vst.msk [vmem:[#allocation2 + $0x28] sm:$0xff] %vm64_vm2, %v362_v8  ;;  %v262_v15 = vpop.f32.mrb[10].mxu0  ;;  %v483_v16 = vrot.slane %v7069_v11, 4  ;;  %5522 = vmatprep.mubr.msk.bf16.mxu1 %vm64_vm2, %v7069_v11  ;;  %v336_v24 = vmax.f32 %v259_v14, 0.0 }
  0xff   :  { %v263_v17 = vadd.f32 %v262_v15, %v7049_v38  ;;  %v264_v18 = vpop.f32.mrb[11].mxu0  ;;  %965 = vmatmul.mubr.bf16.gmra.mrb[4].mxu1 %v7058_v53  ;;  %v486_v46 = vsel %vm478_vm3, %v480_v12, %v7089_v32 }
 0x100   :  { %v265_v19 = vadd.f32 %v264_v18, %v7052_v40  ;;  %v484_v20 = vsel %vm478_vm3, %v482_v9, %v483_v16 }
 0x101   :  { %v337_v22 = vmax.f32 %v263_v17, 0.0  ;;  %5489 = vmatprep.mubr.msk.bf16.mxu0 %vm64_vm2, %v484_v20 }
 0x102   :  { %v338_v25 = vmax.f32 %v265_v19, 0.0  ;;  %v268_v26 = vpop.f32.mrb[12].mxu0  ;;  %698 = vmatmul.mubr.bf16.vlgmr.msra.gmra.mrb[32].mxu0 %v481_v23 }
 0x103   :  { %v7083_v27 = vpack.c.bf16 %v337_v22, %v335_v21  ;;  %v270_v28 = vpop.f32.mrb[13].mxu0  ;;  %v269_v30 = vadd.f32 %v268_v26, %v7049_v38 }
 0x104   :  { %v364_v29 = vpack.c.bf16 %v338_v25, %v336_v24  ;;  %v271_v33 = vadd.f32 %v270_v28, %v7052_v40 }
 0x105   :  { %v7086_v31 = vld [vmem:[#allocation2 + $0x28] sm:$0xff]  ;;  %v339_v44 = vmax.f32 %v269_v30, 0.0  ;;  %v489_v56 = vrot.slane %v7083_v27, 4 }
 0x106   :  { %380 = vst.msk [vmem:[#allocation2 + $0x38] sm:$0xff] %vm64_vm2, %v364_v29  ;;  %v274_v34 = vpop.f32.mrb[14].mxu0  ;;  %v7094_v36 = vrot.slane %v7086_v31, 4  ;;  %5523 = vmatprep.mubr.msk.bf16.mxu1 %vm64_vm2, %v7086_v31  ;;  %v340_v47 = vmax.f32 %v271_v33, 0.0 }
 0x107   :  { %v275_v39 = vadd.f32 %v274_v34, %v7049_v38  ;;  %v276_v41 = vpop.f32.mrb[15].mxu0  ;;  %975 = vmatmul.mubr.bf16.gmra.mrb[8].mxu1 %v7066_v6  ;;  %v7128_v3 = vsel %vm478_vm3, %v7089_v32, %v489_v56 }
 0x108   :  { %v277_v42 = vadd.f32 %v276_v41, %v7052_v40  ;;  %v488_v43 = vsel %vm478_vm3, %v483_v16, %v7094_v36 }
 0x109   :  { %v341_v45 = vmax.f32 %v275_v39, 0.0  ;;  %5490 = vmatprep.mubr.msk.bf16.mxu0 %vm64_vm2, %v488_v43 }
 0x10a   :  { %v342_v48 = vmax.f32 %v277_v42, 0.0  ;;  %v280_v49 = vpop.f32.mrb[16].mxu0  ;;  %708 = vmatmul.mubr.bf16.gmra.mrb[36].mxu0 %v486_v46 }
 0x10b   :  { %v7106_v50 = vpack.c.bf16 %v341_v45, %v339_v44  ;;  %v282_v51 = vpop.f32.mrb[17].mxu0  ;;  %v281_v54 = vadd.f32 %v280_v49, %v7049_v38 }
 0x10c   :  { %v366_v52 = vpack.c.bf16 %v342_v48, %v340_v47  ;;  %v283_v57 = vadd.f32 %v282_v51, %v7052_v40 }
 0x10d   :  { %v7109_v55 = vld [vmem:[#allocation2 + $0x38] sm:$0xff]  ;;  %v343_v1 = vmax.f32 %v281_v54, 0.0  ;;  %v493_v14 = vrot.slane %v7106_v50, 4 }
 0x10e   :  { %382 = vst.msk [vmem:[#allocation2 + $0x48] sm:$0xff] %vm64_vm2, %v366_v52  ;;  %v286_v58 = vpop.f32.mrb[18].mxu0  ;;  %v491_v59 = vrot.slane %v7109_v55, 4  ;;  %5524 = vmatprep.mubr.msk.bf16.mxu1 %vm64_vm2, %v7109_v55  ;;  %v344_v4 = vmax.f32 %v283_v57, 0.0 }
 0x10f   :  { %v287_v60 = vadd.f32 %v286_v58, %v7049_v38  ;;  %v288_v61 = vpop.f32.mrb[19].mxu0  ;;  %985 = vmatmul.mubr.bf16.gmra.mrb[12].mxu1 %v7083_v27  ;;  %v7151_v24 = vsel %vm478_vm3, %v489_v56, %v493_v14 }
 0x110   :  { %v289_v62 = vadd.f32 %v288_v61, %v7052_v40  ;;  %v7122_v63 = vsel %vm478_vm3, %v7094_v36, %v491_v59 }
 0x111   :  { %v345_v2 = vmax.f32 %v287_v60, 0.0  ;;  %5491 = vmatprep.mubr.msk.bf16.mxu0 %vm64_vm2, %v7122_v63 }
 0x112   :  { %v346_v5 = vmax.f32 %v289_v62, 0.0  ;;  %v292_v7 = vpop.f32.mrb[20].mxu0  ;;  %718 = vmatmul.mubr.bf16.gmra.mrb[40].mxu0 %v7128_v3 }
 0x113   :  { %v7131_v8 = vpack.c.bf16 %v345_v2, %v343_v1  ;;  %v294_v9 = vpop.f32.mrb[21].mxu0  ;;  %v293_v12 = vadd.f32 %v292_v7, %v7049_v38 }
 0x114   :  { %v368_v10 = vpack.c.bf16 %v346_v5, %v344_v4  ;;  %v295_v15 = vadd.f32 %v294_v9, %v7052_v40 }
 0x115   :  { %v7134_v13 = vld [vmem:[#allocation2 + $0x48] sm:$0xff]  ;;  %v347_v22 = vmax.f32 %v293_v12, 0.0  ;;  %v497_v41 = vrot.slane %v7131_v8, 4 }
 0x116   :  { %384 = vst.msk [vmem:[#allocation2 + $0x58] sm:$0xff] %vm64_vm2, %v368_v10  ;;  %v298_v16 = vpop.f32.mrb[22].mxu0  ;;  %v495_v17 = vrot.slane %v7134_v13, 4  ;;  %5525 = vmatprep.mubr.msk.bf16.mxu1 %vm64_vm2, %v7134_v13  ;;  %v348_v25 = vmax.f32 %v295_v15, 0.0 }
 0x117   :  { %v299_v18 = vadd.f32 %v298_v16, %v7049_v38  ;;  %v300_v19 = vpop.f32.mrb[23].mxu0  ;;  %995 = vmatmul.mubr.bf16.gmra.mrb[16].mxu1 %v7106_v50  ;;  %v7174_v52 = vsel %vm478_vm3, %v493_v14, %v497_v41 }
 0x118   :  { %v301_v20 = vadd.f32 %v300_v19, %v7052_v40  ;;  %v7146_v21 = vsel %vm478_vm3, %v491_v59, %v495_v17 }
 0x119   :  { %v349_v23 = vmax.f32 %v299_v18, 0.0  ;;  %5492 = vmatprep.mubr.msk.bf16.mxu0 %vm64_vm2, %v7146_v21 }
 0x11a   :  { %v350_v26 = vmax.f32 %v301_v20, 0.0  ;;  %v304_v28 = vpop.f32.mrb[24].mxu0  ;;  %728 = vmatmul.mubr.bf16.gmra.mrb[44].mxu0 %v7151_v24 }
 0x11b   :  { %v7154_v29 = vpack.c.bf16 %v349_v23, %v347_v22  ;;  %v306_v30 = vpop.f32.mrb[25].mxu0  ;;  %v305_v34 = vadd.f32 %v304_v28, %v7049_v38 }
 0x11c   :  { %v370_v33 = vpack.c.bf16 %v350_v26, %v348_v25  ;;  %v307_v42 = vadd.f32 %v306_v30, %v7052_v40  ;;  %v6397_v26 = vld [vmem:[#allocation5 + $0x240] ss:$8 sps:$4 sm:$0xff]  }
 0x11d   :  { %v7157_v39 = vld [vmem:[#allocation2 + $0x58] sm:$0xff]  ;;  %v351_v49 = vmax.f32 %v305_v34, 0.0  ;;  %v501_v2 = vrot.slane %v7154_v29, 4  ;;  %v6402_v34 = vld [vmem:[#allocation5 + $0x254] ss:$8 sps:$4 sm:$0xff]  }
 0x11e   :  { %386 = vst.msk [vmem:[#allocation2 + $0x68] sm:$0xff] %vm64_vm2, %v370_v33  ;;  %v310_v43 = vpop.f32.mrb[26].mxu0  ;;  %v499_v44 = vrot.slane %v7157_v39, 4  ;;  %5526 = vmatprep.mubr.msk.bf16.mxu1 %vm64_vm2, %v7157_v39  ;;  %v352_v54 = vmax.f32 %v307_v42, 0.0  ;;  %v6400_v42 = vld [vmem:[#allocation5 + $0x250] ss:$8 sps:$4 sm:$0xff]  }
 0x11f   :  { %v311_v45 = vadd.f32 %v310_v43, %v7049_v38  ;;  %v312_v46 = vpop.f32.mrb[27].mxu0  ;;  %1005 = vmatmul.mubr.bf16.gmra.mrb[20].mxu1 %v7131_v8 }
 0x120   :  { %v313_v47 = vadd.f32 %v312_v46, %v7052_v40  ;;  %v7169_v48 = vsel %vm478_vm3, %v495_v17, %v499_v44  ;;  %v7197_v17 = vsel %vm478_vm3, %v497_v41, %v501_v2  ;;  %v6406_v46 = vld [vmem:[#allocation5 + $0x270] ss:$8 sps:$4 sm:$0xff]  }
 0x121   :  { %v353_v51 = vmax.f32 %v311_v45, 0.0  ;;  %5493 = vmatprep.mubr.msk.bf16.mxu0 %vm64_vm2, %v7169_v48  ;;  %v6403_v45 = vld [vmem:[#allocation5 + $0x260] ss:$8 sps:$4 sm:$0xff]  }
 0x122   :  { %v354_v56 = vmax.f32 %v313_v47, 0.0  ;;  %738 = vmatmul.mubr.bf16.gmra.mrb[48].mxu0 %v7174_v52  ;;  %v316_v57 = vpop.f32.mrb[28].mxu0  ;;  %v6411_v47 = vld [vmem:[#allocation5 + $0x284] ss:$8 sps:$4 sm:$0xff]  }
 0x123   :  { %v7177_v58 = vpack.c.bf16 %v353_v51, %v351_v49  ;;  %v317_v59 = vadd.f32 %v316_v57, %v7049_v38  ;;  %v318_v60 = vpop.f32.mrb[29].mxu0  ;;  %v6409_v49 = vld [vmem:[#allocation5 + $0x280] ss:$8 sps:$4 sm:$0xff]   ;;  %v6414_v51 = vld [vmem:[#allocation5 + $0x294] ss:$8 sps:$4 sm:$0xff]  }
 0x124   :  { %v372_v61 = vpack.c.bf16 %v354_v56, %v352_v54  ;;  %v319_v62 = vadd.f32 %v318_v60, %v7052_v40  ;;  %v6412_v54 = vld [vmem:[#allocation5 + $0x290] ss:$8 sps:$4 sm:$0xff]   ;;  %v6417_v56 = vld [vmem:[#allocation5 + $0x2a4] ss:$8 sps:$4 sm:$0xff]   ;;  %v6415_v57 = vld [vmem:[#allocation5 + $0x2a0] ss:$8 sps:$4 sm:$0xff]  }
 0x125   :  { %v7181_v1 = vld [vmem:[#allocation2 + $0x68] sm:$0xff]  ;;  %v355_v7 = vmax.f32 %v317_v59, 0.0 }
 0x126   :  { %388 = vst.msk [vmem:[#allocation2 + $0x78] sm:$0xff] %vm64_vm2, %v372_v61  ;;  %v322_v4 = vpop.f32.mrb[30].mxu0  ;;  %v503_v5 = vrot.slane %v7181_v1, 4  ;;  %5527 = vmatprep.mubr.msk.bf16.mxu1 %vm64_vm2, %v7181_v1  ;;  %v356_v12 = vmax.f32 %v319_v62, 0.0  ;;  %v6420_v59 = vld [vmem:[#allocation5 + $0x2b4] ss:$8 sps:$4 sm:$0xff]  }
 0x127   :  { %v323_v9 = vadd.f32 %v322_v4, %v7049_v38  ;;  %v324_v10 = vpop.f32.mrb[31].mxu0  ;;  %1015 = vmatmul.mubr.bf16.gmra.mrb[24].mxu1 %v7154_v29  ;;  %v6418_v60 = vld [vmem:[#allocation5 + $0x2b0] ss:$8 sps:$4 sm:$0xff]   ;;  %v6423_v61 = vld [vmem:[#allocation5 + $0x2c4] ss:$8 sps:$4 sm:$0xff]  }
 0x128   :  { %v325_v14 = vadd.f32 %v324_v10, %v7052_v40  ;;  %v7192_v15 = vsel %vm478_vm3, %v499_v44, %v503_v5  ;;  %v7206_v40 = vrot.slane %v7177_v58, 4  ;;  %v6405_v44 = vld [vmem:[#allocation5 + $0x264] ss:$8 sps:$4 sm:$0xff]   ;;  %v6421_v62 = vld [vmem:[#allocation5 + $0x2c0] ss:$8 sps:$4 sm:$0xff]  }
 0x129   :  { %v357_v16 = vmax.f32 %v323_v9, 0.0  ;;  %5494 = vmatprep.mubr.msk.bf16.mxu0 %vm64_vm2, %v7192_v15  ;;  %v6424_v4 = vld [vmem:[#allocation5 + $0x2d0] ss:$8 sps:$4 sm:$0xff]   ;;  %v6432_v9 = vld [vmem:[#allocation5 + $0x2f4] ss:$8 sps:$4 sm:$0xff]  }
 0x12a   :  { %v358_v18 = vmax.f32 %v325_v14, 0.0  ;;  %748 = vmatmul.mubr.bf16.gmra.mrb[52].mxu0 %v7197_v17  ;;  %v7225_v25 = vsel %vm478_vm3, %v501_v2, %v7206_v40  ;;  %v6426_v2 = vld [vmem:[#allocation5 + $0x2d4] ss:$8 sps:$4 sm:$0xff]   ;;  %v6430_v10 = vld [vmem:[#allocation5 + $0x2f0] ss:$8 sps:$4 sm:$0xff]  }
 0x12b   :  { %v7200_v38 = vpack.c.bf16 %v357_v16, %v355_v7  ;;  %v6427_v7 = vld [vmem:[#allocation5 + $0x2e0] ss:$8 sps:$4 sm:$0xff]   ;;  %v1331_v16 = vld [vmem:[#allocation2 + $0x18] sm:$0xf0] }
 0x12c   :  { %v374_v19 = vpack.c.bf16 %v358_v18, %v356_v12  ;;  %v6435_v12 = vld [vmem:[#allocation5 + $0x304] ss:$8 sps:$4 sm:$0xff]   ;;  %v1394_v18 = vrot.slane %v1331_v16, 4 }
 0x12d   :  { %389 = vst [vmem:[#allocation2 + $0x80] sm:$0xff] %v7200_v38  ;;  %v7203_v20 = vld [vmem:[#allocation2 + $0x78] sm:$0xff] }
 0x12e   :  { %390 = vst.msk [vmem:[#allocation2 + $0x88] sm:$0xff] %vm64_vm2, %v374_v19  ;;  %v7210_v22 = vrot.slane %v7203_v20, 4  ;;  %5528 = vmatprep.mubr.msk.bf16.mxu1 %vm64_vm2, %v7203_v20  ;;  %v1396_v19 = vsel %vm478_vm3, %v1394_v18, %v7094_v36  ;;  %v6444_v36 = vld [vmem:[#allocation5 + $0x334] ss:$8 sps:$4 sm:$0xff]  }
 0x12f   :  { %1025 = vmatmul.mubr.bf16.gmra.mrb[28].mxu1 %v7177_v58 }
 0x130   :  { %5553 = vmatprep.mubr.msk.bf16.mxu1 %vm64_vm2, %v7069_v11  ;;  %v7219_v23 = vsel %vm478_vm3, %v503_v5, %v7210_v22  ;;  %v6429_v5 = vld [vmem:[#allocation5 + $0x2e4] ss:$8 sps:$4 sm:$0xff]  }
 0x131   :  { %5495 = vmatprep.mubr.msk.bf16.mxu0 %vm64_vm2, %v7219_v23 }
 0x132   :  { %758 = vmatmul.mubr.bf16.gmra.mrb[56].mxu0 %v7225_v25 }
 0x134   :  { %v433_v28 = vld [vmem:[#allocation2 + $0x80] sm:$0xf] }
 0x135   :  { %v434_v30 = vld [vmem:[#allocation2 + $0x88] sm:$0xf]  ;;  %v509_v33 = vrot.slane %v433_v28, 4 }
 0x136   :  { %v511_v41 = vrot.slane %v434_v30, 4  ;;  %v7252_v14 = vld [vmem:[#allocation2 + $0x88] sm:$0xff]  ;;  %v6433_v30 = vld [vmem:[#allocation5 + $0x300] ss:$8 sps:$4 sm:$0xff]  }
 0x137   :  { %1218 = vmatmul.mubr.bf16.vlgmr.msra.gmra.mrb[0].mxu1 %v7058_v53  ;;  %v510_v43 = vsel %vm478_vm3, %v7206_v40, %v509_v33  ;;  %v6408_v53 = vld [vmem:[#allocation5 + $0x274] ss:$8 sps:$4 sm:$0xff]  }
 0x138   :  { %1578 = vmatpush1.bf16.msra.mxu1 %v6397_v26  ;;  %5554 = vmatprep.mubr.msk.bf16.mxu1 %vm64_vm2, %v7086_v31  ;;  %v512_v11 = vsel %vm478_vm3, %v7210_v22, %v511_v41  ;;  %v1330_v26 = vld [vmem:[#allocation2 + $0x10] sm:$0xf0]  ;;  %v6438_v33 = vld [vmem:[#allocation5 + $0x314] ss:$8 sps:$4 sm:$0xff]   ;;  %v6436_v41 = vld [vmem:[#allocation5 + $0x310] ss:$8 sps:$4 sm:$0xff]  }
 0x139   :  { %5496 = vmatprep.mubr.msk.bf16.mxu0 %vm64_vm2, %v512_v11  ;;  %1579 = vmatprep.subr.bf16.mxu1 %v6402_v34  ;;  %v1391_v28 = vrot.slane %v1330_v26, 4  ;;  %v6441_v11 = vld [vmem:[#allocation5 + $0x324] ss:$8 sps:$4 sm:$0xff]  }
 0x13a   :  { %768 = vmatmul.mubr.bf16.gmra.mrb[60].mxu0 %v510_v43  ;;  %v6442_v43 = vld [vmem:[#allocation5 + $0x330] ss:$8 sps:$4 sm:$0xff]  }
 0x13b   :  { %v1393_v34 = vsel %vm478_vm3, %v1391_v28, %v7089_v32  ;;  %v6447_v32 = vld [vmem:[#allocation5 + $0x344] ss:$8 sps:$4 sm:$0xff]  }
 0x13c   :  { %1580 = vmatpush1.bf16.msra.mxu1 %v6400_v42  ;;  %v6439_v42 = vld [vmem:[#allocation5 + $0x320] ss:$8 sps:$4 sm:$0xff]  }
 0x13d   :  { %1581 = vmatprep.subr.bf16.mxu1 %v6405_v44  ;;  %v6445_v44 = vld [vmem:[#allocation5 + $0x340] ss:$8 sps:$4 sm:$0xff]  }
 0x13f   :  { %1228 = vmatmul.mubr.bf16.gmra.mrb[4].mxu1 %v7066_v6 }
 0x140   :  { %5555 = vmatprep.mubr.msk.bf16.mxu1 %vm64_vm2, %v7109_v55  ;;  %1582 = vmatpush1.bf16.msra.mxu1 %v6403_v45  ;;  %v6448_v45 = vld [vmem:[#allocation5 + $0x350] ss:$8 sps:$4 sm:$0xff]  }
 0x141   :  { %1583 = vmatprep.subr.bf16.mxu1 %v6408_v53  ;;  %v6451_v53 = vld [vmem:[#allocation5 + $0x360] ss:$8 sps:$4 sm:$0xff]  }
 0x144   :  { %1584 = vmatpush1.bf16.msra.mxu1 %v6406_v46  ;;  %v6454_v46 = vld [vmem:[#allocation5 + $0x370] ss:$8 sps:$4 sm:$0xff]  }
 0x145   :  { %1585 = vmatprep.subr.bf16.mxu1 %v6411_v47  ;;  %v6470_v47 = vld [vmem:[%s8892_s5 + $0x68] sm:$0xff]  }
 0x147   :  { %1238 = vmatmul.mubr.bf16.gmra.mrb[8].mxu1 %v7083_v27 }
 0x148   :  { %5556 = vmatprep.mubr.msk.bf16.mxu1 %vm64_vm2, %v7134_v13  ;;  %1586 = vmatpush1.bf16.msra.mxu1 %v6409_v49  ;;  %v7279_v49 = vld [vmem:[#allocation2] sm:$0xff] }
 0x149   :  { %1587 = vmatprep.subr.bf16.mxu1 %v6414_v51  ;;  %v6471_v51 = vld [vmem:[%s8892_s5 + $0x70] sm:$0xff]   ;;  %75 = vst.msk [vmem:[#allocation3 + $0x98] sm:$0xf0] %vm74_vm4, %v7279_v49 }
 0x14a   :  { %72 = vst.msk [vmem:[#allocation3 + $0x18] sm:$0xf] %vm71_vm5, %v7279_v49 }
 0x14c   :  { %1588 = vmatpush1.bf16.msra.mxu1 %v6412_v54  ;;  %v6460_v54 = vld [vmem:[#allocation5 + $0x390] ss:$8 sps:$4 sm:$0xff]  }
 0x14d   :  { %1589 = vmatprep.subr.bf16.mxu1 %v6417_v56  ;;  %v6465_v56 = vld [vmem:[#allocation5 + $0x3a4] ss:$8 sps:$4 sm:$0xff]  }
 0x14f   :  { %1248 = vmatmul.mubr.bf16.gmra.mrb[12].mxu1 %v7106_v50 }
 0x150   :  { %5557 = vmatprep.mubr.msk.bf16.mxu1 %vm64_vm2, %v7157_v39  ;;  %1590 = vmatpush1.bf16.msra.mxu1 %v6415_v57  ;;  %v6472_v57 = vld [vmem:[%s8892_s5 + $0x78] sm:$0xff]  }
 0x151   :  { %1591 = vmatprep.subr.bf16.mxu1 %v6420_v59  ;;  %v1419_v59 = vrot.slane %v7252_v14, 4 }
 0x154   :  { %1592 = vmatpush1.bf16.msra.mxu1 %v6418_v60  ;;  %v6468_v60 = vld [vmem:[#allocation5 + $0x3b4] ss:$8 sps:$4 sm:$0xff]  }
 0x155   :  { %1593 = vmatprep.subr.bf16.mxu1 %v6423_v61  ;;  %v1420_v61 = vsel %vm478_vm3, %v7210_v22, %v1419_v59 }
 0x157   :  { %1258 = vmatmul.mubr.bf16.gmra.mrb[16].mxu1 %v7131_v8 }
 0x158   :  { %5558 = vmatprep.mubr.msk.bf16.mxu1 %vm64_vm2, %v7181_v1  ;;  %1594 = vmatpush1.bf16.msra.mxu1 %v6421_v62  ;;  %v1347_v62 = vld [vmem:[#allocation2 + $0x98] sm:$0xf] }
 0x159   :  { %1595 = vmatprep.subr.bf16.mxu1 %v6426_v2  ;;  %v6466_v2 = vld [vmem:[#allocation5 + $0x3b0] ss:$8 sps:$4 sm:$0xff]  }
 0x15c   :  { %1596 = vmatpush1.bf16.msra.mxu1 %v6424_v4  ;;  %v1417_v4 = vrot.slane %v7200_v38, 4 }
 0x15d   :  { %1597 = vmatprep.subr.bf16.mxu1 %v6429_v5  ;;  %v6474_v5 = vld [vmem:[%s8892_s5 + $0x88] sm:$0xff]  }
 0x15e   :  { %v1418_v22 = vsel %vm478_vm3, %v7206_v40, %v1417_v4  ;;  %v6476_v40 = vld [vmem:[%s8892_s5 + $0x1e0] sm:$0xff]  }
 0x15f   :  { %1268 = vmatmul.mubr.bf16.gmra.mrb[20].mxu1 %v7154_v29 }
 0x160   :  { %5559 = vmatprep.mubr.msk.bf16.mxu1 %vm64_vm2, %v7203_v20  ;;  %1598 = vmatpush1.bf16.msra.mxu1 %v6427_v7  ;;  %v1423_v7 = vrot.slane %v1347_v62, 4  ;;  %v6495_v62 = vld [vmem:[%s8892_s5 + $0x238] sm:$0xff]  }
 0x161   :  { %1599 = vmatprep.subr.bf16.mxu1 %v6432_v9 }
 0x162   :  { %v1424_v9 = vsel %vm478_vm3, %v1419_v59, %v1423_v7  ;;  %v6487_v59 = vld [vmem:[%s8892_s5 + $0xb8] sm:$0xff]  }
 0x164   :  { %1600 = vmatpush1.bf16.msra.mxu1 %v6430_v10  ;;  %v1346_v10 = vld [vmem:[#allocation2 + $0x90] sm:$0xf] }
 0x165   :  { %1893 = vmatprep.subr.bf16.mxu1 %v6435_v12  ;;  %v1421_v12 = vrot.slane %v1346_v10, 4 }
 0x167   :  { %1278 = vmatmul.mubr.bf16.gmra.mrb[24].mxu1 %v7177_v58  ;;  %v1422_v16 = vsel %vm478_vm3, %v1417_v4, %v1421_v12 }
 0x168   :  { %5560 = vmatprep.mubr.msk.bf16.mxu1 %vm64_vm2, %v7252_v14 }
 0x16f   :  { %1288 = vmatmul.mubr.bf16.gmra.mrb[28].mxu1 %v7200_v38 }
 0x170   :  { %5585 = vmatprep.mubr.msk.bf16.mxu1 %vm64_vm2, %v1396_v19 }
 0x177   :  { %1610 = vmatmul.mubr.bf16.vlgmr.msra.gmra.mrb[0].mxu1 %v1393_v34 }
 0x178   :  { %1894 = vmatpush1.bf16.msra.mxu1 %v6433_v30  ;;  %5586 = vmatprep.mubr.msk.bf16.mxu1 %vm64_vm2, %v7122_v63  ;;  %v6450_v63 = vld [vmem:[#allocation5 + $0x354] ss:$8 sps:$4 sm:$0xff]  }
 0x179   :  { %1895 = vmatprep.subr.bf16.mxu1 %v6438_v33 }
 0x17c   :  { %1896 = vmatpush1.bf16.msra.mxu1 %v6436_v41 }
 0x17d   :  { %1897 = vmatprep.subr.bf16.mxu1 %v6441_v11 }
 0x17f   :  { %1620 = vmatmul.mubr.bf16.gmra.mrb[4].mxu1 %v7128_v3  ;;  %v6453_v3 = vld [vmem:[#allocation5 + $0x364] ss:$8 sps:$4 sm:$0xff]  }
 0x180   :  { %5587 = vmatprep.mubr.msk.bf16.mxu1 %vm64_vm2, %v7146_v21  ;;  %1898 = vmatpush1.bf16.msra.mxu1 %v6439_v42  ;;  %v6456_v21 = vld [vmem:[#allocation5 + $0x374] ss:$8 sps:$4 sm:$0xff]  }
 0x181   :  { %1899 = vmatprep.subr.bf16.mxu1 %v6444_v36 }
 0x184   :  { %1900 = vmatpush1.bf16.msra.mxu1 %v6442_v43 }
 0x185   :  { %1901 = vmatprep.subr.bf16.mxu1 %v6447_v32 }
 0x187   :  { %1630 = vmatmul.mubr.bf16.gmra.mrb[8].mxu1 %v7151_v24  ;;  %v6469_v24 = vld [vmem:[%s8892_s5 + $0x60] sm:$0xff]  }
 0x188   :  { %5588 = vmatprep.mubr.msk.bf16.mxu1 %vm64_vm2, %v7169_v48  ;;  %1902 = vmatpush1.bf16.msra.mxu1 %v6445_v44  ;;  %v6459_v48 = vld [vmem:[#allocation5 + $0x384] ss:$8 sps:$4 sm:$0xff]  }
 0x189   :  { %1903 = vmatprep.subr.bf16.mxu1 %v6450_v63  ;;  %2437 = vmatpush1.bf16.msra.mxu0 %v6469_v24  ;;  %v6478_v24 = vld [vmem:[%s8892_s5 + $0x98] sm:$0xff]  }
 0x18a   :  { %2438 = vmatprep.subr.bf16.mxu0 %v7279_v49 }
 0x18c   :  { %1904 = vmatpush1.bf16.msra.mxu1 %v6448_v45  ;;  %v6477_v45 = vld [vmem:[%s8892_s5 + $0x1e8] sm:$0xff]  }
 0x18d   :  { %1905 = vmatprep.subr.bf16.mxu1 %v6453_v3  ;;  %2439 = vmatpush1.bf16.msra.mxu0 %v6470_v47  ;;  %v6479_v3 = vld [vmem:[%s8892_s5 + $0x1f0] sm:$0xff]   ;;  %v6481_v47 = vld [vmem:[%s8892_s5 + $0x1f8] sm:$0xff]  }
 0x18e   :  { %2440 = vmatprep.subr.bf16.mxu0 %v7279_v49 }
 0x18f   :  { %1640 = vmatmul.mubr.bf16.gmra.mrb[12].mxu1 %v7174_v52  ;;  %v6457_v52 = vld [vmem:[#allocation5 + $0x380] ss:$8 sps:$4 sm:$0xff]  }
 0x190   :  { %5589 = vmatprep.mubr.msk.bf16.mxu1 %vm64_vm2, %v7192_v15  ;;  %1906 = vmatpush1.bf16.msra.mxu1 %v6451_v53  ;;  %v6462_v15 = vld [vmem:[#allocation5 + $0x394] ss:$8 sps:$4 sm:$0xff]  }
 0x191   :  { %1907 = vmatprep.subr.bf16.mxu1 %v6456_v21  ;;  %2441 = vmatpush1.bf16.msra.mxu0 %v6471_v51  ;;  %v6482_v51 = vld [vmem:[%s8892_s5 + $0xa8] sm:$0xff]  }
 0x192   :  { %2442 = vmatprep.subr.bf16.mxu0 %v7279_v49 }
 0x194   :  { %1908 = vmatpush1.bf16.msra.mxu1 %v6454_v46 }
 0x195   :  { %1909 = vmatprep.subr.bf16.mxu1 %v6459_v48  ;;  %2443 = vmatpush1.bf16.msra.mxu0 %v6472_v57  ;;  %v6486_v57 = vld [vmem:[%s8892_s5 + $0x210] sm:$0xff]  }
 0x196   :  { %2444 = vmatprep.subr.bf16.mxu0 %v7279_v49 }
 0x197   :  { %1650 = vmatmul.mubr.bf16.gmra.mrb[16].mxu1 %v7197_v17  ;;  %v6463_v17 = vld [vmem:[#allocation5 + $0x3a0] ss:$8 sps:$4 sm:$0xff]  }
 0x198   :  { %5590 = vmatprep.mubr.msk.bf16.mxu1 %vm64_vm2, %v7219_v23  ;;  %1910 = vmatpush1.bf16.msra.mxu1 %v6457_v52  ;;  %v6473_v23 = vld [vmem:[%s8892_s5 + $0x80] sm:$0xff]  }
 0x199   :  { %1911 = vmatprep.subr.bf16.mxu1 %v6462_v15  ;;  %2445 = vmatpush1.bf16.msra.mxu0 %v6473_v23  ;;  %v6480_v52 = vld [vmem:[%s8892_s5 + $0xa0] sm:$0xff]   ;;  %v6491_v23 = vld [vmem:[%s8892_s5 + $0x228] sm:$0xff]  }
 0x19a   :  { %2446 = vmatprep.subr.bf16.mxu0 %v7279_v49  ;;  %v6483_v15 = vld [vmem:[%s8892_s5 + $0x200] sm:$0xff]  }
 0x19c   :  { %1912 = vmatpush1.bf16.msra.mxu1 %v6460_v54  ;;  %v6484_v54 = vld [vmem:[%s8892_s5 + $0x208] sm:$0xff]  }
 0x19d   :  { %1913 = vmatprep.subr.bf16.mxu1 %v6465_v56  ;;  %2447 = vmatpush1.bf16.msra.mxu0 %v6474_v5  ;;  %v6485_v56 = vld [vmem:[%s8892_s5 + $0xb0] sm:$0xff]  }
 0x19e   :  { %2448 = vmatprep.subr.bf16.mxu0 %v7279_v49 }
 0x19f   :  { %1660 = vmatmul.mubr.bf16.gmra.mrb[20].mxu1 %v7225_v25  ;;  %v6475_v25 = vld [vmem:[%s8892_s5 + $0x90] sm:$0xff]  }
 0x1a0   :  { %5591 = vmatprep.mubr.msk.bf16.mxu1 %vm64_vm2, %v1420_v61  ;;  %1914 = vmatpush1.bf16.msra.mxu1 %v6463_v17  ;;  %v6488_v17 = vld [vmem:[%s8892_s5 + $0x218] sm:$0xff]   ;;  %v6493_v61 = vld [vmem:[%s8892_s5 + $0x230] sm:$0xff]  }
 0x1a1   :  { %1915 = vmatprep.subr.bf16.mxu1 %v6468_v60  ;;  %2449 = vmatpush1.bf16.msra.mxu0 %v6475_v25  ;;  %v6490_v60 = vld [vmem:[%s8892_s5 + $0x220] sm:$0xff]  }
 0x1a2   :  { %2450 = vmatprep.subr.bf16.mxu0 %v7279_v49 }
 0x1a4   :  { %1916 = vmatpush1.bf16.msra.mxu1 %v6466_v2  ;;  %v79_v2 = vld [vmem:[%s8891_s4] sm:$0x3] }
 0x1a5   :  { %3688 = vmatprep.subr.bf16.mxu1 %v7279_v49  ;;  %2451 = vmatpush1.bf16.msra.mxu0 %v6478_v24  ;;  %v7480_v4 = vrot.slane %v79_v2, %v7041_v35  ;;  %v7483_v7 = vrot.slane %v79_v2, %v7046_v37 }
 0x1a6   :  { %2452 = vmatprep.subr.bf16.mxu0 %v7279_v49 }
 0x1a7   :  { %1670 = vmatmul.mubr.bf16.gmra.mrb[24].mxu1 %v1418_v22 }
 0x1a8   :  { %5592 = vmatprep.mubr.msk.bf16.mxu1 %vm64_vm2, %v1424_v9 }
 0x1a9   :  { %2453 = vmatpush1.bf16.msra.mxu0 %v6480_v52 }
 0x1aa   :  { %2454 = vmatprep.subr.bf16.mxu0 %v7279_v49 }
 0x1ad   :  { %2455 = vmatpush1.bf16.msra.mxu0 %v6482_v51 }
 0x1ae   :  { %2456 = vmatprep.subr.bf16.mxu0 %v7279_v49 }
 0x1af   :  { %1680 = vmatmul.mubr.bf16.gmra.mrb[28].mxu1 %v1422_v16 }
 0x1b0   :  { %5617 = vmatprep.mubr.msk.bf16.mxu1 %vm64_vm2, %v7086_v31 }
 0x1b1   :  { %2457 = vmatpush1.bf16.msra.mxu0 %v6485_v56 }
 0x1b2   :  { %2458 = vmatprep.subr.bf16.mxu0 %v7279_v49 }
 0x1b5   :  { %2459 = vmatpush1.bf16.msra.mxu0 %v6487_v59 }
 0x1b6   :  { %2629 = vmatprep.subr.bf16.mxu0 %v7279_v49 }
 0x1b7   :  { %1926 = vmatmul.mubr.bf16.vlgmr.msra.gmra.mrb[0].mxu1 %v7066_v6 }
 0x1b8   :  { %5618 = vmatprep.mubr.msk.bf16.mxu1 %vm64_vm2, %v7109_v55  ;;  %3689 = vmatpush1.bf16.msra.mxu1 %v6476_v40 }
 0x1b9   :  { %3690 = vmatprep.subr.bf16.mxu1 %v7279_v49 }
 0x1bc   :  { %3691 = vmatpush1.bf16.msra.mxu1 %v6477_v45 }
 0x1bd   :  { %3692 = vmatprep.subr.bf16.mxu1 %v7279_v49 }
 0x1bf   :  { %1936 = vmatmul.mubr.bf16.gmra.mrb[4].mxu1 %v7083_v27 }
 0x1c0   :  { %5619 = vmatprep.mubr.msk.bf16.mxu1 %vm64_vm2, %v7134_v13  ;;  %3693 = vmatpush1.bf16.msra.mxu1 %v6479_v3 }
 0x1c1   :  { %3694 = vmatprep.subr.bf16.mxu1 %v7279_v49 }
 0x1c4   :  { %3695 = vmatpush1.bf16.msra.mxu1 %v6481_v47 }
 0x1c5   :  { %3696 = vmatprep.subr.bf16.mxu1 %v7279_v49 }
 0x1c7   :  { %1946 = vmatmul.mubr.bf16.gmra.mrb[8].mxu1 %v7106_v50 }
 0x1c8   :  { %5620 = vmatprep.mubr.msk.bf16.mxu1 %vm64_vm2, %v7157_v39  ;;  %3697 = vmatpush1.bf16.msra.mxu1 %v6483_v15 }
 0x1c9   :  { %3698 = vmatprep.subr.bf16.mxu1 %v7279_v49 }
 0x1cc   :  { %3699 = vmatpush1.bf16.msra.mxu1 %v6484_v54 }
 0x1cd   :  { %3700 = vmatprep.subr.bf16.mxu1 %v7279_v49 }
 0x1cf   :  { %1956 = vmatmul.mubr.bf16.gmra.mrb[12].mxu1 %v7131_v8 }
 0x1d0   :  { %5621 = vmatprep.mubr.msk.bf16.mxu1 %vm64_vm2, %v7181_v1  ;;  %3701 = vmatpush1.bf16.msra.mxu1 %v6486_v57 }
 0x1d1   :  { %3702 = vmatprep.subr.bf16.mxu1 %v7279_v49 }
 0x1d4   :  { %3703 = vmatpush1.bf16.msra.mxu1 %v6488_v17 }
 0x1d5   :  { %v7336_v6 = vpop.f32.mrb[32].mxu0  ;;  %3704 = vmatprep.subr.bf16.mxu1 %v7279_v49 }
 0x1d6   :  { %v7338_v31 = vpop.f32.mrb[33].mxu0 }
 0x1d7   :  { %v7340_v55 = vpop.f32.mrb[34].mxu0  ;;  %1966 = vmatmul.mubr.bf16.gmra.mrb[16].mxu1 %v7154_v29  ;;  %v1723_v29 = vld [vmem:[#allocation2 + $0x98] sm:$0xff] }
 0x1d8   :  { %v7343_v27 = vpop.f32.mrb[35].mxu0  ;;  %5622 = vmatprep.mubr.msk.bf16.mxu1 %vm64_vm2, %v7203_v20  ;;  %3705 = vmatpush1.bf16.msra.mxu1 %v6490_v60 }
 0x1d9   :  { %3706 = vmatprep.subr.bf16.mxu1 %v7279_v49 }
 0x1dc   :  { %3707 = vmatpush1.bf16.msra.mxu1 %v6491_v23 }
 0x1dd   :  { %v7347_v50 = vpop.f32.mrb[36].mxu0  ;;  %3708 = vmatprep.subr.bf16.mxu1 %v7279_v49 }
 0x1de   :  { %v7349_v13 = vpop.f32.mrb[37].mxu0 }
 0x1df   :  { %v7351_v8 = vpop.f32.mrb[38].mxu0  ;;  %1976 = vmatmul.mubr.bf16.gmra.mrb[20].mxu1 %v7177_v58 }
 0x1e0   :  { %v7354_v39 = vpop.f32.mrb[39].mxu0  ;;  %5623 = vmatprep.mubr.msk.bf16.mxu1 %vm64_vm2, %v7252_v14  ;;  %3709 = vmatpush1.bf16.msra.mxu1 %v6493_v61 }
 0x1e1   :  { %3710 = vmatprep.subr.bf16.mxu1 %v7279_v49 }
 0x1e4   :  { %3711 = vmatpush1.bf16.msra.mxu1 %v6495_v62 }
 0x1e5   :  { %v7358_v1 = vpop.f32.mrb[40].mxu0 }
 0x1e6   :  { %v7360_v18 = vpop.f32.mrb[41].mxu0 }
 0x1e7   :  { %v7362_v19 = vpop.f32.mrb[42].mxu0  ;;  %1986 = vmatmul.mubr.bf16.gmra.mrb[24].mxu1 %v7200_v38 }
 0x1e8   :  { %v7365_v20 = vpop.f32.mrb[43].mxu0  ;;  %5624 = vmatprep.mubr.msk.bf16.mxu1 %vm64_vm2, %v1723_v29 }
 0x1ed   :  { %v7368_v26 = vpop.f32.mrb[44].mxu0 }
 0x1ee   :  { %v7370_v58 = vpop.f32.mrb[45].mxu0 }
 0x1ef   :  { %v7372_v28 = vpop.f32.mrb[46].mxu0  ;;  %1996 = vmatmul.mubr.bf16.gmra.mrb[28].mxu1 %v7279_v49 }
 0x1f0   :  { %v7375_v14 = vpop.f32.mrb[47].mxu0 }
 0x1f5   :  { %v7377_v30 = vpop.f32.mrb[48].mxu0 }
 0x1f6   :  { %v7379_v33 = vpop.f32.mrb[49].mxu0 }
 0x1f7   :  { %v7381_v34 = vpop.f32.mrb[50].mxu0 }
 0x1f8   :  { %v7383_v38 = vpop.f32.mrb[51].mxu0 }
 0x1fd   :  { %v7385_v41 = vpop.f32.mrb[52].mxu0 }
 0x1fe   :  { %v7387_v11 = vpop.f32.mrb[53].mxu0 }
 0x1ff   :  { %v7389_v42 = vpop.f32.mrb[54].mxu0 }
 0x200   :  { %v7391_v36 = vpop.f32.mrb[55].mxu0 }
 0x205   :  { %v7393_v43 = vpop.f32.mrb[56].mxu0 }
 0x206   :  { %v7395_v32 = vpop.f32.mrb[57].mxu0 }
 0x207   :  { %v7397_v44 = vpop.f32.mrb[58].mxu0 }
 0x208   :  { %v7399_v63 = vpop.f32.mrb[59].mxu0 }
 0x20d   :  { %v7408_v53 = vpop.f32.mrb[60].mxu0 }
 0x20e   :  { %v7410_v21 = vpop.f32.mrb[61].mxu0 }
 0x20f   :  { %v7412_v46 = vpop.f32.mrb[62].mxu0 }
 0x210   :  { %v7418_v48 = vpop.f32.mrb[63].mxu0 }
 0x28a   :  { %v1927_v5 = vpop.f32.mrb[0].mxu1 }
 0x28b   :  { %v6139_v22 = vadd.f32 %v1927_v5, %v7336_v6  ;;  %v1929_v25 = vpop.f32.mrb[1].mxu1 }
 0x28c   :  { %v6140_v9 = vadd.f32 %v1929_v25, %v7338_v31  ;;  %v1931_v10 = vpop.f32.mrb[2].mxu1 }
 0x28d   :  { %v2049_v12 = vadd.f32 %v6139_v22, %v7480_v4  ;;  %v6141_v16 = vadd.f32 %v1931_v10, %v7340_v55  ;;  %v1933_v40 = vpop.f32.mrb[3].mxu1 }
 0x28e   :  { %v2050_v29 = vadd.f32 %v6140_v9, %v7483_v7  ;;  %v6142_v45 = vadd.f32 %v1933_v40, %v7343_v27  ;;  %v2252_v40 = vld [vmem:[#allocation3 + $0x8] sm:$0xf0] }
 0x28f   :  { %v2051_v3 = vadd.f32 %v6141_v16, %v7480_v4  ;;  %v2081_v47 = vmax.f32 %v2049_v12, 0.0 }
 0x290   :  { %v2052_v24 = vadd.f32 %v6142_v45, %v7483_v7  ;;  %v2082_v6 = vmax.f32 %v2050_v29, 0.0 }
 0x291   :  { %v2083_v52 = vmax.f32 %v2051_v3, 0.0  ;;  %v2251_v3 = vld [vmem:[#allocation3] sm:$0xf0] }
 0x292   :  { %v2084_v15 = vmax.f32 %v2052_v24, 0.0  ;;  %v1937_v51 = vpop.f32.mrb[4].mxu1 }
 0x293   :  { %v2113_v31 = vpack.c.bf16 %v2083_v52, %v2081_v47  ;;  %v6143_v54 = vadd.f32 %v1937_v51, %v7347_v50  ;;  %v1939_v56 = vpop.f32.mrb[5].mxu1 }
 0x294   :  { %v2114_v57 = vpack.c.bf16 %v2084_v15, %v2082_v6  ;;  %v6144_v55 = vadd.f32 %v1939_v56, %v7349_v13  ;;  %v1941_v59 = vpop.f32.mrb[6].mxu1 }
 0x295   :  { %v2145_v17 = vrot.slane %v2113_v31, 4  ;;  %v2053_v27 = vadd.f32 %v6143_v54, %v7480_v4  ;;  %v6145_v60 = vadd.f32 %v1941_v59, %v7351_v8  ;;  %v1943_v23 = vpop.f32.mrb[7].mxu1  ;;  %v2301_v54 = vrot.slane %v2252_v40, 4 }
 0x296   :  { %v2146_v61 = vrot.slane %v2114_v57, 4  ;;  %v2054_v62 = vadd.f32 %v6144_v55, %v7483_v7  ;;  %v6146_v2 = vadd.f32 %v1943_v23, %v7354_v39  ;;  %v2298_v55 = vrot.slane %v2251_v3, 4  ;;  %v6489_v23 = vld [vmem:[%s8892_s5] sm:$0xff]  }
 0x297   :  { %2193 = vst [vmem:[#allocation3 + $0x10] sm:$0xf0] %v2145_v17  ;;  %v2055_v5 = vadd.f32 %v6145_v60, %v7480_v4  ;;  %v2085_v13 = vmax.f32 %v2053_v27, 0.0 }
 0x298   :  { %2194 = vst.msk [vmem:[#allocation3 + $0x18] sm:$0xf0] %vm74_vm4, %v2146_v61  ;;  %v2056_v50 = vadd.f32 %v6146_v2, %v7483_v7  ;;  %v2086_v25 = vmax.f32 %v2054_v62, 0.0 }
 0x299   :  { %v2087_v22 = vmax.f32 %v2055_v5, 0.0 }
 0x29a   :  { %v2088_v9 = vmax.f32 %v2056_v50, 0.0  ;;  %v1947_v10 = vpop.f32.mrb[8].mxu1 }
 0x29b   :  { %v2115_v12 = vpack.c.bf16 %v2087_v22, %v2085_v13  ;;  %v6147_v8 = vadd.f32 %v1947_v10, %v7358_v1  ;;  %v1949_v16 = vpop.f32.mrb[9].mxu1 }
 0x29c   :  { %v2116_v29 = vpack.c.bf16 %v2088_v9, %v2086_v25  ;;  %v6148_v39 = vadd.f32 %v1949_v16, %v7360_v18  ;;  %v1951_v45 = vpop.f32.mrb[10].mxu1 }
 0x29d   :  { %v2147_v24 = vrot.slane %v2115_v12, 4  ;;  %v2057_v47 = vadd.f32 %v6147_v8, %v7480_v4  ;;  %v6149_v52 = vadd.f32 %v1951_v45, %v7362_v19  ;;  %v1953_v6 = vpop.f32.mrb[11].mxu1 }
 0x29e   :  { %v2149_v15 = vrot.slane %v2116_v29, 4  ;;  %v2058_v51 = vadd.f32 %v6148_v39, %v7483_v7  ;;  %v6150_v31 = vadd.f32 %v1953_v6, %v7365_v20  ;;  %v7508_v1 = vld [vmem:[#allocation3 + $0x10] sm:$0xff] }
 0x29f   :  { %v7511_v56 = vsel %vm478_vm3, %v2145_v17, %v2147_v24  ;;  %v2059_v18 = vadd.f32 %v6149_v52, %v7480_v4  ;;  %v7514_v57 = vld [vmem:[#allocation3 + $0x18] sm:$0xff]  ;;  %v2299_v59 = vrot.slane %v7508_v1, 4  ;;  %v2089_v60 = vmax.f32 %v2057_v47, 0.0 }
 0x2a0   :  { %2195 = vst [vmem:[#allocation3 + $0x20] sm:$0xff] %v7511_v56  ;;  %v2150_v19 = vsel %vm478_vm3, %v2146_v61, %v2149_v15  ;;  %v2060_v27 = vadd.f32 %v6150_v31, %v7483_v7  ;;  %v2302_v20 = vrot.slane %v7514_v57, 4  ;;  %v2090_v62 = vmax.f32 %v2058_v51, 0.0 }
 0x2a1   :  { %2196 = vst.msk [vmem:[#allocation3 + $0x28] sm:$0xff] %vm64_vm2, %v2150_v19  ;;  %v2091_v17 = vmax.f32 %v2059_v18, 0.0  ;;  %v2300_v25 = vsel %vm478_vm3, %v2298_v55, %v2299_v59  ;;  %v2304_v51 = vrot.slane %v7511_v56, 4 }
 0x2a2   :  { %v2092_v2 = vmax.f32 %v2060_v27, 0.0  ;;  %v1957_v5 = vpop.f32.mrb[12].mxu1  ;;  %v2303_v50 = vsel %vm478_vm3, %v2301_v54, %v2302_v20 }
 0x2a3   :  { %v2117_v13 = vpack.c.bf16 %v2091_v17, %v2089_v60  ;;  %v6151_v61 = vadd.f32 %v1957_v5, %v7368_v26  ;;  %v1959_v22 = vpop.f32.mrb[13].mxu1  ;;  %5661 = vmatprep.mubr.msk.bf16.mxu0 %vm64_vm2, %v2303_v50  ;;  %v6492_v26 = vld [vmem:[%s8892_s5 + $0x8] sm:$0xff]   ;;  %v2305_v5 = vsel %vm478_vm3, %v2299_v59, %v2304_v51  ;;  %v6496_v59 = vld [vmem:[%s8892_s5 + $0x18] sm:$0xff]  }
 0x2a4   :  { %v2118_v9 = vpack.c.bf16 %v2092_v2, %v2090_v62  ;;  %v6152_v10 = vadd.f32 %v1959_v22, %v7370_v58  ;;  %v1961_v12 = vpop.f32.mrb[14].mxu1  ;;  %2469 = vmatmul.mubr.bf16.vlgmr.msra.gmra.mrb[64].mxu0 %v2300_v25 }
 0x2a5   :  { %v2151_v8 = vrot.slane %v2117_v13, 4  ;;  %v2061_v16 = vadd.f32 %v6151_v61, %v7480_v4  ;;  %v6153_v40 = vadd.f32 %v1961_v12, %v7372_v28  ;;  %v1963_v29 = vpop.f32.mrb[15].mxu1  ;;  %2630 = vmatpush1.bf16.msra.mxu0 %v6489_v23 }
 0x2a6   :  { %v2153_v39 = vrot.slane %v2118_v9, 4  ;;  %v2062_v45 = vadd.f32 %v6152_v10, %v7483_v7  ;;  %v6154_v3 = vadd.f32 %v1963_v29, %v7375_v14  ;;  %2631 = vmatprep.subr.bf16.mxu0 %v7279_v49 }
 0x2a7   :  { %v7539_v58 = vsel %vm478_vm3, %v2147_v24, %v2151_v8  ;;  %v2063_v47 = vadd.f32 %v6153_v40, %v7480_v4  ;;  %v2093_v14 = vmax.f32 %v2061_v16, 0.0  ;;  %v3489_v22 = vld [vmem:[#allocation3 + $0x20] sm:$0xf0] }
 0x2a8   :  { %2197 = vst [vmem:[#allocation3 + $0x30] sm:$0xff] %v7539_v58  ;;  %v2154_v28 = vsel %vm478_vm3, %v2149_v15, %v2153_v39  ;;  %v2064_v52 = vadd.f32 %v6154_v3, %v7483_v7  ;;  %v7545_v6 = vld [vmem:[#allocation3 + $0x28] sm:$0xff]  ;;  %v2094_v54 = vmax.f32 %v2062_v45, 0.0  ;;  %v6494_v15 = vld [vmem:[%s8892_s5 + $0x10] sm:$0xff]   ;;  %v7573_v10 = vrot.slane %v7539_v58, 4 }
 0x2a9   :  { %2198 = vst.msk [vmem:[#allocation3 + $0x38] sm:$0xff] %vm64_vm2, %v2154_v28  ;;  %v2095_v31 = vmax.f32 %v2063_v47, 0.0  ;;  %2632 = vmatpush1.bf16.msra.mxu0 %v6492_v26  ;;  %v7550_v24 = vrot.slane %v7545_v6, 4  ;;  %v3490_v9 = vld [vmem:[#allocation3 + $0x28] sm:$0xf0]  ;;  %v3550_v29 = vrot.slane %v3489_v22, 4 }
 0x2aa   :  { %v2096_v18 = vmax.f32 %v2064_v52, 0.0  ;;  %v1967_v55 = vpop.f32.mrb[16].mxu1  ;;  %2633 = vmatprep.subr.bf16.mxu0 %v7279_v49  ;;  %v3553_v3 = vrot.slane %v3490_v9, 4 }
 0x2ab   :  { %v7556_v19 = vpack.c.bf16 %v2095_v31, %v2093_v14  ;;  %v6155_v27 = vadd.f32 %v1967_v55, %v7377_v30  ;;  %v1969_v60 = vpop.f32.mrb[17].mxu1  ;;  %v2307_v17 = vsel %vm478_vm3, %v2302_v20, %v7550_v24  ;;  %v2309_v14 = vsel %vm478_vm3, %v2304_v51, %v7573_v10 }
 0x2ac   :  { %v7561_v23 = vpack.c.bf16 %v2096_v18, %v2094_v54  ;;  %v6156_v62 = vadd.f32 %v1969_v60, %v7379_v33  ;;  %v1971_v2 = vpop.f32.mrb[18].mxu1  ;;  %5662 = vmatprep.mubr.msk.bf16.mxu0 %vm64_vm2, %v2307_v17 }
 0x2ad   :  { %v2155_v50 = vrot.slane %v7556_v19, 4  ;;  %v2065_v13 = vadd.f32 %v6155_v27, %v7480_v4  ;;  %v6157_v61 = vadd.f32 %v1971_v2, %v7381_v34  ;;  %v1973_v30 = vpop.f32.mrb[19].mxu1  ;;  %2477 = vmatmul.mubr.bf16.gmra.mrb[68].mxu0 %v2305_v5 }
 0x2ae   :  { %v2157_v20 = vrot.slane %v7561_v23, 4  ;;  %v2066_v25 = vadd.f32 %v6156_v62, %v7483_v7  ;;  %v6158_v33 = vadd.f32 %v1973_v30, %v7383_v38  ;;  %2634 = vmatpush1.bf16.msra.mxu0 %v6494_v15 }
 0x2af   :  { %v7579_v34 = vsel %vm478_vm3, %v2151_v8, %v2155_v50  ;;  %v2067_v12 = vadd.f32 %v6157_v61, %v7480_v4  ;;  %2635 = vmatprep.subr.bf16.mxu0 %v7279_v49  ;;  %v2097_v26 = vmax.f32 %v2065_v13, 0.0  ;;  %v6498_v13 = vld [vmem:[%s8892_s5 + $0x28] sm:$0xff]  }
 0x2b0   :  { %2199 = vst [vmem:[#allocation3 + $0x40] sm:$0xff] %v7579_v34  ;;  %v2158_v38 = vsel %vm478_vm3, %v2153_v39, %v2157_v20  ;;  %v2068_v16 = vadd.f32 %v6158_v33, %v7483_v7  ;;  %v7586_v40 = vld [vmem:[#allocation3 + $0x38] sm:$0xff]  ;;  %v2098_v47 = vmax.f32 %v2066_v25, 0.0  ;;  %v6497_v39 = vld [vmem:[%s8892_s5 + $0x20] sm:$0xff]  }
 0x2b1   :  { %2200 = vst.msk [vmem:[#allocation3 + $0x48] sm:$0xff] %vm64_vm2, %v2158_v38  ;;  %v2099_v45 = vmax.f32 %v2067_v12, 0.0  ;;  %v2310_v8 = vrot.slane %v7586_v40, 4 }
 0x2b2   :  { %v2100_v28 = vmax.f32 %v2068_v16, 0.0  ;;  %v1977_v52 = vpop.f32.mrb[20].mxu1  ;;  %2636 = vmatpush1.bf16.msra.mxu0 %v6496_v59 }
 0x2b3   :  { %v7595_v31 = vpack.c.bf16 %v2099_v45, %v2097_v26  ;;  %v6159_v54 = vadd.f32 %v1977_v52, %v7385_v41  ;;  %v1979_v18 = vpop.f32.mrb[21].mxu1  ;;  %v7600_v55 = vsel %vm478_vm3, %v7550_v24, %v2310_v8  ;;  %v3555_v15 = vsel %vm478_vm3, %v3553_v3, %v2310_v8  ;;  %2637 = vmatprep.subr.bf16.mxu0 %v7279_v49 }
 0x2b4   :  { %v2122_v19 = vpack.c.bf16 %v2100_v28, %v2098_v47  ;;  %v6160_v51 = vadd.f32 %v1979_v18, %v7387_v11  ;;  %v1981_v27 = vpop.f32.mrb[22].mxu1  ;;  %5663 = vmatprep.mubr.msk.bf16.mxu0 %vm64_vm2, %v7600_v55  ;;  %5857 = vmatprep.mubr.msk.bf16.mxu1 %vm64_vm2, %v3555_v15  ;;  %v3552_v41 = vsel %vm478_vm3, %v3550_v29, %v7573_v10  ;;  %v6500_v18 = vld [vmem:[%s8892_s5 + $0x38] sm:$0xff]  }
 0x2b5   :  { %v2159_v60 = vrot.slane %v7595_v31, 4  ;;  %v2069_v17 = vadd.f32 %v6159_v54, %v7480_v4  ;;  %v6161_v23 = vadd.f32 %v1981_v27, %v7389_v42  ;;  %v1983_v62 = vpop.f32.mrb[23].mxu1  ;;  %2485 = vmatmul.mubr.bf16.gmra.mrb[72].mxu0 %v2309_v14  ;;  %3721 = vmatmul.mubr.bf16.vlgmr.msra.gmra.mrb[32].mxu1 %v3552_v41 }
 0x2b6   :  { %v2161_v2 = vrot.slane %v2122_v19, 4  ;;  %v2070_v11 = vadd.f32 %v6160_v51, %v7483_v7  ;;  %v6162_v5 = vadd.f32 %v1983_v62, %v7391_v36  ;;  %2638 = vmatpush1.bf16.msra.mxu0 %v6497_v39  ;;  %v2312_v36 = vrot.slane %v7579_v34, 4 }
 0x2b7   :  { %v7619_v61 = vsel %vm478_vm3, %v2155_v50, %v2159_v60  ;;  %v2071_v30 = vadd.f32 %v6161_v23, %v7480_v4  ;;  %2639 = vmatprep.subr.bf16.mxu0 %v7279_v49  ;;  %v2101_v33 = vmax.f32 %v2069_v17, 0.0 }
 0x2b8   :  { %v2162_v42 = vsel %vm478_vm3, %v2157_v20, %v2161_v2  ;;  %v2072_v22 = vadd.f32 %v6162_v5, %v7483_v7  ;;  %v7625_v25 = vld [vmem:[#allocation3 + $0x48] sm:$0xff]  ;;  %v2102_v50 = vmax.f32 %v2070_v11, 0.0  ;;  %v6499_v20 = vld [vmem:[%s8892_s5 + $0x30] sm:$0xff]   ;;  %v2313_v52 = vsel %vm478_vm3, %v7573_v10, %v2312_v36 }
 0x2b9   :  { %2202 = vst.msk [vmem:[#allocation3 + $0x58] sm:$0xff] %vm64_vm2, %v2162_v42  ;;  %v2103_v9 = vmax.f32 %v2071_v30, 0.0  ;;  %v2314_v59 = vrot.slane %v7625_v25, 4 }
 0x2ba   :  { %v2104_v12 = vmax.f32 %v2072_v22, 0.0  ;;  %v1987_v38 = vpop.f32.mrb[24].mxu1  ;;  %2640 = vmatpush1.bf16.msra.mxu0 %v6498_v13 }
 0x2bb   :  { %v2123_v16 = vpack.c.bf16 %v2103_v9, %v2101_v33  ;;  %v6163_v29 = vadd.f32 %v1987_v38, %v7393_v43  ;;  %v1989_v26 = vpop.f32.mrb[25].mxu1  ;;  %v7635_v45 = vsel %vm478_vm3, %v2310_v8, %v2314_v59  ;;  %2641 = vmatprep.subr.bf16.mxu0 %v7279_v49 }
 0x2bc   :  { %v2124_v3 = vpack.c.bf16 %v2104_v12, %v2102_v50  ;;  %v6164_v47 = vadd.f32 %v1989_v26, %v7395_v32  ;;  %v1991_v28 = vpop.f32.mrb[26].mxu1  ;;  %5664 = vmatprep.mubr.msk.bf16.mxu0 %vm64_vm2, %v7635_v45  ;;  %5858 = vmatprep.mubr.msk.bf16.mxu1 %vm64_vm2, %v7635_v45 }
 0x2bd   :  { %v2163_v43 = vrot.slane %v2123_v16, 4  ;;  %v2073_v14 = vadd.f32 %v6163_v29, %v7480_v4  ;;  %v6165_v8 = vadd.f32 %v1991_v28, %v7397_v44  ;;  %v1993_v39 = vpop.f32.mrb[27].mxu1  ;;  %2493 = vmatmul.mubr.bf16.gmra.mrb[76].mxu0 %v2313_v52  ;;  %3729 = vmatmul.mubr.bf16.gmra.mrb[36].mxu1 %v2313_v52  ;;  %v6502_v16 = vld [vmem:[%s8892_s5 + $0x48] sm:$0xff]  }
 0x2be   :  { %v2165_v31 = vrot.slane %v2124_v3, 4  ;;  %v2074_v32 = vadd.f32 %v6164_v47, %v7483_v7  ;;  %v6166_v54 = vadd.f32 %v1993_v39, %v7399_v63  ;;  %2642 = vmatpush1.bf16.msra.mxu0 %v6499_v20  ;;  %v7662_v63 = vrot.slane %v7619_v61, 4 }
 0x2bf   :  { %v7653_v10 = vsel %vm478_vm3, %v2159_v60, %v2163_v43  ;;  %v2075_v15 = vadd.f32 %v6165_v8, %v7480_v4  ;;  %2643 = vmatprep.subr.bf16.mxu0 %v7279_v49  ;;  %v2105_v27 = vmax.f32 %v2073_v14, 0.0 }
 0x2c0   :  { %v2166_v44 = vsel %vm478_vm3, %v2161_v2, %v2165_v31  ;;  %v2076_v19 = vadd.f32 %v6166_v54, %v7483_v7  ;;  %v7659_v51 = vld [vmem:[#allocation3 + $0x58] sm:$0xff]  ;;  %v2106_v17 = vmax.f32 %v2074_v32, 0.0  ;;  %v6501_v2 = vld [vmem:[%s8892_s5 + $0x40] sm:$0xff]   ;;  %v2317_v9 = vsel %vm478_vm3, %v2312_v36, %v7662_v63 }
 0x2c1   :  { %2204 = vst.msk [vmem:[#allocation3 + $0x68] sm:$0xff] %vm64_vm2, %v2166_v44  ;;  %v2107_v41 = vmax.f32 %v2075_v15, 0.0  ;;  %v2318_v60 = vrot.slane %v7659_v51, 4 }
 0x2c2   :  { %v2108_v23 = vmax.f32 %v2076_v19, 0.0  ;;  %v1997_v62 = vpop.f32.mrb[28].mxu1  ;;  %2644 = vmatpush1.bf16.msra.mxu0 %v6500_v18  ;;  %v6504_v18 = vld [vmem:[%s8892_s5 + $0x58] sm:$0xff]  }
 0x2c3   :  { %v2125_v11 = vpack.c.bf16 %v2107_v41, %v2105_v27  ;;  %v6167_v5 = vadd.f32 %v1997_v62, %v7408_v53  ;;  %v1999_v13 = vpop.f32.mrb[29].mxu1  ;;  %v7671_v30 = vsel %vm478_vm3, %v2314_v59, %v2318_v60  ;;  %2645 = vmatprep.subr.bf16.mxu0 %v7279_v49 }
 0x2c4   :  { %v2126_v42 = vpack.c.bf16 %v2108_v23, %v2106_v17  ;;  %v6168_v22 = vadd.f32 %v1999_v13, %v7410_v21  ;;  %v2001_v33 = vpop.f32.mrb[30].mxu1  ;;  %5665 = vmatprep.mubr.msk.bf16.mxu0 %vm64_vm2, %v7671_v30  ;;  %5859 = vmatprep.mubr.msk.bf16.mxu1 %vm64_vm2, %v7671_v30 }
 0x2c5   :  { %v2167_v53 = vrot.slane %v2125_v11, 4  ;;  %v2077_v50 = vadd.f32 %v6167_v5, %v7480_v4  ;;  %v6169_v59 = vadd.f32 %v2001_v33, %v7412_v46  ;;  %v2003_v12 = vpop.f32.mrb[31].mxu1  ;;  %2501 = vmatmul.mubr.bf16.gmra.mrb[80].mxu0 %v2317_v9  ;;  %3737 = vmatmul.mubr.bf16.gmra.mrb[40].mxu1 %v2317_v9 }
 0x2c6   :  { %v2169_v38 = vrot.slane %v2126_v42, 4  ;;  %v2078_v21 = vadd.f32 %v6168_v22, %v7483_v7  ;;  %v6170_v20 = vadd.f32 %v2003_v12, %v7418_v48  ;;  %2646 = vmatpush1.bf16.msra.mxu0 %v6501_v2  ;;  %v2320_v48 = vrot.slane %v7653_v10, 4 }
 0x2c7   :  { %v7689_v36 = vsel %vm478_vm3, %v2163_v43, %v2167_v53  ;;  %v2079_v29 = vadd.f32 %v6169_v59, %v7480_v4  ;;  %2647 = vmatprep.subr.bf16.mxu0 %v7279_v49  ;;  %v2109_v47 = vmax.f32 %v2077_v50, 0.0  ;;  %v6503_v4 = vld [vmem:[%s8892_s5 + $0x50] sm:$0xff]   ;;  %v2212_v50 = vld [vmem:[#allocation3 + $0x8] sm:$0xff] }
 0x2c8   :  { %v2170_v46 = vsel %vm478_vm3, %v2165_v31, %v2169_v38  ;;  %v2080_v26 = vadd.f32 %v6170_v20, %v7483_v7  ;;  %v7695_v3 = vld [vmem:[#allocation3 + $0x68] sm:$0xff]  ;;  %v2110_v43 = vmax.f32 %v2078_v21, 0.0  ;;  %v7713_v31 = vsel %vm478_vm3, %v7662_v63, %v2320_v48 }
 0x2c9   :  { %2206 = vst.msk [vmem:[#allocation3 + $0x78] sm:$0xff] %vm64_vm2, %v2170_v46  ;;  %v2111_v28 = vmax.f32 %v2079_v29, 0.0  ;;  %v2322_v52 = vrot.slane %v7695_v3, 4  ;;  %v2324_v27 = vrot.slane %v7689_v36, 4  ;;  %v3506_v20 = vld [vmem:[#allocation3 + $0xa8] sm:$0xf] }
 0x2ca   :  { %v2112_v14 = vmax.f32 %v2080_v26, 0.0  ;;  %2648 = vmatpush1.bf16.msra.mxu0 %v6502_v16  ;;  %v6505_v29 = vld [vmem:[%s8892_s5 + $0xc0] sm:$0xff]   ;;  %v3582_v46 = vrot.slane %v3506_v20, 4 }
 0x2cb   :  { %v2127_v8 = vpack.c.bf16 %v2111_v28, %v2109_v47  ;;  %v7704_v7 = vsel %vm478_vm3, %v2318_v60, %v2322_v52  ;;  %2649 = vmatprep.subr.bf16.mxu0 %v7279_v49  ;;  %v7741_v17 = vsel %vm478_vm3, %v2320_v48, %v2324_v27  ;;  %v3505_v48 = vld [vmem:[#allocation3 + $0xa0] sm:$0xf]  ;;  %v6506_v28 = vld [vmem:[%s8892_s5 + $0xc8] sm:$0xff]  }
 0x2cc   :  { %v2128_v39 = vpack.c.bf16 %v2112_v14, %v2110_v43  ;;  %5666 = vmatprep.mubr.msk.bf16.mxu0 %vm64_vm2, %v7704_v7  ;;  %5860 = vmatprep.mubr.msk.bf16.mxu1 %vm64_vm2, %v7704_v7  ;;  %v6507_v43 = vld [vmem:[%s8892_s5 + $0xd0] sm:$0xff]  }
 0x2cd   :  { %v2171_v32 = vrot.slane %v2127_v8, 4  ;;  %2509 = vmatmul.mubr.bf16.gmra.mrb[84].mxu0 %v7713_v31  ;;  %3745 = vmatmul.mubr.bf16.gmra.mrb[44].mxu1 %v7713_v31  ;;  %v6509_v8 = vld [vmem:[%s8892_s5 + $0xe0] sm:$0xff]  }
 0x2ce   :  { %v2173_v54 = vrot.slane %v2128_v39, 4  ;;  %2650 = vmatpush1.bf16.msra.mxu0 %v6503_v4  ;;  %v6508_v4 = vld [vmem:[%s8892_s5 + $0xd8] sm:$0xff]   ;;  %v6510_v39 = vld [vmem:[%s8892_s5 + $0xe8] sm:$0xff]  }
 0x2cf   :  { %v7721_v15 = vsel %vm478_vm3, %v2167_v53, %v2171_v32  ;;  %2209 = vst [vmem:[#allocation3 + $0x90] sm:$0xf] %v2171_v32  ;;  %2651 = vmatprep.subr.bf16.mxu0 %v7279_v49  ;;  %v6511_v32 = vld [vmem:[%s8892_s5 + $0xf0] sm:$0xff]  }
 0x2d0   :  { %2207 = vst [vmem:[#allocation3 + $0x80] sm:$0xff] %v7721_v15  ;;  %v2174_v44 = vsel %vm478_vm3, %v2169_v38, %v2173_v54  ;;  %2210 = vst.msk [vmem:[#allocation3 + $0x98] sm:$0xf] %vm71_vm5, %v2173_v54  ;;  %v7727_v19 = vld [vmem:[#allocation3 + $0x78] sm:$0xff]  ;;  %v7750_v13 = vrot.slane %v7721_v15, 4  ;;  %v7817_v54 = vld [vmem:[#allocation2] sm:$0xff] }
 0x2d1   :  { %2208 = vst.msk [vmem:[#allocation3 + $0x88] sm:$0xff] %vm64_vm2, %v2174_v44  ;;  %v2326_v41 = vrot.slane %v7727_v19, 4  ;;  %v6514_v44 = vld [vmem:[%s8892_s5 + $0x108] sm:$0xff]  }
 0x2d2   :  { %2652 = vmatpush1.bf16.msra.mxu0 %v6504_v18  ;;  %v7767_v12 = vsel %vm478_vm3, %v2324_v27, %v7750_v13  ;;  %v6512_v18 = vld [vmem:[%s8892_s5 + $0xf8] sm:$0xff]  }
 0x2d3   :  { %v7733_v60 = vsel %vm478_vm3, %v2322_v52, %v2326_v41  ;;  %2828 = vmatprep.subr.bf16.mxu0 %v7279_v49  ;;  %v3580_v52 = vrot.slane %v3505_v48, 4  ;;  %v6529_v48 = vld [vmem:[%s8892_s5 + $0x180] sm:$0xff]  }
 0x2d4   :  { %5667 = vmatprep.mubr.msk.bf16.mxu0 %vm64_vm2, %v7733_v60  ;;  %5861 = vmatprep.mubr.msk.bf16.mxu1 %vm64_vm2, %v7733_v60 }
 0x2d5   :  { %2517 = vmatmul.mubr.bf16.gmra.mrb[88].mxu0 %v7741_v17  ;;  %3753 = vmatmul.mubr.bf16.gmra.mrb[48].mxu1 %v7741_v17 }
 0x2d6   :  { %v7772_v21 = vld [vmem:[#allocation3 + $0x90] sm:$0xff] }
 0x2d7   :  { %v2253_v23 = vld [vmem:[#allocation3 + $0x80] sm:$0xf]  ;;  %v7745_v62 = vld [vmem:[#allocation3 + $0x98] sm:$0xff]  ;;  %v3576_v16 = vrot.slane %v7772_v21, 4 }
 0x2d8   :  { %v2254_v2 = vld [vmem:[#allocation3 + $0x88] sm:$0xf]  ;;  %v2328_v5 = vrot.slane %v2253_v23, 4  ;;  %v3578_v33 = vrot.slane %v7745_v62, 4  ;;  %v6517_v23 = vld [vmem:[%s8892_s5 + $0x120] sm:$0xff]  }
 0x2d9   :  { %v7747_v11 = vld [vmem:[#allocation3 + $0x88] sm:$0xff]  ;;  %v2330_v42 = vrot.slane %v2254_v2, 4  ;;  %v3577_v26 = vsel %vm478_vm3, %v7750_v13, %v3576_v16  ;;  %v3581_v14 = vsel %vm478_vm3, %v3576_v16, %v3580_v52  ;;  %v7928_v16 = vld [vmem:[#allocation3 + $0x20] sm:$0xff] }
 0x2da   :  { %v7753_v22 = vrot.slane %v7747_v11, 4  ;;  %v2329_v59 = vsel %vm478_vm3, %v2324_v27, %v2328_v5  ;;  %v3583_v47 = vsel %vm478_vm3, %v3578_v33, %v3582_v46  ;;  %v6515_v27 = vld [vmem:[%s8892_s5 + $0x110] sm:$0xff]   ;;  %v6518_v2 = vld [vmem:[%s8892_s5 + $0x128] sm:$0xff]   ;;  %v6521_v5 = vld [vmem:[%s8892_s5 + $0x140] sm:$0xff]   ;;  %v3003_v46 = vrot.slane %v7928_v16, 4 }
 0x2db   :  { %v2331_v9 = vsel %vm478_vm3, %v2326_v41, %v2330_v42  ;;  %v6523_v42 = vld [vmem:[%s8892_s5 + $0x150] sm:$0xff]  }
 0x2dc   :  { %v7759_v53 = vsel %vm478_vm3, %v2326_v41, %v7753_v22  ;;  %5668 = vmatprep.mubr.msk.bf16.mxu0 %vm64_vm2, %v2331_v9  ;;  %v3579_v38 = vsel %vm478_vm3, %v7753_v22, %v3578_v33  ;;  %v6516_v41 = vld [vmem:[%s8892_s5 + $0x118] sm:$0xff]   ;;  %v6525_v33 = vld [vmem:[%s8892_s5 + $0x160] sm:$0xff]   ;;  %v6527_v9 = vld [vmem:[%s8892_s5 + $0x170] sm:$0xff]  }
 0x2dd   :  { %5862 = vmatprep.mubr.msk.bf16.mxu1 %vm64_vm2, %v7759_v53  ;;  %2525 = vmatmul.mubr.bf16.gmra.mrb[92].mxu0 %v2329_v59  ;;  %v2942_v59 = vld [vmem:[#allocation3 + $0x18] sm:$0xf0] }
 0x2de   :  { %3761 = vmatmul.mubr.bf16.gmra.mrb[52].mxu1 %v7767_v12  ;;  %5681 = vmatprep.mubr.msk.bf16.mxu0 %vm64_vm2, %v2212_v50  ;;  %v6528_v50 = vld [vmem:[%s8892_s5 + $0x178] sm:$0xff]  }
 0x2df   :  { %5863 = vmatprep.mubr.msk.bf16.mxu1 %vm64_vm2, %v3579_v38  ;;  %v3005_v38 = vrot.slane %v2942_v59, 4  ;;  %v2958_v59 = vld [vmem:[#allocation3 + $0x98] sm:$0xf] }
 0x2e1   :  { %v3007_v20 = vsel %vm478_vm3, %v3005_v38, %v7550_v24  ;;  %v6530_v24 = vld [vmem:[%s8892_s5 + $0x188] sm:$0xff]   ;;  %v6540_v38 = vld [vmem:[%s8892_s5 + $0x1d8] sm:$0xff]  }
 0x2e5   :  { %2662 = vmatmul.mubr.bf16.vlgmr.msra.gmra.mrb[96].mxu0 %v7279_v49 }
 0x2e6   :  { %3769 = vmatmul.mubr.bf16.gmra.mrb[56].mxu1 %v3577_v26  ;;  %2829 = vmatpush1.bf16.msra.mxu0 %v6505_v29  ;;  %v2941_v29 = vld [vmem:[#allocation3 + $0x10] sm:$0xf0] }
 0x2e7   :  { %5682 = vmatprep.mubr.msk.bf16.mxu0 %vm64_vm2, %v7514_v57  ;;  %5864 = vmatprep.mubr.msk.bf16.mxu1 %vm64_vm2, %v3583_v47  ;;  %v3002_v26 = vrot.slane %v2941_v29, 4 }
 0x2e8   :  { %2830 = vmatprep.subr.bf16.mxu0 %v7279_v49 }
 0x2e9   :  { %v3004_v47 = vsel %vm478_vm3, %v3002_v26, %v3003_v46 }
 0x2ea   :  { %2831 = vmatpush1.bf16.msra.mxu0 %v6506_v28  ;;  %v7936_v28 = vld [vmem:[#allocation3 + $0x30] sm:$0xff] }
 0x2eb   :  { %2832 = vmatprep.subr.bf16.mxu0 %v7279_v49  ;;  %v3008_v52 = vrot.slane %v7936_v28, 4 }
 0x2ed   :  { %2670 = vmatmul.mubr.bf16.gmra.mrb[100].mxu0 %v7508_v1 }
 0x2ee   :  { %3777 = vmatmul.mubr.bf16.gmra.mrb[60].mxu1 %v3581_v14  ;;  %5683 = vmatprep.mubr.msk.bf16.mxu0 %vm64_vm2, %v7545_v6  ;;  %v3009_v14 = vsel %vm478_vm3, %v3003_v46, %v3008_v52 }
 0x2ef   :  { %2833 = vmatpush1.bf16.msra.mxu0 %v6507_v43  ;;  %v6531_v43 = vld [vmem:[%s8892_s5 + $0x190] sm:$0xff]  }
 0x2f0   :  { %2834 = vmatprep.subr.bf16.mxu0 %v7279_v49 }
 0x2f3   :  { %2835 = vmatpush1.bf16.msra.mxu0 %v6508_v4  ;;  %v7950_v4 = vld [vmem:[#allocation3 + $0x40] sm:$0xff] }
 0x2f4   :  { %2836 = vmatprep.subr.bf16.mxu0 %v7279_v49 }
 0x2f5   :  { %2678 = vmatmul.mubr.bf16.gmra.mrb[104].mxu0 %v7511_v56 }
 0x2f6   :  { %5684 = vmatprep.mubr.msk.bf16.mxu0 %vm64_vm2, %v7586_v40 }
 0x2f7   :  { %2837 = vmatpush1.bf16.msra.mxu0 %v6509_v8  ;;  %v3012_v8 = vrot.slane %v7950_v4, 4 }
 0x2f8   :  { %2838 = vmatprep.subr.bf16.mxu0 %v7279_v49  ;;  %v6513_v49 = vld [vmem:[%s8892_s5 + $0x100] sm:$0xff]  }
 0x2fb   :  { %2839 = vmatpush1.bf16.msra.mxu0 %v6510_v39  ;;  %v6533_v39 = vld [vmem:[%s8892_s5 + $0x1a0] sm:$0xff]  }
 0x2fc   :  { %2840 = vmatprep.subr.bf16.mxu0 %v7817_v54 }
 0x2fd   :  { %2686 = vmatmul.mubr.bf16.gmra.mrb[108].mxu0 %v7539_v58 }
 0x2fe   :  { %5685 = vmatprep.mubr.msk.bf16.mxu0 %vm64_vm2, %v7625_v25 }
 0x2ff   :  { %2841 = vmatpush1.bf16.msra.mxu0 %v6511_v32  ;;  %v3013_v32 = vsel %vm478_vm3, %v3008_v52, %v3012_v8 }
 0x300   :  { %2842 = vmatprep.subr.bf16.mxu0 %v7817_v54 }
 0x303   :  { %2843 = vmatpush1.bf16.msra.mxu0 %v6512_v18 }
 0x304   :  { %2844 = vmatprep.subr.bf16.mxu0 %v7817_v54 }
 0x305   :  { %2694 = vmatmul.mubr.bf16.gmra.mrb[112].mxu0 %v7579_v34 }
 0x306   :  { %5686 = vmatprep.mubr.msk.bf16.mxu0 %vm64_vm2, %v7659_v51 }
 0x307   :  { %2845 = vmatpush1.bf16.msra.mxu0 %v6513_v49 }
 0x308   :  { %2846 = vmatprep.subr.bf16.mxu0 %v7817_v54 }
 0x30b   :  { %2847 = vmatpush1.bf16.msra.mxu0 %v6514_v44 }
 0x30c   :  { %2848 = vmatprep.subr.bf16.mxu0 %v7817_v54 }
 0x30d   :  { %2702 = vmatmul.mubr.bf16.gmra.mrb[116].mxu0 %v7619_v61 }
 0x30e   :  { %5687 = vmatprep.mubr.msk.bf16.mxu0 %vm64_vm2, %v7695_v3 }
 0x30f   :  { %2849 = vmatpush1.bf16.msra.mxu0 %v6515_v27 }
 0x310   :  { %2850 = vmatprep.subr.bf16.mxu0 %v7817_v54 }
 0x313   :  { %2851 = vmatpush1.bf16.msra.mxu0 %v6516_v41  ;;  %v6535_v41 = vld [vmem:[%s8892_s5 + $0x1b0] sm:$0xff]  }
 0x314   :  { %3140 = vmatprep.subr.bf16.mxu0 %v7817_v54 }
 0x315   :  { %2710 = vmatmul.mubr.bf16.gmra.mrb[120].mxu0 %v7653_v10 }
 0x316   :  { %5688 = vmatprep.mubr.msk.bf16.mxu0 %vm64_vm2, %v7727_v19 }
 0x31d   :  { %2718 = vmatmul.mubr.bf16.gmra.mrb[124].mxu0 %v7689_v36 }
 0x31e   :  { %5725 = vmatprep.mubr.msk.bf16.mxu0 %vm64_vm2, %v7514_v57  ;;  %v6519_v57 = vld [vmem:[%s8892_s5 + $0x130] sm:$0xff]  }
 0x325   :  { %2861 = vmatmul.mubr.bf16.vlgmr.msra.gmra.mrb[128].mxu0 %v7508_v1  ;;  %v6520_v1 = vld [vmem:[%s8892_s5 + $0x138] sm:$0xff]  }
 0x326   :  { %3141 = vmatpush1.bf16.msra.mxu0 %v6517_v23  ;;  %5726 = vmatprep.mubr.msk.bf16.mxu0 %vm64_vm2, %v7545_v6  ;;  %v6536_v23 = vld [vmem:[%s8892_s5 + $0x1b8] sm:$0xff]  }
 0x327   :  { %3142 = vmatprep.subr.bf16.mxu0 %v7817_v54 }
 0x32a   :  { %3143 = vmatpush1.bf16.msra.mxu0 %v6518_v2 }
 0x32b   :  { %3144 = vmatprep.subr.bf16.mxu0 %v7817_v54 }
 0x32d   :  { %2869 = vmatmul.mubr.bf16.gmra.mrb[132].mxu0 %v7511_v56  ;;  %v6522_v56 = vld [vmem:[%s8892_s5 + $0x148] sm:$0xff]  }
 0x32e   :  { %5727 = vmatprep.mubr.msk.bf16.mxu0 %vm64_vm2, %v7586_v40  ;;  %3145 = vmatpush1.bf16.msra.mxu0 %v6519_v57 }
 0x32f   :  { %3146 = vmatprep.subr.bf16.mxu0 %v7817_v54 }
 0x332   :  { %3147 = vmatpush1.bf16.msra.mxu0 %v6520_v1 }
 0x333   :  { %3148 = vmatprep.subr.bf16.mxu0 %v7817_v54 }
 0x335   :  { %2877 = vmatmul.mubr.bf16.gmra.mrb[136].mxu0 %v7539_v58  ;;  %v6524_v58 = vld [vmem:[%s8892_s5 + $0x158] sm:$0xff]  }
 0x336   :  { %5728 = vmatprep.mubr.msk.bf16.mxu0 %vm64_vm2, %v7625_v25  ;;  %3149 = vmatpush1.bf16.msra.mxu0 %v6521_v5 }
 0x337   :  { %3150 = vmatprep.subr.bf16.mxu0 %v7817_v54 }
 0x33a   :  { %3151 = vmatpush1.bf16.msra.mxu0 %v6522_v56 }
 0x33b   :  { %3152 = vmatprep.subr.bf16.mxu0 %v7817_v54 }
 0x33d   :  { %2885 = vmatmul.mubr.bf16.gmra.mrb[140].mxu0 %v7579_v34  ;;  %v6526_v34 = vld [vmem:[%s8892_s5 + $0x168] sm:$0xff]  }
 0x33e   :  { %5729 = vmatprep.mubr.msk.bf16.mxu0 %vm64_vm2, %v7659_v51  ;;  %3153 = vmatpush1.bf16.msra.mxu0 %v6523_v42 }
 0x33f   :  { %3154 = vmatprep.subr.bf16.mxu0 %v7817_v54 }
 0x342   :  { %3155 = vmatpush1.bf16.msra.mxu0 %v6524_v58 }
 0x343   :  { %3156 = vmatprep.subr.bf16.mxu0 %v7817_v54 }
 0x345   :  { %2893 = vmatmul.mubr.bf16.gmra.mrb[144].mxu0 %v7619_v61 }
 0x346   :  { %5730 = vmatprep.mubr.msk.bf16.mxu0 %vm64_vm2, %v7695_v3  ;;  %3157 = vmatpush1.bf16.msra.mxu0 %v6525_v33 }
 0x347   :  { %3158 = vmatprep.subr.bf16.mxu0 %v7817_v54 }
 0x34a   :  { %3159 = vmatpush1.bf16.msra.mxu0 %v6526_v34 }
 0x34b   :  { %3160 = vmatprep.subr.bf16.mxu0 %v7817_v54 }
 0x34d   :  { %2901 = vmatmul.mubr.bf16.gmra.mrb[148].mxu0 %v7653_v10 }
 0x34e   :  { %5731 = vmatprep.mubr.msk.bf16.mxu0 %vm64_vm2, %v7727_v19  ;;  %3161 = vmatpush1.bf16.msra.mxu0 %v6527_v9 }
 0x34f   :  { %3162 = vmatprep.subr.bf16.mxu0 %v7817_v54 }
 0x352   :  { %3163 = vmatpush1.bf16.msra.mxu0 %v6528_v50 }
 0x353   :  { %3376 = vmatprep.subr.bf16.mxu0 %v7817_v54 }
 0x355   :  { %2909 = vmatmul.mubr.bf16.gmra.mrb[152].mxu0 %v7689_v36 }
 0x356   :  { %5732 = vmatprep.mubr.msk.bf16.mxu0 %vm64_vm2, %v7747_v11 }
 0x35d   :  { %2917 = vmatmul.mubr.bf16.gmra.mrb[156].mxu0 %v7721_v15 }
 0x35e   :  { %5769 = vmatprep.mubr.msk.bf16.mxu0 %vm64_vm2, %v3007_v20 }
 0x365   :  { %3173 = vmatmul.mubr.bf16.vlgmr.msra.gmra.mrb[160].mxu0 %v3004_v47 }
 0x366   :  { %3377 = vmatpush1.bf16.msra.mxu0 %v6529_v48  ;;  %5770 = vmatprep.mubr.msk.bf16.mxu0 %vm64_vm2, %v7600_v55  ;;  %v6532_v55 = vld [vmem:[%s8892_s5 + $0x198] sm:$0xff]   ;;  %v3034_v48 = vrot.slane %v2958_v59, 4 }
 0x367   :  { %3378 = vmatprep.subr.bf16.mxu0 %v7817_v54 }
 0x368   :  { %v3035_v52 = vsel %vm478_vm3, %v7753_v22, %v3034_v48 }
 0x36a   :  { %3379 = vmatpush1.bf16.msra.mxu0 %v6530_v24 }
 0x36b   :  { %3380 = vmatprep.subr.bf16.mxu0 %v7817_v54 }
 0x36d   :  { %3181 = vmatmul.mubr.bf16.gmra.mrb[164].mxu0 %v3009_v14 }
 0x36e   :  { %5771 = vmatprep.mubr.msk.bf16.mxu0 %vm64_vm2, %v7635_v45  ;;  %3381 = vmatpush1.bf16.msra.mxu0 %v6531_v43  ;;  %v6534_v45 = vld [vmem:[%s8892_s5 + $0x1a8] sm:$0xff]   ;;  %v2957_v43 = vld [vmem:[#allocation3 + $0x90] sm:$0xf] }
 0x36f   :  { %3382 = vmatprep.subr.bf16.mxu0 %v7817_v54 }
 0x372   :  { %3383 = vmatpush1.bf16.msra.mxu0 %v6532_v55 }
 0x373   :  { %3384 = vmatprep.subr.bf16.mxu0 %v7817_v54 }
 0x375   :  { %3189 = vmatmul.mubr.bf16.gmra.mrb[168].mxu0 %v3013_v32 }
 0x376   :  { %5772 = vmatprep.mubr.msk.bf16.mxu0 %vm64_vm2, %v7671_v30  ;;  %3385 = vmatpush1.bf16.msra.mxu0 %v6533_v39  ;;  %v3017_v30 = vsel %vm478_vm3, %v3012_v8, %v7662_v63  ;;  %v6537_v63 = vld [vmem:[%s8892_s5 + $0x1c0] sm:$0xff]   ;;  %v3032_v8 = vrot.slane %v2957_v43, 4 }
 0x377   :  { %v7969_v18 = vpop.f32.mrb[64].mxu0  ;;  %3386 = vmatprep.subr.bf16.mxu0 %v7817_v54 }
 0x378   :  { %v2472_v49 = vpop.f32.mrb[65].mxu0 }
 0x379   :  { %v7972_v44 = vpop.f32.mrb[66].mxu0 }
 0x37a   :  { %v2475_v27 = vpop.f32.mrb[67].mxu0  ;;  %3387 = vmatpush1.bf16.msra.mxu0 %v6534_v45 }
 0x37b   :  { %3388 = vmatprep.subr.bf16.mxu0 %v7817_v54 }
 0x37d   :  { %3197 = vmatmul.mubr.bf16.gmra.mrb[172].mxu0 %v3017_v30 }
 0x37e   :  { %5773 = vmatprep.mubr.msk.bf16.mxu0 %vm64_vm2, %v7704_v7  ;;  %3389 = vmatpush1.bf16.msra.mxu0 %v6535_v41  ;;  %v6538_v7 = vld [vmem:[%s8892_s5 + $0x1c8] sm:$0xff]  }
 0x37f   :  { %3390 = vmatprep.subr.bf16.mxu0 %v7817_v54 }
 0x380   :  { %v7986_v2 = vpop.f32.mrb[68].mxu0 }
 0x381   :  { %v2480_v57 = vpop.f32.mrb[69].mxu0 }
 0x382   :  { %v7988_v1 = vpop.f32.mrb[70].mxu0  ;;  %3391 = vmatpush1.bf16.msra.mxu0 %v6536_v23 }
 0x383   :  { %v2483_v5 = vpop.f32.mrb[71].mxu0  ;;  %3392 = vmatprep.subr.bf16.mxu0 %v7817_v54 }
 0x385   :  { %3205 = vmatmul.mubr.bf16.gmra.mrb[176].mxu0 %v7713_v31  ;;  %v6539_v31 = vld [vmem:[%s8892_s5 + $0x1d0] sm:$0xff]  }
 0x386   :  { %5774 = vmatprep.mubr.msk.bf16.mxu0 %vm64_vm2, %v7733_v60  ;;  %3393 = vmatpush1.bf16.msra.mxu0 %v6537_v63 }
 0x387   :  { %3394 = vmatprep.subr.bf16.mxu0 %v7817_v54 }
 0x388   :  { %v8001_v56 = vpop.f32.mrb[72].mxu0  ;;  %v8003_v42 = vpop.f32.mrb[32].mxu1 }
 0x389   :  { %v2488_v58 = vpop.f32.mrb[73].mxu0  ;;  %v3724_v33 = vpop.f32.mrb[33].mxu1 }
 0x38a   :  { %v8005_v34 = vpop.f32.mrb[74].mxu0  ;;  %v8007_v9 = vpop.f32.mrb[34].mxu1  ;;  %3395 = vmatpush1.bf16.msra.mxu0 %v6538_v7  ;;  %v6541_v7 = vld [vmem:[%s8892_s5 + $0x240] sm:$0xff]  }
 0x38b   :  { %v2491_v60 = vpop.f32.mrb[75].mxu0  ;;  %v3727_v50 = vpop.f32.mrb[35].mxu1  ;;  %3396 = vmatprep.subr.bf16.mxu0 %v7817_v54 }
 0x38d   :  { %3213 = vmatmul.mubr.bf16.gmra.mrb[180].mxu0 %v7741_v17 }
 0x38e   :  { %5775 = vmatprep.mubr.msk.bf16.mxu0 %vm64_vm2, %v7759_v53  ;;  %3397 = vmatpush1.bf16.msra.mxu0 %v6539_v31 }
 0x38f   :  { %3398 = vmatprep.subr.bf16.mxu0 %v7817_v54 }
 0x390   :  { %v8020_v20 = vpop.f32.mrb[76].mxu0  ;;  %v8022_v29 = vpop.f32.mrb[36].mxu1 }
 0x391   :  { %v2496_v46 = vpop.f32.mrb[77].mxu0  ;;  %v3732_v26 = vpop.f32.mrb[37].mxu1 }
 0x392   :  { %v8024_v47 = vpop.f32.mrb[78].mxu0  ;;  %v8026_v17 = vpop.f32.mrb[38].mxu1  ;;  %3399 = vmatpush1.bf16.msra.mxu0 %v6540_v38  ;;  %v6544_v26 = vld [vmem:[%s8892_s5 + $0x258] sm:$0xff]  }
 0x393   :  { %v2499_v53 = vpop.f32.mrb[79].mxu0  ;;  %v3735_v24 = vpop.f32.mrb[39].mxu1  ;;  %3924 = vmatprep.subr.bf16.mxu0 %v7817_v54 }
 0x395   :  { %3221 = vmatmul.mubr.bf16.gmra.mrb[184].mxu0 %v7767_v12  ;;  %v3033_v12 = vsel %vm478_vm3, %v7750_v13, %v3032_v8 }
 0x396   :  { %5776 = vmatprep.mubr.msk.bf16.mxu0 %vm64_vm2, %v3035_v52 }
 0x398   :  { %v8033_v14 = vpop.f32.mrb[80].mxu0  ;;  %v8035_v55 = vpop.f32.mrb[40].mxu1 }
 0x399   :  { %v2504_v39 = vpop.f32.mrb[81].mxu0  ;;  %v3740_v32 = vpop.f32.mrb[41].mxu1 }
 0x39a   :  { %v8037_v45 = vpop.f32.mrb[82].mxu0  ;;  %v8039_v49 = vpop.f32.mrb[42].mxu1 }
 0x39b   :  { %v2507_v27 = vpop.f32.mrb[83].mxu0  ;;  %v3743_v41 = vpop.f32.mrb[43].mxu1 }
 0x39c   :  { %v6546_v27 = vld [vmem:[%s8892_s5 + $0x268] sm:$0xff]  }
 0x39d   :  { %3229 = vmatmul.mubr.bf16.gmra.mrb[188].mxu0 %v3033_v12 }
 0x39e   :  { %5813 = vmatprep.mubr.msk.bf16.mxu0 %vm64_vm2, %v7545_v6  ;;  %v6542_v6 = vld [vmem:[%s8892_s5 + $0x248] sm:$0xff]  }
 0x3a0   :  { %v8045_v22 = vpop.f32.mrb[84].mxu0  ;;  %v8047_v30 = vpop.f32.mrb[44].mxu1 }
 0x3a1   :  { %v2512_v23 = vpop.f32.mrb[85].mxu0  ;;  %v3748_v57 = vpop.f32.mrb[45].mxu1 }
 0x3a2   :  { %v8049_v63 = vpop.f32.mrb[86].mxu0  ;;  %v8051_v5 = vpop.f32.mrb[46].mxu1 }
 0x3a3   :  { %v2515_v58 = vpop.f32.mrb[87].mxu0  ;;  %v3751_v13 = vpop.f32.mrb[47].mxu1 }
 0x3a4   :  { %v6547_v13 = vld [vmem:[%s8892_s5 + $0x270] sm:$0xff]  }
 0x3a5   :  { %3409 = vmatmul.mubr.bf16.vlgmr.msra.gmra.mrb[192].mxu0 %v7928_v16 }
 0x3a6   :  { %3925 = vmatpush1.bf16.msra.mxu0 %v6541_v7  ;;  %5814 = vmatprep.mubr.msk.bf16.mxu0 %vm64_vm2, %v7586_v40  ;;  %v6543_v40 = vld [vmem:[%s8892_s5 + $0x250] sm:$0xff]  }
 0x3a7   :  { %3926 = vmatprep.subr.bf16.mxu0 %v7817_v54 }
 0x3a8   :  { %v8063_v33 = vpop.f32.mrb[88].mxu0  ;;  %v8065_v31 = vpop.f32.mrb[48].mxu1 }
 0x3a9   :  { %v2520_v60 = vpop.f32.mrb[89].mxu0  ;;  %v3756_v50 = vpop.f32.mrb[49].mxu1 }
 0x3aa   :  { %v8067_v59 = vpop.f32.mrb[90].mxu0  ;;  %v8069_v38 = vpop.f32.mrb[50].mxu1  ;;  %3927 = vmatpush1.bf16.msra.mxu0 %v6542_v6 }
 0x3ab   :  { %v2523_v16 = vpop.f32.mrb[91].mxu0  ;;  %v3759_v46 = vpop.f32.mrb[51].mxu1  ;;  %3928 = vmatprep.subr.bf16.mxu0 %v7817_v54 }
 0x3ad   :  { %3417 = vmatmul.mubr.bf16.gmra.mrb[196].mxu0 %v7936_v28  ;;  %v6545_v28 = vld [vmem:[%s8892_s5 + $0x260] sm:$0xff]  }
 0x3ae   :  { %5815 = vmatprep.mubr.msk.bf16.mxu0 %vm64_vm2, %v7625_v25  ;;  %3929 = vmatpush1.bf16.msra.mxu0 %v6543_v40 }
 0x3af   :  { %3930 = vmatprep.subr.bf16.mxu0 %v7817_v54 }
 0x3b0   :  { %v8082_v48 = vpop.f32.mrb[92].mxu0 }
 0x3b1   :  { %v8084_v53 = vpop.f32.mrb[52].mxu1  ;;  %v2528_v24 = vpop.f32.mrb[93].mxu0 }
 0x3b2   :  { %v3764_v52 = vpop.f32.mrb[53].mxu1  ;;  %v8086_v43 = vpop.f32.mrb[94].mxu0  ;;  %3931 = vmatpush1.bf16.msra.mxu0 %v6544_v26 }
 0x3b3   :  { %v8088_v8 = vpop.f32.mrb[54].mxu1  ;;  %v2531_v39 = vpop.f32.mrb[95].mxu0  ;;  %3932 = vmatprep.subr.bf16.mxu0 %v7817_v54 }
 0x3b4   :  { %v3767_v32 = vpop.f32.mrb[55].mxu1 }
 0x3b5   :  { %3425 = vmatmul.mubr.bf16.gmra.mrb[200].mxu0 %v7950_v4 }
 0x3b6   :  { %5816 = vmatprep.mubr.msk.bf16.mxu0 %vm64_vm2, %v7659_v51  ;;  %3933 = vmatpush1.bf16.msra.mxu0 %v6545_v28  ;;  %v6549_v28 = vld [vmem:[%s8892_s5 + $0x280] sm:$0xff]  }
 0x3b7   :  { %3934 = vmatprep.subr.bf16.mxu0 %v7817_v54 }
 0x3b8   :  { %v2663_v41 = vpop.f32.mrb[96].mxu0 }
 0x3b9   :  { %v8101_v12 = vpop.f32.mrb[56].mxu1  ;;  %v8104_v23 = vadd.f32 %v2663_v41, %v7969_v18  ;;  %v2665_v57 = vpop.f32.mrb[97].mxu0  ;;  %v6548_v18 = vld [vmem:[%s8892_s5 + $0x278] sm:$0xff]  }
 0x3ba   :  { %v3772_v7 = vpop.f32.mrb[57].mxu1  ;;  %v2666_v58 = vpop.f32.mrb[98].mxu0  ;;  %3935 = vmatpush1.bf16.msra.mxu0 %v6546_v27 }
 0x3bb   :  { %v8106_v4 = vpop.f32.mrb[58].mxu1  ;;  %v8112_v6 = vadd.f32 %v2666_v58, %v7972_v44  ;;  %v2668_v60 = vpop.f32.mrb[99].mxu0  ;;  %3936 = vmatprep.subr.bf16.mxu0 %v7817_v54  ;;  %v6551_v58 = vld [vmem:[%s8892_s5 + $0x290] sm:$0xff]  }
 0x3bc   :  { %v3775_v50 = vpop.f32.mrb[59].mxu1 }
 0x3bd   :  { %3433 = vmatmul.mubr.bf16.gmra.mrb[204].mxu0 %v7619_v61 }
 0x3be   :  { %5817 = vmatprep.mubr.msk.bf16.mxu0 %vm64_vm2, %v7695_v3  ;;  %3937 = vmatpush1.bf16.msra.mxu0 %v6547_v13 }
 0x3bf   :  { %3938 = vmatprep.subr.bf16.mxu0 %v7817_v54 }
 0x3c0   :  { %v2671_v40 = vpop.f32.mrb[100].mxu0 }
 0x3c1   :  { %v8122_v16 = vpop.f32.mrb[60].mxu1  ;;  %v8125_v44 = vadd.f32 %v2671_v40, %v7986_v2  ;;  %v2673_v46 = vpop.f32.mrb[101].mxu0  ;;  %v6550_v2 = vld [vmem:[%s8892_s5 + $0x288] sm:$0xff]  }
 0x3c2   :  { %v3780_v26 = vpop.f32.mrb[61].mxu1  ;;  %v2674_v24 = vpop.f32.mrb[102].mxu0  ;;  %3939 = vmatpush1.bf16.msra.mxu0 %v6548_v18 }
 0x3c3   :  { %v8127_v52 = vpop.f32.mrb[62].mxu1  ;;  %v8133_v39 = vadd.f32 %v2674_v24, %v7988_v1  ;;  %v2676_v32 = vpop.f32.mrb[103].mxu0  ;;  %3940 = vmatprep.subr.bf16.mxu0 %v7817_v54 }
 0x3c4   :  { %v3783_v27 = vpop.f32.mrb[63].mxu1 }
 0x3c5   :  { %3441 = vmatmul.mubr.bf16.gmra.mrb[208].mxu0 %v7653_v10 }
 0x3c6   :  { %5818 = vmatprep.mubr.msk.bf16.mxu0 %vm64_vm2, %v7727_v19  ;;  %3941 = vmatpush1.bf16.msra.mxu0 %v6549_v28 }
 0x3c7   :  { %3942 = vmatprep.subr.bf16.mxu0 %v7817_v54 }
 0x3c8   :  { %v2679_v41 = vpop.f32.mrb[104].mxu0 }
 0x3c9   :  { %v8144_v1 = vadd.f32 %v2679_v41, %v8001_v56  ;;  %v2681_v57 = vpop.f32.mrb[105].mxu0  ;;  %v6552_v56 = vld [vmem:[%s8892_s5 + $0x298] sm:$0xff]  }
 0x3ca   :  { %v2682_v7 = vpop.f32.mrb[106].mxu0  ;;  %3943 = vmatpush1.bf16.msra.mxu0 %v6550_v2 }
 0x3cb   :  { %v8150_v13 = vadd.f32 %v2682_v7, %v8005_v34  ;;  %v2684_v60 = vpop.f32.mrb[107].mxu0  ;;  %3944 = vmatprep.subr.bf16.mxu0 %v7817_v54 }
 0x3cd   :  { %3449 = vmatmul.mubr.bf16.gmra.mrb[212].mxu0 %v7689_v36 }
 0x3ce   :  { %5819 = vmatprep.mubr.msk.bf16.mxu0 %vm64_vm2, %v7747_v11  ;;  %3945 = vmatpush1.bf16.msra.mxu0 %v6551_v58 }
 0x3cf   :  { %3946 = vmatprep.subr.bf16.mxu0 %v7817_v54 }
 0x3d0   :  { %v2687_v50 = vpop.f32.mrb[108].mxu0 }
 0x3d1   :  { %v8161_v18 = vadd.f32 %v2687_v50, %v8020_v20  ;;  %v2689_v34 = vpop.f32.mrb[109].mxu0 }
 0x3d2   :  { %v2690_v40 = vpop.f32.mrb[110].mxu0  ;;  %3947 = vmatpush1.bf16.msra.mxu0 %v6552_v56  ;;  %v6780_v56 = vld [vmem:[#allocation3 + $0x30] sm:$0xff] }
 0x3d3   :  { %v8164_v46 = vadd.f32 %v2690_v40, %v8024_v47  ;;  %v2692_v26 = vpop.f32.mrb[111].mxu0  ;;  %v6779_v47 = vld [vmem:[#allocation3 + $0x38] sm:$0xff] }
 0x3d5   :  { %3457 = vmatmul.mubr.bf16.gmra.mrb[216].mxu0 %v7721_v15 }
 0x3d6   :  { %5820 = vmatprep.mubr.msk.bf16.mxu0 %vm64_vm2, %v7745_v62 }
 0x3d8   :  { %v2695_v24 = vpop.f32.mrb[112].mxu0 }
 0x3d9   :  { %v8170_v28 = vadd.f32 %v2695_v24, %v8033_v14  ;;  %v2697_v32 = vpop.f32.mrb[113].mxu0  ;;  %v6781_v24 = vld [vmem:[#allocation3 + $0x40] sm:$0xff] }
 0x3da   :  { %v2698_v27 = vpop.f32.mrb[114].mxu0 }
 0x3db   :  { %v8173_v20 = vadd.f32 %v2698_v27, %v8037_v45  ;;  %v2700_v2 = vpop.f32.mrb[115].mxu0 }
 0x3dd   :  { %3465 = vmatmul.mubr.bf16.gmra.mrb[220].mxu0 %v7772_v21 }
 0x3de   :  { %5901 = vmatprep.mubr.msk.bf16.mxu0 %vm64_vm2, %v6779_v47 }
 0x3e0   :  { %v2703_v41 = vpop.f32.mrb[116].mxu0 }
 0x3e1   :  { %v8178_v57 = vadd.f32 %v2703_v41, %v8045_v22  ;;  %v2705_v7 = vpop.f32.mrb[117].mxu0 }
 0x3e2   :  { %v2706_v58 = vpop.f32.mrb[118].mxu0 }
 0x3e3   :  { %v8181_v14 = vadd.f32 %v2706_v58, %v8049_v63  ;;  %v2708_v60 = vpop.f32.mrb[119].mxu0 }
 0x3e5   :  { %3957 = vmatmul.mubr.bf16.vlgmr.msra.gmra.mrb[224].mxu0 %v6780_v56 }
 0x3e6   :  { %5902 = vmatprep.mubr.msk.bf16.mxu0 %vm64_vm2, %v7625_v25 }
 0x3e8   :  { %v2711_v45 = vpop.f32.mrb[120].mxu0 }
 0x3e9   :  { %v8186_v50 = vadd.f32 %v2711_v45, %v8063_v33  ;;  %v2713_v34 = vpop.f32.mrb[121].mxu0 }
 0x3ea   :  { %v2714_v40 = vpop.f32.mrb[122].mxu0 }
 0x3eb   :  { %v8189_v22 = vadd.f32 %v2714_v40, %v8067_v59  ;;  %v2716_v26 = vpop.f32.mrb[123].mxu0 }
 0x3ed   :  { %3965 = vmatmul.mubr.bf16.gmra.mrb[228].mxu0 %v6781_v24  ;;  %v3802_v24 = vld [vmem:[#allocation3 + $0xa8] sm:$0xff] }
 0x3ee   :  { %5903 = vmatprep.mubr.msk.bf16.mxu0 %vm64_vm2, %v7659_v51 }
 0x3f0   :  { %v2719_v63 = vpop.f32.mrb[124].mxu0 }
 0x3f1   :  { %v2720_v32 = vadd.f32 %v2719_v63, %v8082_v48  ;;  %v2721_v27 = vpop.f32.mrb[125].mxu0 }
 0x3f2   :  { %v2722_v25 = vpop.f32.mrb[126].mxu0 }
 0x3f3   :  { %v2723_v2 = vadd.f32 %v2722_v25, %v8086_v43  ;;  %v2724_v33 = vpop.f32.mrb[127].mxu0 }
 0x3f5   :  { %3973 = vmatmul.mubr.bf16.gmra.mrb[232].mxu0 %v7619_v61 }
 0x3f6   :  { %5904 = vmatprep.mubr.msk.bf16.mxu0 %vm64_vm2, %v7695_v3 }
 0x3f8   :  { %v2862_v59 = vpop.f32.mrb[128].mxu0 }
 0x3f9   :  { %v2925_v47 = vadd.f32 %v2862_v59, %v8104_v23  ;;  %v2864_v41 = vpop.f32.mrb[129].mxu0 }
 0x3fa   :  { %v2865_v7 = vpop.f32.mrb[130].mxu0 }
 0x3fb   :  { %v2926_v51 = vadd.f32 %v2865_v7, %v8112_v6  ;;  %v2867_v58 = vpop.f32.mrb[131].mxu0 }
 0x3fd   :  { %3981 = vmatmul.mubr.bf16.gmra.mrb[236].mxu0 %v7653_v10 }
 0x3fe   :  { %5905 = vmatprep.mubr.msk.bf16.mxu0 %vm64_vm2, %v7727_v19 }
 0x400   :  { %v2870_v48 = vpop.f32.mrb[132].mxu0 }
 0x401   :  { %v2927_v43 = vadd.f32 %v2870_v48, %v8125_v44  ;;  %v2872_v61 = vpop.f32.mrb[133].mxu0 }
 0x402   :  { %v2873_v60 = vpop.f32.mrb[134].mxu0 }
 0x403   :  { %v2928_v3 = vadd.f32 %v2873_v60, %v8133_v39  ;;  %v2875_v56 = vpop.f32.mrb[135].mxu0 }
 0x405   :  { %3989 = vmatmul.mubr.bf16.gmra.mrb[240].mxu0 %v7689_v36 }
 0x406   :  { %5906 = vmatprep.mubr.msk.bf16.mxu0 %vm64_vm2, %v7747_v11 }
 0x408   :  { %v2878_v23 = vpop.f32.mrb[136].mxu0 }
 0x409   :  { %v2929_v6 = vadd.f32 %v2878_v23, %v8144_v1  ;;  %v2880_v10 = vpop.f32.mrb[137].mxu0 }
 0x40a   :  { %v2881_v45 = vpop.f32.mrb[138].mxu0 }
 0x40b   :  { %v2930_v19 = vadd.f32 %v2881_v45, %v8150_v13  ;;  %v2883_v34 = vpop.f32.mrb[139].mxu0 }
 0x40d   :  { %3997 = vmatmul.mubr.bf16.gmra.mrb[244].mxu0 %v7721_v15 }
 0x40e   :  { %5907 = vmatprep.mubr.msk.bf16.mxu0 %vm64_vm2, %v7745_v62 }
 0x410   :  { %v2886_v44 = vpop.f32.mrb[140].mxu0 }
 0x411   :  { %v2931_v39 = vadd.f32 %v2886_v44, %v8161_v18  ;;  %v2888_v36 = vpop.f32.mrb[141].mxu0 }
 0x412   :  { %v2889_v40 = vpop.f32.mrb[142].mxu0 }
 0x413   :  { %v2932_v11 = vadd.f32 %v2889_v40, %v8164_v46  ;;  %v2891_v26 = vpop.f32.mrb[143].mxu0 }
 0x415   :  { %4005 = vmatmul.mubr.bf16.gmra.mrb[248].mxu0 %v7772_v21 }
 0x416   :  { %5908 = vmatprep.mubr.msk.bf16.mxu0 %vm64_vm2, %v3802_v24 }
 0x418   :  { %v2894_v1 = vpop.f32.mrb[144].mxu0 }
 0x419   :  { %v2933_v13 = vadd.f32 %v2894_v1, %v8170_v28  ;;  %v2896_v15 = vpop.f32.mrb[145].mxu0 }
 0x41a   :  { %v2897_v63 = vpop.f32.mrb[146].mxu0 }
 0x41b   :  { %v2934_v62 = vadd.f32 %v2897_v63, %v8173_v20  ;;  %v2899_v27 = vpop.f32.mrb[147].mxu0 }
 0x41d   :  { %4013 = vmatmul.mubr.bf16.gmra.mrb[252].mxu0 %v7817_v54 }
 0x420   :  { %v2902_v18 = vpop.f32.mrb[148].mxu0 }
 0x421   :  { %v2935_v25 = vadd.f32 %v2902_v18, %v8178_v57  ;;  %v2904_v46 = vpop.f32.mrb[149].mxu0 }
 0x422   :  { %v2905_v33 = vpop.f32.mrb[150].mxu0 }
 0x423   :  { %v2936_v59 = vadd.f32 %v2905_v33, %v8181_v14  ;;  %v2907_v21 = vpop.f32.mrb[151].mxu0 }
 0x428   :  { %v2910_v41 = vpop.f32.mrb[152].mxu0 }
 0x429   :  { %v2937_v7 = vadd.f32 %v2910_v41, %v8186_v50  ;;  %v2912_v58 = vpop.f32.mrb[153].mxu0 }
 0x42a   :  { %v2913_v28 = vpop.f32.mrb[154].mxu0 }
 0x42b   :  { %v2938_v48 = vadd.f32 %v2913_v28, %v8189_v22  ;;  %v2915_v61 = vpop.f32.mrb[155].mxu0 }
 0x430   :  { %v2918_v20 = vpop.f32.mrb[156].mxu0 }
 0x431   :  { %v2939_v60 = vadd.f32 %v2918_v20, %v2720_v32  ;;  %v2920_v56 = vpop.f32.mrb[157].mxu0 }
 0x432   :  { %v2921_v54 = vpop.f32.mrb[158].mxu0 }
 0x433   :  { %v2940_v23 = vadd.f32 %v2921_v54, %v2723_v2  ;;  %v2923_v10 = vpop.f32.mrb[159].mxu0 }
 0x438   :  { %v3174_v57 = vpop.f32.mrb[160].mxu0 }
 0x439   :  { %v3237_v45 = vadd.f32 %v3174_v57, %v2925_v47  ;;  %v3176_v34 = vpop.f32.mrb[161].mxu0 }
 0x43a   :  { %v3177_v44 = vpop.f32.mrb[162].mxu0 }
 0x43b   :  { %v3238_v14 = vadd.f32 %v3177_v44, %v2926_v51  ;;  %v3179_v36 = vpop.f32.mrb[163].mxu0 }
 0x440   :  { %v3182_v40 = vpop.f32.mrb[164].mxu0 }
 0x441   :  { %v3239_v26 = vadd.f32 %v3182_v40, %v2927_v43  ;;  %v3184_v50 = vpop.f32.mrb[165].mxu0 }
 0x442   :  { %v3185_v24 = vpop.f32.mrb[166].mxu0 }
 0x443   :  { %v3240_v1 = vadd.f32 %v3185_v24, %v2928_v3  ;;  %v3187_v15 = vpop.f32.mrb[167].mxu0 }
 0x448   :  { %v3190_v22 = vpop.f32.mrb[168].mxu0 }
 0x449   :  { %v8224_v63 = vadd.f32 %v3190_v22, %v2929_v6  ;;  %v3192_v32 = vpop.f32.mrb[169].mxu0 }
 0x44a   :  { %v3193_v27 = vpop.f32.mrb[170].mxu0 }
 0x44b   :  { %v8226_v18 = vadd.f32 %v3193_v27, %v2930_v19  ;;  %v3195_v2 = vpop.f32.mrb[171].mxu0 }
 0x450   :  { %v3198_v46 = vpop.f32.mrb[172].mxu0 }
 0x451   :  { %v8228_v47 = vadd.f32 %v3198_v46, %v2931_v39  ;;  %v3200_v33 = vpop.f32.mrb[173].mxu0 }
 0x452   :  { %v3201_v51 = vpop.f32.mrb[174].mxu0 }
 0x453   :  { %v8230_v21 = vadd.f32 %v3201_v51, %v2932_v11  ;;  %v3203_v43 = vpop.f32.mrb[175].mxu0 }
 0x458   :  { %v3206_v41 = vpop.f32.mrb[176].mxu0 }
 0x459   :  { %v8232_v58 = vadd.f32 %v3206_v41, %v2933_v13  ;;  %v3208_v3 = vpop.f32.mrb[177].mxu0 }
 0x45a   :  { %v3209_v28 = vpop.f32.mrb[178].mxu0 }
 0x45b   :  { %v8234_v6 = vadd.f32 %v3209_v28, %v2934_v62  ;;  %v3211_v61 = vpop.f32.mrb[179].mxu0 }
 0x460   :  { %v3214_v20 = vpop.f32.mrb[180].mxu0 }
 0x461   :  { %v8236_v19 = vadd.f32 %v3214_v20, %v2935_v25  ;;  %v3216_v56 = vpop.f32.mrb[181].mxu0  ;;  %v6564_v20 = vld [vmem:[%s8894_s7 + $0x34] ss:$8 sps:$4 sm:$0xff]  }
 0x462   :  { %v3217_v54 = vpop.f32.mrb[182].mxu0 }
 0x463   :  { %v8238_v39 = vadd.f32 %v3217_v54, %v2936_v59  ;;  %v3219_v10 = vpop.f32.mrb[183].mxu0 }
 0x468   :  { %v3222_v57 = vpop.f32.mrb[184].mxu0 }
 0x469   :  { %v8240_v11 = vadd.f32 %v3222_v57, %v2937_v7  ;;  %v3224_v34 = vpop.f32.mrb[185].mxu0 }
 0x46a   :  { %v3225_v44 = vpop.f32.mrb[186].mxu0 }
 0x46b   :  { %v8242_v13 = vadd.f32 %v3225_v44, %v2938_v48  ;;  %v3227_v36 = vpop.f32.mrb[187].mxu0  ;;  %v6553_v48 = vld [vmem:[%s8894_s7] ss:$8 sps:$4 sm:$0xff]  }
 0x470   :  { %v3230_v40 = vpop.f32.mrb[188].mxu0 }
 0x471   :  { %v8244_v62 = vadd.f32 %v3230_v40, %v2939_v60  ;;  %v3232_v50 = vpop.f32.mrb[189].mxu0  ;;  %v6555_v60 = vld [vmem:[%s8894_s7 + $0x4] ss:$8 sps:$4 sm:$0xff]   ;;  %v6570_v40 = vld [vmem:[%s8894_s7 + $0x54] ss:$8 sps:$4 sm:$0xff]  }
 0x472   :  { %v3233_v24 = vpop.f32.mrb[190].mxu0  ;;  %4960 = vmatprep.subr.bf16.mxu1 %v6555_v60  ;;  %v6568_v50 = vld [vmem:[%s8894_s7 + $0x50] ss:$8 sps:$4 sm:$0xff]  }
 0x473   :  { %v8246_v25 = vadd.f32 %v3233_v24, %v2940_v23  ;;  %v3235_v15 = vpop.f32.mrb[191].mxu0  ;;  %v6558_v23 = vld [vmem:[%s8894_s7 + $0x14] ss:$8 sps:$4 sm:$0xff]   ;;  %4961 = vmatpush1.bf16.msra.mxu1 %v6553_v48 }
 0x474   :  { %4962 = vmatprep.subr.bf16.mxu1 %v6558_v23 }
 0x478   :  { %v3410_v22 = vpop.f32.mrb[192].mxu0 }
 0x479   :  { %v3473_v59 = vadd.f32 %v3410_v22, %v3237_v45  ;;  %v3412_v32 = vpop.f32.mrb[193].mxu0 }
 0x47a   :  { %v3413_v27 = vpop.f32.mrb[194].mxu0 }
 0x47b   :  { %v3474_v2 = vadd.f32 %v3413_v27, %v3238_v14  ;;  %v3415_v7 = vpop.f32.mrb[195].mxu0  ;;  %v8249_v46 = vadd.f32 %v8003_v42, %v3473_v59  ;;  %v6556_v42 = vld [vmem:[%s8894_s7 + $0x10] ss:$8 sps:$4 sm:$0xff]   ;;  %v6561_v14 = vld [vmem:[%s8894_s7 + $0x24] ss:$8 sps:$4 sm:$0xff]  }
 0x47c   :  { %4963 = vmatpush1.bf16.msra.mxu1 %v6556_v42  ;;  %v6574_v7 = vld [vmem:[%s8894_s7 + $0x70] ss:$8 sps:$4 sm:$0xff]  }
 0x47d   :  { %v8261_v45 = vadd.f32 %v8007_v9, %v3474_v2  ;;  %v6559_v9 = vld [vmem:[%s8894_s7 + $0x20] ss:$8 sps:$4 sm:$0xff]   ;;  %4964 = vmatprep.subr.bf16.mxu1 %v6561_v14  ;;  %v6576_v2 = vld [vmem:[%s8894_s7 + $0x74] ss:$8 sps:$4 sm:$0xff]  }
 0x480   :  { %v3418_v33 = vpop.f32.mrb[196].mxu0  ;;  %4965 = vmatpush1.bf16.msra.mxu1 %v6559_v9 }
 0x481   :  { %v3475_v51 = vadd.f32 %v3418_v33, %v3239_v26  ;;  %v3420_v43 = vpop.f32.mrb[197].mxu0  ;;  %v6562_v26 = vld [vmem:[%s8894_s7 + $0x30] ss:$8 sps:$4 sm:$0xff]   ;;  %4966 = vmatprep.subr.bf16.mxu1 %v6564_v20 }
 0x482   :  { %v3421_v41 = vpop.f32.mrb[198].mxu0  ;;  %v6580_v43 = vld [vmem:[%s8894_s7 + $0x90] ss:$8 sps:$4 sm:$0xff]  }
 0x483   :  { %v3476_v3 = vadd.f32 %v3421_v41, %v3240_v1  ;;  %v3423_v28 = vpop.f32.mrb[199].mxu0  ;;  %v8273_v61 = vadd.f32 %v8022_v29, %v3475_v51  ;;  %v6567_v1 = vld [vmem:[%s8894_s7 + $0x44] ss:$8 sps:$4 sm:$0xff]   ;;  %v6582_v51 = vld [vmem:[%s8894_s7 + $0x94] ss:$8 sps:$4 sm:$0xff]  }
 0x484   :  { %4967 = vmatpush1.bf16.msra.mxu1 %v6562_v26 }
 0x485   :  { %v8279_v56 = vadd.f32 %v8026_v17, %v3476_v3  ;;  %v6565_v17 = vld [vmem:[%s8894_s7 + $0x40] ss:$8 sps:$4 sm:$0xff]   ;;  %4968 = vmatprep.subr.bf16.mxu1 %v6567_v1  ;;  %v6588_v1 = vld [vmem:[%s8894_s7 + $0xb4] ss:$8 sps:$4 sm:$0xff]  }
 0x488   :  { %v3426_v29 = vpop.f32.mrb[200].mxu0  ;;  %4969 = vmatpush1.bf16.msra.mxu1 %v6565_v17 }
 0x489   :  { %v3477_v54 = vadd.f32 %v3426_v29, %v8224_v63  ;;  %v3428_v10 = vpop.f32.mrb[201].mxu0  ;;  %4970 = vmatprep.subr.bf16.mxu1 %v6570_v40  ;;  %v6586_v29 = vld [vmem:[%s8894_s7 + $0xb0] ss:$8 sps:$4 sm:$0xff]  }
 0x48a   :  { %v3429_v57 = vpop.f32.mrb[202].mxu0 }
 0x48b   :  { %v3478_v34 = vadd.f32 %v3429_v57, %v8226_v18  ;;  %v3431_v44 = vpop.f32.mrb[203].mxu0  ;;  %v8293_v36 = vadd.f32 %v8035_v55, %v3477_v54  ;;  %v6573_v18 = vld [vmem:[%s8894_s7 + $0x64] ss:$8 sps:$4 sm:$0xff]  }
 0x48c   :  { %4971 = vmatpush1.bf16.msra.mxu1 %v6568_v50 }
 0x48d   :  { %v8299_v63 = vadd.f32 %v8039_v49, %v3478_v34  ;;  %v6571_v49 = vld [vmem:[%s8894_s7 + $0x60] ss:$8 sps:$4 sm:$0xff]   ;;  %4972 = vmatprep.subr.bf16.mxu1 %v6573_v18 }
 0x490   :  { %v3434_v55 = vpop.f32.mrb[204].mxu0  ;;  %4973 = vmatpush1.bf16.msra.mxu1 %v6571_v49 }
 0x491   :  { %v3479_v24 = vadd.f32 %v3434_v55, %v8228_v47  ;;  %v3436_v15 = vpop.f32.mrb[205].mxu0  ;;  %4974 = vmatprep.subr.bf16.mxu1 %v6576_v2 }
 0x492   :  { %v3437_v22 = vpop.f32.mrb[206].mxu0 }
 0x493   :  { %v3480_v59 = vadd.f32 %v3437_v22, %v8230_v21  ;;  %v3439_v32 = vpop.f32.mrb[207].mxu0  ;;  %v8313_v27 = vadd.f32 %v8047_v30, %v3479_v24  ;;  %v6579_v21 = vld [vmem:[%s8894_s7 + $0x84] ss:$8 sps:$4 sm:$0xff]   ;;  %v6592_v22 = vld [vmem:[%s8894_s7 + $0xd0] ss:$8 sps:$4 sm:$0xff]  }
 0x494   :  { %4975 = vmatpush1.bf16.msra.mxu1 %v6574_v7 }
 0x495   :  { %v8319_v47 = vadd.f32 %v8051_v5, %v3480_v59  ;;  %v6577_v5 = vld [vmem:[%s8894_s7 + $0x80] ss:$8 sps:$4 sm:$0xff]   ;;  %4976 = vmatprep.subr.bf16.mxu1 %v6579_v21  ;;  %v6597_v21 = vld [vmem:[%s8894_s7 + $0xe4] ss:$8 sps:$4 sm:$0xff]  }
 0x498   :  { %v3442_v30 = vpop.f32.mrb[208].mxu0  ;;  %4977 = vmatpush1.bf16.msra.mxu1 %v6577_v5 }
 0x499   :  { %v3481_v48 = vadd.f32 %v3442_v30, %v8232_v58  ;;  %v3444_v60 = vpop.f32.mrb[209].mxu0  ;;  %4978 = vmatprep.subr.bf16.mxu1 %v6582_v51  ;;  %v6598_v51 = vld [vmem:[%s8894_s7 + $0xf0] ss:$8 sps:$4 sm:$0xff]  }
 0x49a   :  { %v3445_v23 = vpop.f32.mrb[210].mxu0  ;;  %v6600_v60 = vld [vmem:[%s8894_s7 + $0xf4] ss:$8 sps:$4 sm:$0xff]  }
 0x49b   :  { %v3482_v42 = vadd.f32 %v3445_v23, %v8234_v6  ;;  %v3447_v14 = vpop.f32.mrb[211].mxu0  ;;  %v8333_v33 = vadd.f32 %v8065_v31, %v3481_v48  ;;  %v6585_v6 = vld [vmem:[%s8894_s7 + $0xa4] ss:$8 sps:$4 sm:$0xff]  }
 0x49c   :  { %4979 = vmatpush1.bf16.msra.mxu1 %v6580_v43 }
 0x49d   :  { %v8339_v58 = vadd.f32 %v8069_v38, %v3482_v42  ;;  %v6583_v38 = vld [vmem:[%s8894_s7 + $0xa0] ss:$8 sps:$4 sm:$0xff]   ;;  %4980 = vmatprep.subr.bf16.mxu1 %v6585_v6 }
 0x4a0   :  { %v3450_v31 = vpop.f32.mrb[212].mxu0  ;;  %4981 = vmatpush1.bf16.msra.mxu1 %v6583_v38 }
 0x4a1   :  { %v3483_v41 = vadd.f32 %v3450_v31, %v8236_v19  ;;  %v3452_v9 = vpop.f32.mrb[213].mxu0  ;;  %4982 = vmatprep.subr.bf16.mxu1 %v6588_v1 }
 0x4a2   :  { %v3453_v3 = vpop.f32.mrb[214].mxu0 }
 0x4a3   :  { %v3484_v28 = vadd.f32 %v3453_v3, %v8238_v39  ;;  %v3455_v20 = vpop.f32.mrb[215].mxu0  ;;  %v8353_v26 = vadd.f32 %v8084_v53, %v3483_v41 }
 0x4a4   :  { %4983 = vmatpush1.bf16.msra.mxu1 %v6586_v29 }
 0x4a5   :  { %v8359_v19 = vadd.f32 %v8088_v8, %v3484_v28  ;;  %v6605_v28 = vld [vmem:[%s8894_s7 + $0x104] ss:$8 sps:$4 sm:$0xff]  }
 0x4a8   :  { %v3458_v54 = vpop.f32.mrb[216].mxu0 }
 0x4a9   :  { %v3485_v39 = vadd.f32 %v3458_v54, %v8240_v11  ;;  %v3460_v10 = vpop.f32.mrb[217].mxu0 }
 0x4aa   :  { %v3461_v53 = vpop.f32.mrb[218].mxu0 }
 0x4ab   :  { %v3486_v57 = vadd.f32 %v3461_v53, %v8242_v13  ;;  %v3463_v17 = vpop.f32.mrb[219].mxu0  ;;  %v8367_v34 = vadd.f32 %v8101_v12, %v3485_v39  ;;  %v6589_v12 = vld [vmem:[%s8894_s7 + $0xc0] ss:$8 sps:$4 sm:$0xff]  }
 0x4ad   :  { %v8370_v8 = vadd.f32 %v8106_v4, %v3486_v57  ;;  %v6591_v4 = vld [vmem:[%s8894_s7 + $0xc4] ss:$8 sps:$4 sm:$0xff]  }
 0x4ae   :  { %4984 = vmatprep.subr.bf16.mxu1 %v6591_v4 }
 0x4af   :  { %4985 = vmatpush1.bf16.msra.mxu1 %v6589_v12 }
 0x4b0   :  { %v3466_v44 = vpop.f32.mrb[220].mxu0 }
 0x4b1   :  { %v3487_v40 = vadd.f32 %v3466_v44, %v8244_v62  ;;  %v3468_v50 = vpop.f32.mrb[221].mxu0  ;;  %v6594_v62 = vld [vmem:[%s8894_s7 + $0xd4] ss:$8 sps:$4 sm:$0xff]  }
 0x4b2   :  { %v3469_v18 = vpop.f32.mrb[222].mxu0  ;;  %4986 = vmatprep.subr.bf16.mxu1 %v6594_v62 }
 0x4b3   :  { %v3488_v55 = vadd.f32 %v3469_v18, %v8246_v25  ;;  %v3471_v11 = vpop.f32.mrb[223].mxu0  ;;  %v8375_v24 = vadd.f32 %v8122_v16, %v3487_v40  ;;  %v8392_v16 = vld [vmem:[%s8893_s6] ss:$0 sm:$0xff]  ;;  %4987 = vmatpush1.bf16.msra.mxu1 %v6592_v22 }
 0x4b4   :  { %4988 = vmatprep.subr.bf16.mxu1 %v6597_v21 }
 0x4b5   :  { %v8378_v13 = vadd.f32 %v8127_v52, %v3488_v55 }
 0x4b8   :  { %v3958_v25 = vpop.f32.mrb[224].mxu0 }
 0x4b9   :  { %v4021_v52 = vadd.f32 %v3958_v25, %v8249_v46  ;;  %v3960_v15 = vpop.f32.mrb[225].mxu0  ;;  %v6595_v46 = vld [vmem:[%s8894_s7 + $0xe0] ss:$8 sps:$4 sm:$0xff]  }
 0x4ba   :  { %v3961_v49 = vpop.f32.mrb[226].mxu0  ;;  %4989 = vmatpush1.bf16.msra.mxu1 %v6595_v46 }
 0x4bb   :  { %v4043_v59 = vadd.f32 %v8392_v16, %v4021_v52  ;;  %v4022_v32 = vadd.f32 %v3961_v49, %v8261_v45  ;;  %v3963_v2 = vpop.f32.mrb[227].mxu0  ;;  %4990 = vmatprep.subr.bf16.mxu1 %v6600_v60 }
 0x4bd   :  { %v4044_v7 = vadd.f32 %v8392_v16, %v4022_v32  ;;  %v4059_v30 = vmax.f32 %v4043_v59, 0.0 }
 0x4be   :  { %4991 = vmatpush1.bf16.msra.mxu1 %v6598_v51 }
 0x4bf   :  { %v4060_v48 = vmax.f32 %v4044_v7, 0.0  ;;  %5001 = vmatprep.subr.bf16.mxu1 %v6605_v28 }
 0x4c0   :  { %v3966_v23 = vpop.f32.mrb[228].mxu0 }
 0x4c1   :  { %v4075_v45 = vpack.c.bf16 %v4060_v48, %v4059_v30  ;;  %v4023_v5 = vadd.f32 %v3966_v23, %v8273_v61  ;;  %v3968_v42 = vpop.f32.mrb[229].mxu0  ;;  %v6080_v14 = vpack.c.bf16 %v4060_v48, %v4060_v48 }
 0x4c2   :  { %v3969_v43 = vpop.f32.mrb[230].mxu0 }
 0x4c3   :  { %4083 = vst.msk [vmem:[#allocation4] sm:$0xf] %vm71_vm5, %v4075_v45  ;;  %v4045_v6 = vadd.f32 %v8392_v16, %v4023_v5  ;;  %v4024_v31 = vadd.f32 %v3969_v43, %v8279_v56  ;;  %v3971_v41 = vpop.f32.mrb[231].mxu0  ;;  %4087 = vrot.lane.b32.xlu0 %v6080_v14, %s6859_s15 }
 0x4c5   :  { %v4046_v61 = vadd.f32 %v8392_v16, %v4024_v31  ;;  %v4061_v9 = vmax.f32 %v4045_v6, 0.0 }
 0x4c7   :  { %v4062_v3 = vmax.f32 %v4046_v61, 0.0 }
 0x4c8   :  { %v3974_v38 = vpop.f32.mrb[232].mxu0 }
 0x4c9   :  { %v4076_v20 = vpack.c.bf16 %v4062_v3, %v4061_v9  ;;  %v4025_v1 = vadd.f32 %v3974_v38, %v8293_v36  ;;  %v3976_v29 = vpop.f32.mrb[233].mxu0  ;;  %v6081_v54 = vpack.c.bf16 %v4062_v3, %v4062_v3 }
 0x4ca   :  { %v3977_v56 = vpop.f32.mrb[234].mxu0 }
 0x4cb   :  { %4092 = vst.msk [vmem:[#allocation4 + $0x4] sm:$0xf] %vm71_vm5, %v4076_v20  ;;  %v4047_v39 = vadd.f32 %v8392_v16, %v4025_v1  ;;  %v4026_v10 = vadd.f32 %v3977_v56, %v8299_v63  ;;  %v3979_v53 = vpop.f32.mrb[235].mxu0  ;;  %4096 = vrot.lane.b32.xlu0 %v6081_v54, %s6859_s15 }
 0x4cd   :  { %v4048_v57 = vadd.f32 %v8392_v16, %v4026_v10  ;;  %v4063_v17 = vmax.f32 %v4047_v39, 0.0 }
 0x4cf   :  { %v4064_v44 = vmax.f32 %v4048_v57, 0.0 }
 0x4d0   :  { %v3982_v40 = vpop.f32.mrb[236].mxu0 }
 0x4d1   :  { %v4077_v50 = vpack.c.bf16 %v4064_v44, %v4063_v17  ;;  %v4027_v36 = vadd.f32 %v3982_v40, %v8313_v27  ;;  %v3984_v18 = vpop.f32.mrb[237].mxu0  ;;  %v6082_v55 = vpack.c.bf16 %v4064_v44, %v4064_v44 }
 0x4d2   :  { %v3985_v11 = vpop.f32.mrb[238].mxu0 }
 0x4d3   :  { %4100 = vst.msk [vmem:[#allocation4 + $0x8] sm:$0xf] %vm71_vm5, %v4077_v50  ;;  %v4049_v12 = vadd.f32 %v8392_v16, %v4027_v36  ;;  %v4028_v63 = vadd.f32 %v3985_v11, %v8319_v47  ;;  %v3987_v4 = vpop.f32.mrb[239].mxu0  ;;  %4104 = vrot.lane.b32.xlu1 %v6082_v55, %s6859_s15 }
 0x4d4   :  { %v6608_v4 = vld [vmem:[%s8894_s7 + $0x114] ss:$8 sps:$4 sm:$0xff]  }
 0x4d5   :  { %v4050_v62 = vadd.f32 %v8392_v16, %v4028_v63  ;;  %v4065_v25 = vmax.f32 %v4049_v12, 0.0  ;;  %v6603_v63 = vld [vmem:[%s8894_s7 + $0x100] ss:$8 sps:$4 sm:$0xff]  }
 0x4d7   :  { %v4066_v52 = vmax.f32 %v4050_v62, 0.0  ;;  %v6606_v62 = vld [vmem:[%s8894_s7 + $0x110] ss:$8 sps:$4 sm:$0xff]  }
 0x4d8   :  { %v3990_v15 = vpop.f32.mrb[240].mxu0 }
 0x4d9   :  { %v4078_v22 = vpack.c.bf16 %v4066_v52, %v4065_v25  ;;  %v4029_v27 = vadd.f32 %v3990_v15, %v8333_v33  ;;  %v3992_v49 = vpop.f32.mrb[241].mxu0  ;;  %v6083_v59 = vpack.c.bf16 %v4066_v52, %v4066_v52  ;;  %v6611_v25 = vld [vmem:[%s8894_s7 + $0x124] ss:$8 sps:$4 sm:$0xff]   ;;  %v6609_v15 = vld [vmem:[%s8894_s7 + $0x120] ss:$8 sps:$4 sm:$0xff]  }
 0x4da   :  { %v3993_v32 = vpop.f32.mrb[242].mxu0  ;;  %v6617_v49 = vld [vmem:[%s8894_s7 + $0x144] ss:$8 sps:$4 sm:$0xff]  }
 0x4db   :  { %4108 = vst.msk [vmem:[#allocation4 + $0xc] sm:$0xf] %vm71_vm5, %v4078_v22  ;;  %v4051_v2 = vadd.f32 %v8392_v16, %v4029_v27  ;;  %v4030_v47 = vadd.f32 %v3993_v32, %v8339_v58  ;;  %v3995_v7 = vpop.f32.mrb[243].mxu0  ;;  %4112 = vrot.lane.b32.xlu1 %v6083_v59, %s6859_s15  ;;  %v6614_v22 = vld [vmem:[%s8894_s7 + $0x134] ss:$8 sps:$4 sm:$0xff]  }
 0x4dc   :  { %v6612_v27 = vld [vmem:[%s8894_s7 + $0x130] ss:$8 sps:$4 sm:$0xff]   ;;  %v6622_v7 = vld [vmem:[%s8894_s7 + $0x154] ss:$8 sps:$4 sm:$0xff]  }
 0x4dd   :  { %v4052_v46 = vadd.f32 %v8392_v16, %v4030_v47  ;;  %v4067_v21 = vmax.f32 %v4051_v2, 0.0  ;;  %v6615_v2 = vld [vmem:[%s8894_s7 + $0x140] ss:$8 sps:$4 sm:$0xff]  }
 0x4df   :  { %v4068_v30 = vmax.f32 %v4052_v46, 0.0  ;;  %v6620_v46 = vld [vmem:[%s8894_s7 + $0x150] ss:$8 sps:$4 sm:$0xff]  }
 0x4e0   :  { %v3998_v48 = vpop.f32.mrb[244].mxu0 }
 0x4e1   :  { %v4079_v60 = vpack.c.bf16 %v4068_v30, %v4067_v21  ;;  %v4031_v33 = vadd.f32 %v3998_v48, %v8353_v26  ;;  %v4000_v23 = vpop.f32.mrb[245].mxu0  ;;  %v6084_v45 = vpack.c.bf16 %v4068_v30, %v4068_v30  ;;  %v6625_v21 = vld [vmem:[%s8894_s7 + $0x164] ss:$8 sps:$4 sm:$0xff]   ;;  %v6623_v48 = vld [vmem:[%s8894_s7 + $0x160] ss:$8 sps:$4 sm:$0xff]  }
 0x4e2   :  { %v4001_v5 = vpop.f32.mrb[246].mxu0  ;;  %v6631_v23 = vld [vmem:[%s8894_s7 + $0x184] ss:$8 sps:$4 sm:$0xff]  }
 0x4e3   :  { %4116 = vst.msk [vmem:[#allocation4 + $0x10] sm:$0xf] %vm71_vm5, %v4079_v60  ;;  %v4053_v42 = vadd.f32 %v8392_v16, %v4031_v33  ;;  %v4032_v58 = vadd.f32 %v4001_v5, %v8359_v19  ;;  %v4003_v14 = vpop.f32.mrb[247].mxu0  ;;  %4120 = vrot.lane.b32.xlu0 %v6084_v45, %s6859_s15  ;;  %v6628_v60 = vld [vmem:[%s8894_s7 + $0x174] ss:$8 sps:$4 sm:$0xff]  }
 0x4e4   :  { %v6626_v33 = vld [vmem:[%s8894_s7 + $0x170] ss:$8 sps:$4 sm:$0xff]   ;;  %v6629_v5 = vld [vmem:[%s8894_s7 + $0x180] ss:$8 sps:$4 sm:$0xff]   ;;  %v6637_v14 = vld [vmem:[%s8894_s7 + $0x1a4] ss:$8 sps:$4 sm:$0xff]  }
 0x4e5   :  { %v4054_v51 = vadd.f32 %v8392_v16, %v4032_v58  ;;  %v4069_v43 = vmax.f32 %v4053_v42, 0.0  ;;  %v6634_v42 = vld [vmem:[%s8894_s7 + $0x194] ss:$8 sps:$4 sm:$0xff]   ;;  %v6632_v58 = vld [vmem:[%s8894_s7 + $0x190] ss:$8 sps:$4 sm:$0xff]  }
 0x4e7   :  { %v4070_v6 = vmax.f32 %v4054_v51, 0.0 }
 0x4e8   :  { %v4006_v31 = vpop.f32.mrb[248].mxu0 }
 0x4e9   :  { %v4080_v41 = vpack.c.bf16 %v4070_v6, %v4069_v43  ;;  %v4033_v26 = vadd.f32 %v4006_v31, %v8367_v34  ;;  %v4008_v61 = vpop.f32.mrb[249].mxu0  ;;  %v6085_v9 = vpack.c.bf16 %v4070_v6, %v4070_v6  ;;  %v6635_v43 = vld [vmem:[%s8894_s7 + $0x1a0] ss:$8 sps:$4 sm:$0xff]   ;;  %v6640_v6 = vld [vmem:[%s8894_s7 + $0x1b4] ss:$8 sps:$4 sm:$0xff]  }
 0x4ea   :  { %v4009_v3 = vpop.f32.mrb[250].mxu0  ;;  %v6638_v31 = vld [vmem:[%s8894_s7 + $0x1b0] ss:$8 sps:$4 sm:$0xff]   ;;  %v6646_v61 = vld [vmem:[%s8894_s7 + $0x1d4] ss:$8 sps:$4 sm:$0xff]  }
 0x4eb   :  { %4124 = vst.msk [vmem:[#allocation4 + $0x14] sm:$0xf] %vm71_vm5, %v4080_v41  ;;  %v4055_v38 = vadd.f32 %v8392_v16, %v4033_v26  ;;  %v4034_v19 = vadd.f32 %v4009_v3, %v8370_v8  ;;  %v4011_v28 = vpop.f32.mrb[251].mxu0  ;;  %4128 = vrot.lane.b32.xlu1 %v6085_v9, %s6859_s15  ;;  %v6643_v41 = vld [vmem:[%s8894_s7 + $0x1c4] ss:$8 sps:$4 sm:$0xff]  }
 0x4ec   :  { %v6641_v26 = vld [vmem:[%s8894_s7 + $0x1c0] ss:$8 sps:$4 sm:$0xff]   ;;  %v6644_v9 = vld [vmem:[%s8894_s7 + $0x1d0] ss:$8 sps:$4 sm:$0xff]   ;;  %v6649_v3 = vld [vmem:[%s8894_s7 + $0x1e4] ss:$8 sps:$4 sm:$0xff]  }
 0x4ed   :  { %v4056_v20 = vadd.f32 %v8392_v16, %v4034_v19  ;;  %v4071_v1 = vmax.f32 %v4055_v38, 0.0  ;;  %v6647_v38 = vld [vmem:[%s8894_s7 + $0x1e0] ss:$8 sps:$4 sm:$0xff]   ;;  %v6652_v19 = vld [vmem:[%s8894_s7 + $0x1f4] ss:$8 sps:$4 sm:$0xff]  }
 0x4ee   :  { %v6650_v28 = vld [vmem:[%s8894_s7 + $0x1f0] ss:$8 sps:$4 sm:$0xff]  }
 0x4ef   :  { %v4072_v29 = vmax.f32 %v4056_v20, 0.0  ;;  %v6655_v20 = vld [vmem:[%s8894_s7 + $0x204] ss:$8 sps:$4 sm:$0xff]  }
 0x4f0   :  { %v4014_v54 = vpop.f32.mrb[252].mxu0 }
 0x4f1   :  { %v4081_v56 = vpack.c.bf16 %v4072_v29, %v4071_v1  ;;  %v4035_v34 = vadd.f32 %v4014_v54, %v8375_v24  ;;  %v4016_v39 = vpop.f32.mrb[253].mxu0  ;;  %v6086_v10 = vpack.c.bf16 %v4072_v29, %v4072_v29  ;;  %v6653_v29 = vld [vmem:[%s8894_s7 + $0x200] ss:$8 sps:$4 sm:$0xff]  }
 0x4f2   :  { %v4017_v53 = vpop.f32.mrb[254].mxu0  ;;  %v6753_v39 = vld [vmem:[%s8896_s9 + $0x40] sm:$0xff]  }
 0x4f3   :  { %4132 = vst.msk [vmem:[#allocation4 + $0x18] sm:$0xf] %vm71_vm5, %v4081_v56  ;;  %v4057_v57 = vadd.f32 %v8392_v16, %v4035_v34  ;;  %v4036_v8 = vadd.f32 %v4017_v53, %v8378_v13  ;;  %4136 = vrot.lane.b32.xlu0 %v6086_v10, %s6859_s15  ;;  %v4019_v17 = vpop.f32.mrb[255].mxu0  ;;  %v6660_v56 = vld [vmem:[%s8894_s7 + $0x214] ss:$8 sps:$4 sm:$0xff]   ;;  %v6754_v10 = vld [vmem:[%s8896_s9] sm:$0xff]   ;;  %6088 = vmatprep.subr.bf16.mxu0 %v6753_v39 }
 0x4f4   :  { %v6755_v53 = vld [vmem:[%s8896_s9 + $0x48] sm:$0xff]   ;;  %6089 = vmatpush3.bf16.msra.mxu0 %v6754_v10  ;;  %v6726_v39 = vld [vmem:[%s8894_s7 + $0x370] ss:$8 sps:$4 sm:$0xff]  }
 0x4f5   :  { %v4058_v44 = vadd.f32 %v8392_v16, %v4036_v8  ;;  %v4073_v40 = vmax.f32 %v4057_v57, 0.0  ;;  %v6658_v57 = vld [vmem:[%s8894_s7 + $0x210] ss:$8 sps:$4 sm:$0xff]   ;;  %v6663_v8 = vld [vmem:[%s8894_s7 + $0x224] ss:$8 sps:$4 sm:$0xff]   ;;  %6090 = vmatprep.subr.bf16.mxu0 %v6755_v53 }
 0x4f6   :  { %v6756_v17 = vld [vmem:[%s8896_s9 + $0x8] sm:$0xff]  }
 0x4f7   :  { %v4074_v50 = vmax.f32 %v4058_v44, 0.0  ;;  %v6757_v44 = vld [vmem:[%s8896_s9 + $0x50] sm:$0xff]   ;;  %v6731_v10 = vld [vmem:[%s8894_s7 + $0x384] ss:$8 sps:$4 sm:$0xff]   ;;  %v6729_v53 = vld [vmem:[%s8894_s7 + $0x380] ss:$8 sps:$4 sm:$0xff]  }
 0x4f8   :  { %6091 = vmatpush3.bf16.msra.mxu0 %v6756_v17  ;;  %v6737_v17 = vld [vmem:[%s8894_s7 + $0x3a4] ss:$8 sps:$4 sm:$0xff]  }
 0x4f9   :  { %v4082_v36 = vpack.c.bf16 %v4074_v50, %v4073_v40  ;;  %v6087_v18 = vpack.c.bf16 %v4074_v50, %v4074_v50  ;;  %v6661_v40 = vld [vmem:[%s8894_s7 + $0x220] ss:$8 sps:$4 sm:$0xff]   ;;  %v6666_v50 = vld [vmem:[%s8894_s7 + $0x234] ss:$8 sps:$4 sm:$0xff]   ;;  %6092 = vmatprep.subr.bf16.mxu0 %v6757_v44 }
 0x4fa   :  { %v6735_v44 = vld [vmem:[%s8894_s7 + $0x3a0] ss:$8 sps:$4 sm:$0xff]  }
 0x4fb   :  { %4140 = vst.msk [vmem:[#allocation4 + $0x1c] sm:$0xf] %vm71_vm5, %v4082_v36  ;;  %4144 = vrot.lane.b32.xlu1 %v6087_v18, %s6859_s15  ;;  %v6758_v36 = vld [vmem:[%s8896_s9 + $0x10] sm:$0xff]   ;;  %v6759_v18 = vld [vmem:[%s8896_s9 + $0x58] sm:$0xff]  }
 0x4fc   :  { %6093 = vmatpush3.bf16.msra.mxu0 %v6758_v36  ;;  %v6743_v36 = vld [vmem:[%s8894_s7 + $0x3c4] ss:$8 sps:$4 sm:$0xff]  }
 0x4fd   :  { %6094 = vmatprep.subr.bf16.mxu0 %v6759_v18  ;;  %v6741_v18 = vld [vmem:[%s8894_s7 + $0x3c0] ss:$8 sps:$4 sm:$0xff]  }
 0x535   :  { %v4088_v24 = vpop.permute.xlu0 %4087 }
 0x536   :  { %4091 = vst.msk [vmem:[#allocation4] sm:$0xf] %vm4090_vm6, %v4088_v24  ;;  %v6664_v24 = vld [vmem:[%s8894_s7 + $0x230] ss:$8 sps:$4 sm:$0xff]  }
 0x53d   :  { %v4097_v55 = vpop.permute.xlu0 %4096 }
 0x53e   :  { %4099 = vst.msk [vmem:[#allocation4 + $0x4] sm:$0xf] %vm4090_vm6, %v4097_v55  ;;  %v6669_v55 = vld [vmem:[%s8894_s7 + $0x244] ss:$8 sps:$4 sm:$0xff]  }
 0x545   :  { %v4105_v13 = vpop.permute.xlu1 %4104  ;;  %v4148_v11 = vld [vmem:[#allocation4] sm:$0xff] }
 0x546   :  { %4107 = vst.msk [vmem:[#allocation4 + $0x8] sm:$0xf] %vm4090_vm6, %v4105_v13  ;;  %v5918_v16 = vcombine.low %v4148_v11, %v4148_v11  ;;  %v5919_v12 = vcombine.high %v4148_v11, %v4148_v11  ;;  %v6760_v13 = vld [vmem:[%s8896_s9 + $0x18] sm:$0xff]   ;;  %v6761_v11 = vld [vmem:[%s8896_s9 + $0x60] sm:$0xff]  }
 0x547   :  { %6095 = vmatpush3.bf16.msra.mxu0 %v6760_v13  ;;  %v6749_v13 = vld [vmem:[%s8894_s7 + $0x3e4] ss:$8 sps:$4 sm:$0xff]  }
 0x548   :  { %4992 = vmatprep.mubr.bf16.mxu1 %v5919_v12  ;;  %v6672_v12 = vld [vmem:[%s8894_s7 + $0x254] ss:$8 sps:$4 sm:$0xff]   ;;  %6096 = vmatprep.subr.bf16.mxu0 %v6761_v11  ;;  %v6747_v11 = vld [vmem:[%s8894_s7 + $0x3e0] ss:$8 sps:$4 sm:$0xff]  }
 0x549   :  { %4993 = vmatmul.mubr.bf16.vlgmr.msra.gmra.mrb[64].mxu1 %v5918_v16  ;;  %v6667_v16 = vld [vmem:[%s8894_s7 + $0x240] ss:$8 sps:$4 sm:$0xff]  }
 0x54a   :  { %5002 = vmatpush1.bf16.msra.mxu1 %v6603_v63  ;;  %v6762_v63 = vld [vmem:[%s8896_s9 + $0x20] sm:$0xff]  }
 0x54b   :  { %5003 = vmatprep.subr.bf16.mxu1 %v6608_v4  ;;  %v6763_v4 = vld [vmem:[%s8896_s9 + $0x68] sm:$0xff]   ;;  %6097 = vmatpush3.bf16.msra.mxu0 %v6762_v63 }
 0x54c   :  { %6098 = vmatprep.subr.bf16.mxu0 %v6763_v4  ;;  %v6767_v4 = vld [vmem:[%s8896_s9 + $0x78] sm:$0xff]  }
 0x54d   :  { %v4113_v52 = vpop.permute.xlu1 %4112 }
 0x54e   :  { %4115 = vst.msk [vmem:[#allocation4 + $0xc] sm:$0xf] %vm4090_vm6, %v4113_v52  ;;  %5004 = vmatpush1.bf16.msra.mxu1 %v6606_v62  ;;  %v6670_v62 = vld [vmem:[%s8894_s7 + $0x250] ss:$8 sps:$4 sm:$0xff]   ;;  %v6764_v52 = vld [vmem:[%s8896_s9 + $0x28] sm:$0xff]  }
 0x54f   :  { %5005 = vmatprep.subr.bf16.mxu1 %v6611_v25  ;;  %v6675_v25 = vld [vmem:[%s8894_s7 + $0x264] ss:$8 sps:$4 sm:$0xff]   ;;  %6099 = vmatpush3.bf16.msra.mxu0 %v6764_v52 }
 0x552   :  { %5006 = vmatpush1.bf16.msra.mxu1 %v6609_v15  ;;  %v6765_v15 = vld [vmem:[%s8896_s9 + $0x70] sm:$0xff]  }
 0x553   :  { %5007 = vmatprep.subr.bf16.mxu1 %v6614_v22  ;;  %v6673_v22 = vld [vmem:[%s8894_s7 + $0x260] ss:$8 sps:$4 sm:$0xff]   ;;  %6100 = vmatprep.subr.bf16.mxu0 %v6765_v15 }
 0x555   :  { %v4121_v59 = vpop.permute.xlu0 %4120  ;;  %v8488_v32 = vld [vmem:[#allocation4 + $0x8] sm:$0xff] }
 0x556   :  { %4123 = vst.msk [vmem:[#allocation4 + $0x10] sm:$0xf] %vm4090_vm6, %v4121_v59  ;;  %5008 = vmatpush1.bf16.msra.mxu1 %v6612_v27  ;;  %v5921_v47 = vcombine.high %v8488_v32, %v8488_v32  ;;  %v5920_v54 = vcombine.low %v8488_v32, %v8488_v32  ;;  %v6678_v27 = vld [vmem:[%s8894_s7 + $0x274] ss:$8 sps:$4 sm:$0xff]   ;;  %v6676_v59 = vld [vmem:[%s8894_s7 + $0x270] ss:$8 sps:$4 sm:$0xff]  }
 0x557   :  { %5009 = vmatprep.subr.bf16.mxu1 %v6617_v49  ;;  %v6766_v49 = vld [vmem:[%s8896_s9 + $0x30] sm:$0xff]   ;;  %v6681_v32 = vld [vmem:[%s8894_s7 + $0x284] ss:$8 sps:$4 sm:$0xff]  }
 0x558   :  { %5033 = vmatprep.mubr.bf16.mxu1 %v5921_v47  ;;  %6101 = vmatpush3.bf16.msra.mxu0 %v6766_v49  ;;  %v6684_v47 = vld [vmem:[%s8894_s7 + $0x294] ss:$8 sps:$4 sm:$0xff]  }
 0x559   :  { %6102 = vmatprep.subr.bf16.mxu0 %v6767_v4 }
 0x55a   :  { %5010 = vmatpush1.bf16.msra.mxu1 %v6615_v2  ;;  %v6679_v2 = vld [vmem:[%s8894_s7 + $0x280] ss:$8 sps:$4 sm:$0xff]  }
 0x55b   :  { %5011 = vmatprep.subr.bf16.mxu1 %v6622_v7  ;;  %v6682_v7 = vld [vmem:[%s8894_s7 + $0x290] ss:$8 sps:$4 sm:$0xff]  }
 0x55d   :  { %v4129_v30 = vpop.permute.xlu1 %4128 }
 0x55e   :  { %4131 = vst.msk [vmem:[#allocation4 + $0x14] sm:$0xf] %vm4090_vm6, %v4129_v30  ;;  %5012 = vmatpush1.bf16.msra.mxu1 %v6620_v46  ;;  %v6687_v46 = vld [vmem:[%s8894_s7 + $0x2a4] ss:$8 sps:$4 sm:$0xff]   ;;  %v6690_v30 = vld [vmem:[%s8894_s7 + $0x2b4] ss:$8 sps:$4 sm:$0xff]  }
 0x55f   :  { %5013 = vmatprep.subr.bf16.mxu1 %v6625_v21  ;;  %v6685_v21 = vld [vmem:[%s8894_s7 + $0x2a0] ss:$8 sps:$4 sm:$0xff]  }
 0x562   :  { %5014 = vmatpush1.bf16.msra.mxu1 %v6623_v48  ;;  %v6688_v48 = vld [vmem:[%s8894_s7 + $0x2b0] ss:$8 sps:$4 sm:$0xff]  }
 0x563   :  { %5015 = vmatprep.subr.bf16.mxu1 %v6628_v60  ;;  %v6693_v60 = vld [vmem:[%s8894_s7 + $0x2c4] ss:$8 sps:$4 sm:$0xff]  }
 0x565   :  { %v4137_v45 = vpop.permute.xlu0 %4136  ;;  %v8568_v1 = vld [vmem:[#allocation4 + $0x10] sm:$0xff] }
 0x566   :  { %4139 = vst.msk [vmem:[#allocation4 + $0x18] sm:$0xf] %vm4090_vm6, %v4137_v45  ;;  %5016 = vmatpush1.bf16.msra.mxu1 %v6626_v33  ;;  %v5923_v34 = vcombine.high %v8568_v1, %v8568_v1  ;;  %v6691_v33 = vld [vmem:[%s8894_s7 + $0x2c0] ss:$8 sps:$4 sm:$0xff]   ;;  %v6694_v45 = vld [vmem:[%s8894_s7 + $0x2d0] ss:$8 sps:$4 sm:$0xff]  }
 0x567   :  { %5017 = vmatprep.subr.bf16.mxu1 %v6631_v23  ;;  %v6696_v23 = vld [vmem:[%s8894_s7 + $0x2d4] ss:$8 sps:$4 sm:$0xff]  }
 0x56a   :  { %5018 = vmatpush1.bf16.msra.mxu1 %v6629_v5  ;;  %v6699_v5 = vld [vmem:[%s8894_s7 + $0x2e4] ss:$8 sps:$4 sm:$0xff]  }
 0x56b   :  { %5019 = vmatprep.subr.bf16.mxu1 %v6634_v42  ;;  %v6697_v42 = vld [vmem:[%s8894_s7 + $0x2e0] ss:$8 sps:$4 sm:$0xff]  }
 0x56d   :  { %v4145_v51 = vpop.permute.xlu1 %4144 }
 0x56e   :  { %4147 = vst.msk [vmem:[#allocation4 + $0x1c] sm:$0xf] %vm4090_vm6, %v4145_v51  ;;  %5020 = vmatpush1.bf16.msra.mxu1 %v6632_v58  ;;  %v6702_v58 = vld [vmem:[%s8894_s7 + $0x2f4] ss:$8 sps:$4 sm:$0xff]   ;;  %v6705_v51 = vld [vmem:[%s8894_s7 + $0x304] ss:$8 sps:$4 sm:$0xff]  }
 0x56f   :  { %5021 = vmatprep.subr.bf16.mxu1 %v6637_v14  ;;  %v6700_v14 = vld [vmem:[%s8894_s7 + $0x2f0] ss:$8 sps:$4 sm:$0xff]  }
 0x572   :  { %5022 = vmatpush1.bf16.msra.mxu1 %v6635_v43 }
 0x573   :  { %5023 = vmatprep.subr.bf16.mxu1 %v6640_v6  ;;  %v6703_v6 = vld [vmem:[%s8894_s7 + $0x300] ss:$8 sps:$4 sm:$0xff]  }
 0x575   :  { %v8712_v43 = vld [vmem:[#allocation4 + $0x18] sm:$0xff] }
 0x576   :  { %5024 = vmatpush1.bf16.msra.mxu1 %v6638_v31  ;;  %v5922_v31 = vcombine.low %v8568_v1, %v8568_v1  ;;  %v6722_v1 = vld [vmem:[%s8894_s7 + $0x354] ss:$8 sps:$4 sm:$0xff]   ;;  %v5924_v63 = vcombine.low %v8712_v43, %v8712_v43 }
 0x577   :  { %5025 = vmatprep.subr.bf16.mxu1 %v6643_v41  ;;  %v6710_v41 = vld [vmem:[%s8894_s7 + $0x314] ss:$8 sps:$4 sm:$0xff]  }
 0x57a   :  { %5026 = vmatpush1.bf16.msra.mxu1 %v6641_v26  ;;  %v5925_v26 = vcombine.high %v8712_v43, %v8712_v43 }
 0x57b   :  { %5027 = vmatprep.subr.bf16.mxu1 %v6646_v61  ;;  %v6708_v61 = vld [vmem:[%s8894_s7 + $0x310] ss:$8 sps:$4 sm:$0xff]  }
 0x57e   :  { %5028 = vmatpush1.bf16.msra.mxu1 %v6644_v9  ;;  %v6713_v9 = vld [vmem:[%s8894_s7 + $0x324] ss:$8 sps:$4 sm:$0xff]  }
 0x57f   :  { %5029 = vmatprep.subr.bf16.mxu1 %v6649_v3  ;;  %v6711_v3 = vld [vmem:[%s8894_s7 + $0x320] ss:$8 sps:$4 sm:$0xff]  }
 0x582   :  { %5030 = vmatpush1.bf16.msra.mxu1 %v6647_v38  ;;  %v6716_v38 = vld [vmem:[%s8894_s7 + $0x334] ss:$8 sps:$4 sm:$0xff]  }
 0x583   :  { %5031 = vmatprep.subr.bf16.mxu1 %v6652_v19  ;;  %v6714_v19 = vld [vmem:[%s8894_s7 + $0x330] ss:$8 sps:$4 sm:$0xff]  }
 0x586   :  { %5032 = vmatpush1.bf16.msra.mxu1 %v6650_v28  ;;  %v6719_v28 = vld [vmem:[%s8894_s7 + $0x344] ss:$8 sps:$4 sm:$0xff]  }
 0x587   :  { %5042 = vmatprep.subr.bf16.mxu1 %v6655_v20  ;;  %v6717_v20 = vld [vmem:[%s8894_s7 + $0x340] ss:$8 sps:$4 sm:$0xff]  }
 0x589   :  { %5034 = vmatmul.mubr.bf16.vlgmr.msra.gmra.mrb[64].mxu1 %v5920_v54  ;;  %v6725_v54 = vld [vmem:[%s8894_s7 + $0x364] ss:$8 sps:$4 sm:$0xff]  }
 0x58a   :  { %5043 = vmatpush1.bf16.msra.mxu1 %v6653_v29  ;;  %5074 = vmatprep.mubr.bf16.mxu1 %v5923_v34  ;;  %v6720_v29 = vld [vmem:[%s8894_s7 + $0x350] ss:$8 sps:$4 sm:$0xff]   ;;  %v6728_v34 = vld [vmem:[%s8894_s7 + $0x374] ss:$8 sps:$4 sm:$0xff]  }
 0x58b   :  { %5044 = vmatprep.subr.bf16.mxu1 %v6660_v56  ;;  %v6723_v56 = vld [vmem:[%s8894_s7 + $0x360] ss:$8 sps:$4 sm:$0xff]  }
 0x58e   :  { %5045 = vmatpush1.bf16.msra.mxu1 %v6658_v57  ;;  %v6734_v57 = vld [vmem:[%s8894_s7 + $0x394] ss:$8 sps:$4 sm:$0xff]  }
 0x58f   :  { %5046 = vmatprep.subr.bf16.mxu1 %v6663_v8  ;;  %v6732_v8 = vld [vmem:[%s8894_s7 + $0x390] ss:$8 sps:$4 sm:$0xff]  }
 0x592   :  { %5047 = vmatpush1.bf16.msra.mxu1 %v6661_v40  ;;  %v6740_v40 = vld [vmem:[%s8894_s7 + $0x3b4] ss:$8 sps:$4 sm:$0xff]  }
 0x593   :  { %5048 = vmatprep.subr.bf16.mxu1 %v6666_v50  ;;  %v6738_v50 = vld [vmem:[%s8894_s7 + $0x3b0] ss:$8 sps:$4 sm:$0xff]  }
 0x596   :  { %5049 = vmatpush1.bf16.msra.mxu1 %v6664_v24  ;;  %v6746_v24 = vld [vmem:[%s8894_s7 + $0x3d4] ss:$8 sps:$4 sm:$0xff]  }
 0x597   :  { %5050 = vmatprep.subr.bf16.mxu1 %v6669_v55  ;;  %v6744_v55 = vld [vmem:[%s8894_s7 + $0x3d0] ss:$8 sps:$4 sm:$0xff]  }
 0x59a   :  { %5051 = vmatpush1.bf16.msra.mxu1 %v6667_v16  ;;  %v6752_v16 = vld [vmem:[%s8894_s7 + $0x3f4] ss:$8 sps:$4 sm:$0xff]  }
 0x59b   :  { %5052 = vmatprep.subr.bf16.mxu1 %v6672_v12  ;;  %v6750_v12 = vld [vmem:[%s8894_s7 + $0x3f0] ss:$8 sps:$4 sm:$0xff]  }
 0x59e   :  { %5053 = vmatpush1.bf16.msra.mxu1 %v6670_v62  ;;  %v6768_v62 = vld [vmem:[%s8896_s9 + $0x38] sm:$0xff]  }
 0x59f   :  { %5054 = vmatprep.subr.bf16.mxu1 %v6675_v25  ;;  %6103 = vmatpush3.bf16.msra.mxu0 %v6768_v62  ;;  %v4280_v25 = vld [vmem:[%s8895_s8] sm:$0x3] }
 0x5a0   :  { %6119 = vmatprep.subr.bf16.mxu0 %v6857_v0  ;;  %v4285_v52 = vrot.slane %v4280_v25, %v7041_v35  ;;  %v4289_v15 = vrot.slane %v4280_v25, %v7046_v37  ;;  %v6770_v35 = vld [vmem:[%s8898_s11 + $0x8] sm:$0xff]   ;;  %v6771_v37 = vld [vmem:[%s8898_s11 + $0x10] sm:$0xff]  }
 0x5a2   :  { %5055 = vmatpush1.bf16.msra.mxu1 %v6673_v22 }
 0x5a3   :  { %5056 = vmatprep.subr.bf16.mxu1 %v6678_v27 }
 0x5a6   :  { %5057 = vmatpush1.bf16.msra.mxu1 %v6676_v59 }
 0x5a7   :  { %5058 = vmatprep.subr.bf16.mxu1 %v6681_v32 }
 0x5aa   :  { %5059 = vmatpush1.bf16.msra.mxu1 %v6679_v2 }
 0x5ab   :  { %5060 = vmatprep.subr.bf16.mxu1 %v6684_v47 }
 0x5ae   :  { %5061 = vmatpush1.bf16.msra.mxu1 %v6682_v7 }
 0x5af   :  { %5062 = vmatprep.subr.bf16.mxu1 %v6687_v46 }
 0x5b2   :  { %5063 = vmatpush1.bf16.msra.mxu1 %v6685_v21  ;;  %v6769_v21 = vld [vmem:[%s8898_s11] sm:$0xff]  }
 0x5b3   :  { %5064 = vmatprep.subr.bf16.mxu1 %v6690_v30 }
 0x5b6   :  { %5065 = vmatpush1.bf16.msra.mxu1 %v6688_v48  ;;  %v6772_v48 = vld [vmem:[%s8898_s11 + $0x18] sm:$0xff]  }
 0x5b7   :  { %5066 = vmatprep.subr.bf16.mxu1 %v6693_v60  ;;  %v6773_v60 = vld [vmem:[%s8898_s11 + $0x20] sm:$0xff]  }
 0x5ba   :  { %5067 = vmatpush1.bf16.msra.mxu1 %v6691_v33  ;;  %v6774_v33 = vld [vmem:[%s8898_s11 + $0x28] sm:$0xff]  }
 0x5bb   :  { %5068 = vmatprep.subr.bf16.mxu1 %v6696_v23  ;;  %v6775_v23 = vld [vmem:[%s8898_s11 + $0x30] sm:$0xff]  }
 0x5be   :  { %5069 = vmatpush1.bf16.msra.mxu1 %v6694_v45  ;;  %v6776_v45 = vld [vmem:[%s8898_s11 + $0x38] sm:$0xff]   ;;  %s5424_s11 = sshll.u32 %s6861_s22, 4  ;;  %s5425_s11 = int_to_ptr.vmem [resolvable:$true] %s5424_s11 }
 0x5bf   :  { %5070 = vmatprep.subr.bf16.mxu1 %v6699_v5  ;;  %s6804_s23 = scalar_lea.vmem %s5425_s11, 128  ;;  %p6809_p9 = scmp.lt.s32.totalorder %s5425_s11, %s5425_s11 }
 0x5c0   :  { %p6805_p8 = scmp.ne.s32.totalorder %s5425_s11, %s6804_s23  ;;  %p6810_p10 = scmp.lt.s32.totalorder %s6804_s23, %s6804_s23 }
 0x5c2   :  { %5071 = vmatpush1.bf16.msra.mxu1 %v6697_v42  ;;  %v6054_v42 = vld [vmem:[%s8897_s10] ss:$0 sm:$0xff]  ;;  %p6811_p11 = por %p6810_p10, %p6809_p9 }
 0x5c3   :  { %5072 = vmatprep.subr.bf16.mxu1 %v6702_v58 }
 0x5c4   :  { %p6812_p12 = pnand %p6811_p11, %p6805_p8 }
 0x5c6   :  { %5073 = vmatpush1.bf16.msra.mxu1 %v6700_v14 }
 0x5c7   :  { %5083 = vmatprep.subr.bf16.mxu1 %v6705_v51 }
 0x5c9   :  { %5075 = vmatmul.mubr.bf16.vlgmr.msra.gmra.mrb[64].mxu1 %v5922_v31 }
 0x5ca   :  { %5084 = vmatpush1.bf16.msra.mxu1 %v6703_v6  ;;  %5115 = vmatprep.mubr.bf16.mxu1 %v5925_v26 }
 0x5cb   :  { %5085 = vmatprep.subr.bf16.mxu1 %v6710_v41 }
 0x5ce   :  { %5086 = vmatpush1.bf16.msra.mxu1 %v6708_v61 }
 0x5cf   :  { %5087 = vmatprep.subr.bf16.mxu1 %v6713_v9 }
 0x5d2   :  { %5088 = vmatpush1.bf16.msra.mxu1 %v6711_v3 }
 0x5d3   :  { %5089 = vmatprep.subr.bf16.mxu1 %v6716_v38 }
 0x5d6   :  { %5090 = vmatpush1.bf16.msra.mxu1 %v6714_v19 }
 0x5d7   :  { %5091 = vmatprep.subr.bf16.mxu1 %v6719_v28 }
 0x5da   :  { %5092 = vmatpush1.bf16.msra.mxu1 %v6717_v20 }
 0x5db   :  { %5093 = vmatprep.subr.bf16.mxu1 %v6722_v1 }
 0x5de   :  { %5094 = vmatpush1.bf16.msra.mxu1 %v6720_v29 }
 0x5df   :  { %5095 = vmatprep.subr.bf16.mxu1 %v6725_v54 }
 0x5e2   :  { %5096 = vmatpush1.bf16.msra.mxu1 %v6723_v56 }
 0x5e3   :  { %5097 = vmatprep.subr.bf16.mxu1 %v6728_v34 }
 0x5e6   :  { %5098 = vmatpush1.bf16.msra.mxu1 %v6726_v39 }
 0x5e7   :  { %5099 = vmatprep.subr.bf16.mxu1 %v6731_v10 }
 0x5ea   :  { %5100 = vmatpush1.bf16.msra.mxu1 %v6729_v53 }
 0x5eb   :  { %5101 = vmatprep.subr.bf16.mxu1 %v6734_v57 }
 0x5ee   :  { %5102 = vmatpush1.bf16.msra.mxu1 %v6732_v8 }
 0x5ef   :  { %5103 = vmatprep.subr.bf16.mxu1 %v6737_v17 }
 0x5f2   :  { %5104 = vmatpush1.bf16.msra.mxu1 %v6735_v44 }
 0x5f3   :  { %5105 = vmatprep.subr.bf16.mxu1 %v6740_v40 }
 0x5f6   :  { %5106 = vmatpush1.bf16.msra.mxu1 %v6738_v50 }
 0x5f7   :  { %5107 = vmatprep.subr.bf16.mxu1 %v6743_v36 }
 0x5fa   :  { %5108 = vmatpush1.bf16.msra.mxu1 %v6741_v18 }
 0x5fb   :  { %5109 = vmatprep.subr.bf16.mxu1 %v6746_v24 }
 0x5fe   :  { %5110 = vmatpush1.bf16.msra.mxu1 %v6744_v55 }
 0x5ff   :  { %5111 = vmatprep.subr.bf16.mxu1 %v6749_v13 }
 0x602   :  { %5112 = vmatpush1.bf16.msra.mxu1 %v6747_v11 }
 0x603   :  { %5113 = vmatprep.subr.bf16.mxu1 %v6752_v16 }
 0x606   :  { %5114 = vmatpush1.bf16.msra.mxu1 %v6750_v12 }
 0x609   :  { %5116 = vmatmul.mubr.bf16.vlgmr.msra.gmra.mrb[64].mxu1 %v5924_v63 }
 0x6dc   :  { %v5117_v22 = vpop.f32.mrb[64].mxu1 }
 0x6dd   :  { %v6171_v27 = vadd.f32 %v5117_v22, %v4285_v52  ;;  %v5119_v49 = vpop.f32.mrb[65].mxu1 }
 0x6de   :  { %v6172_v59 = vadd.f32 %v5119_v49, %v4289_v15  ;;  %v5121_v32 = vpop.f32.mrb[66].mxu1 }
 0x6df   :  { %v5124_v2 = vmax.f32 %v6171_v27, 0.0  ;;  %v5122_v47 = vpop.f32.mrb[67].mxu1 }
 0x6e0   :  { %v5125_v7 = vmax.f32 %v6172_v59, 0.0 }
 0x6e1   :  { %v5126_v30 = vpack.c.bf16 %v5124_v2, %v5124_v2 }
 0x6e2   :  { %v5127_v46 = vpack.c.bf16 %v5125_v7, %v5125_v7 }
 0x6e4   :  { %5295 = vmatprep.mubr.bf16.mxu0 %v5127_v46 }
 0x6e5   :  { %5296 = vmatmul.mubr.bf16.vlgmr.msra.gmra.mrb[0].mxu0 %v5126_v30 }
 0x6e6   :  { %6120 = vmatpush3.bf16.msra.mxu0 %v6769_v21  ;;  %6135 = vmatprep.mubr.msk.bf16.mxu0 %vm6860_vm7, %v6857_v0 }
 0x6e7   :  { %6121 = vmatprep.subr.bf16.mxu0 %v6857_v0 }
 0x6ea   :  { %6122 = vmatpush3.bf16.msra.mxu0 %v6770_v35 }
 0x6eb   :  { %6123 = vmatprep.subr.bf16.mxu0 %v6857_v0 }
 0x6ee   :  { %6124 = vmatpush3.bf16.msra.mxu0 %v6771_v37 }
 0x6ef   :  { %6125 = vmatprep.subr.bf16.mxu0 %v6857_v0 }
 0x6f2   :  { %6126 = vmatpush3.bf16.msra.mxu0 %v6772_v48 }
 0x6f3   :  { %6127 = vmatprep.subr.bf16.mxu0 %v6857_v0 }
 0x6f6   :  { %6128 = vmatpush3.bf16.msra.mxu0 %v6773_v60 }
 0x6f7   :  { %6129 = vmatprep.subr.bf16.mxu0 %v6857_v0 }
 0x6fa   :  { %6130 = vmatpush3.bf16.msra.mxu0 %v6774_v33 }
 0x6fb   :  { %6131 = vmatprep.subr.bf16.mxu0 %v6857_v0 }
 0x6fe   :  { %6132 = vmatpush3.bf16.msra.mxu0 %v6775_v23 }
 0x6ff   :  { %6133 = vmatprep.subr.bf16.mxu0 %v6857_v0 }
 0x702   :  { %6134 = vmatpush3.bf16.msra.mxu0 %v6776_v45 }
 0x7b8   :  { %v6104_v5 = vpop.f32.mrb[0].mxu0 }
 0x7b9   :  { %v6105_v58 = vpop.f32.mrb[1].mxu0 }
 0x7ba   :  { %v6106_v14 = vadd.f32 %v6105_v58, %v6104_v5  ;;  %v6107_v51 = vpop.f32.mrb[2].mxu0 }
 0x7bb   :  { %v6108_v43 = vpop.f32.mrb[3].mxu0 }
 0x7bc   :  { %v5298_v6 = vadd.f32 %v6106_v14, %v6054_v42 }
 0x7be   :  { %v5303_v31 = vmax.f32 %v5298_v6, 0.0 }
 0x7c0   :  { %v5305_v41 = vpack.c.bf16 %v5303_v31, %v5303_v31  ;;  %5304 = vst [vmem:[#allocation8] sm:$0xff] %v5303_v31 }
 0x7c2   :  { %6136 = vmatmul.mubr.bf16.vlgmr.msra.gmra.mrb[4].mxu0 %v5305_v41 }
 0x7c3   :  { %6815 = shalt.err (!%p6812_p12)
}
 0x7c4   :  { %s6816_s6 = scalar_lea.hbm %s8900_s13, 128 }
 0x7c5   :  { %p6817_p13 = scmp.ne.s32.totalorder %s8900_s13, %s6816_s6  ;;  %p6820_p0 = scmp.lt.u32.totalorder %s6816_s6, %s8900_s13 }
 0x7c7   :  { %p6822_p1 = pnand %p6820_p0, %p6817_p13 }
 0x7c9   :  { %6825 = shalt.err (!%p6822_p1)
}
 0x7ca   :  { %5427 = dma.vmem_to_hbm [thread:$0]  %s5425_s11, 128, %s8900_s13, [#allocation7]   ;;  %v6071_v0 = vld [vmem:[%s8899_s12] ss:$0 sm:$0xff] }
 0x7cb   :  { %s6862_s28 = smov [#allocation9]  }
 0x7cc   :  { %s5434_s29 = sshll.u32 %s6862_s28, 4  ;;  %s5435_s29 = int_to_ptr.vmem [resolvable:$true] %s5434_s29 }
 0x7cd   :  { %s6826_s15 = scalar_lea.vmem %s5435_s29, 128  ;;  %p6831_p3 = scmp.lt.s32.totalorder %s5435_s29, %s5435_s29 }
 0x7ce   :  { %p6827_p2 = scmp.ne.s32.totalorder %s5435_s29, %s6826_s15  ;;  %p6832_p4 = scmp.lt.s32.totalorder %s6826_s15, %s6826_s15 }
 0x7d0   :  { %p6833_p5 = por %p6832_p4, %p6831_p3 }
 0x7d2   :  { %p6834_p6 = pnand %p6833_p5, %p6827_p2 }
 0x895   :  { %v5411_v26 = vpop.f32.mrb[4].mxu0 }
 0x896   :  { %v5412_v61 = vadd.f32 %v6071_v0, %v5411_v26  ;;  %v6137_v9 = vpop.f32.mrb[5].mxu0 }
 0x897   :  { %v5414_v3 = vpop.f32.mrb[6].mxu0 }
 0x898   :  { %5417 = vst [vmem:[#allocation9] sm:$0xff] %v5412_v61  ;;  %v6138_v38 = vpop.f32.mrb[7].mxu0 }
 0x899   :  { %6837 = shalt.err (!%p6834_p6)
}
 0x89a   :  { %s6838_s12 = scalar_lea.hbm %s8901_s14, 128 }
 0x89b   :  { %p6839_p7 = scmp.ne.s32.totalorder %s8901_s14, %s6838_s12  ;;  %p6842_p8 = scmp.lt.u32.totalorder %s6838_s12, %s8901_s14 }
 0x89d   :  { %p6844_p9 = pnand %p6842_p8, %p6839_p7 }
 0x89f   :  { %6847 = shalt.err (!%p6844_p9)
}
 0x8a0   :  { %5437 = dma.vmem_to_hbm [thread:$0]  %s5435_s29, 128, %s8901_s14, [#allocation10]  }
 0x8a1   :  { %6850 = dma.done.wait [#allocation7], 128  }
 0x8a2   :  { %6851 = vsyncadd [#allocation7], 4294967168 }
 0x8a3   :  { %6852 = dma.done.wait [#allocation10], 128  }
 0x8a4   :  { %6853 = vsyncadd [#allocation10], 4294967168 }
 0x8a5   :  { %5444 = vsyncpa [#allocation6], 1 }
 0x8a6   :  { %5445 = vsyncpa [#allocation7], 1 }
 0x8a7   :  { %5446 = vsyncpa [#allocation10], 1 }

</bundles_post_ra>
